<compile_context>
chip_gen: v6e
topology: v6e:2x2x1
jax: 0.10.0
libtpu: 0.0.40
codegen_flags: <defaults>
</compile_context>

<pallas_src>
import functools

import jax
import jax.numpy as jnp
from jax import lax
from jax.experimental import pallas as pl
from jax.experimental.pallas import tpu as pltpu


def _round_up(x, m):
    return (x + m - 1) // m * m


def _vmem_capacity_bytes():
    """Physical VMEM per TensorCore, with a conservative fallback (v7x = 64 MiB)."""
    try:
        info = pltpu.get_tpu_info()
        for name in ("vmem_capacity_bytes", "vmem_bytes", "vmem_size_bytes"):
            v = getattr(info, name, None)
            if v:
                return int(v)
    except Exception:
        pass
    return 64 * 2**20


def _aspp_kernel(x_ref, w_ref, b_ref, o_ref, lhs_ref, *,
                 taps, tHo, Wout, Cin, Cp, min_sy, pad_lft, row_off):
    """One grid step = one (batch image, tile of tHo output rows).

    x_ref  : (Hp, Wp, Cin)    bf16 padded image, resident across the h axis
    w_ref  : (Ktot, Cp)       bf16 K-concatenated (fused) tap weights
    b_ref  : (1, Cp)          f32  summed bias
    o_ref  : (tHo, Wout, Cp)  bf16 output tile (N axis squeezed)
    lhs_ref: (tHo*Wout, Ktot) bf16 staging buffer for the fused-K LHS
    """
    h = pl.program_id(1)
    rows = tHo * Wout
    r_base = h * tHo + row_off

    # Stage every surviving tap's patch into its K-band: one matmul at
    # K = n_taps*Cin fills the MXU instead of n_taps matmuls at K = Cin, and
    # there is no per-tap f32 accumulator read-modify-write anymore.
    for t, (sy, sx) in enumerate(taps):
        r0 = r_base + (sy - min_sy)
        c0 = pad_lft + sx
        patch = x_ref[pl.ds(r0, tHo), c0:c0 + Wout, :]
        lhs_ref[:, t * Cin:(t + 1) * Cin] = patch.reshape(rows, Cin)

    acc = jnp.dot(lhs_ref[...], w_ref[...], preferred_element_type=jnp.float32)
    acc = acc + b_ref[...]                                # summed bias, added once
    o_ref[...] = acc.reshape(tHo, Wout, Cp).astype(o_ref.dtype)


def classifier_module_forward(x_nchw, weights_oihw, biases, dilations, paddings):
    """Pallas forward. x_nchw: (N, Cin, H, W); weights_oihw: list of
    (Cout, Cin, 3, 3); biases: list of (Cout,). Returns (N, Cout, Hout, Wout)."""
    N, Cin, H, W = x_nchw.shape
    Cout = weights_oihw[0].shape[0]
    assert len(weights_oihw) == len(biases) == len(dilations) == len(paddings)

    # All branches must produce the same spatial size for the sum to be valid.
    c = int(paddings[0]) - int(dilations[0])
    for d, p in zip(dilations, paddings):
        assert int(p) - int(d) == c, "branches must share output size (p-d const)"
    Hout, Wout = H + 2 * c, W + 2 * c
    assert Hout > 0 and Wout > 0

    # --- trace-time tap analysis: drop all-zero taps, fuse coincident ones ---
    tap_w = {}
    for wi, d, p in zip(weights_oihw, dilations, paddings):
        d, p = int(d), int(p)
        wi = jnp.asarray(wi, jnp.float32)
        wi = wi.astype(jnp.bfloat16).astype(jnp.float32)   # match kernel dtype
        for ky in range(3):
            for kx in range(3):
                sy = ky * d - p
                sx = kx * d - p
                # Tap reads only the zero halo everywhere -> contributes 0.
                if not (-Hout < sy < H and -Wout < sx < W):
                    continue
                wmat = jnp.transpose(wi[:, :, ky, kx], (1, 0))   # (Cin, Cout)
                key = (sy, sx)
                tap_w[key] = wmat if key not in tap_w else tap_w[key] + wmat
    taps = tuple(sorted(tap_w.keys()))
    n_taps = len(taps)

    b_total = jnp.sum(jnp.stack([jnp.asarray(b, jnp.float32) for b in biases]),
                      axis=0)

    if n_taps == 0:   # degenerate: every tap lands in the zero halo
        return jnp.broadcast_to(b_total.reshape(1, Cout, 1, 1),
                                (N, Cout, Hout, Wout))

    min_sy = min(s for s, _ in taps)
    max_sy = max(s for s, _ in taps)
    min_sx = min(s for _, s in taps)
    max_sx = max(s for _, s in taps)
    pad_top = max(0, -min_sy)
    pad_bot = max(0, max_sy + Hout - H)
    pad_lft = max(0, -min_sx)
    pad_rgt = max(0, max_sx + Wout - W)
    Hp = H + pad_top + pad_bot
    Wp = W + pad_lft + pad_rgt
    row_off = pad_top + min_sy                      # >= 0 by construction

    Cp = _round_up(max(Cout, 128), 128)             # lane-dense output channels
    Ktot = n_taps * Cin

    # --- choose the output-row tile from the per-generation VMEM budget ---
    vmem_cap = _vmem_capacity_bytes()
    budget = vmem_cap // 2                          # headroom for compiler scratch

    def step_bytes(tho):
        rows = tho * Wout
        return (2 * Hp * Wp * Cin * 2               # resident image block, dbl-buf
                + 2 * Ktot * Cp * 2                 # fused weights, dbl-buf
                + 2 * Cp * 4                        # bias
                + 2 * rows * Cp * 2                 # bf16 output block, dbl-buf
                + rows * Ktot * 2                   # fused-K LHS staging scratch
                + rows * Cp * 4)                    # f32 matmul result

    divisors = [t for t in range(1, Hout + 1) if Hout % t == 0]
    feasible = [t for t in divisors if step_bytes(t) <= budget]
    if not feasible:
        # TODO(synk): for feature maps too large to keep one padded image resident
        # in VMEM, fall back to a manually double-buffered halo-row-band DMA
        # (memory_space=pl.ANY input) instead of the resident-image BlockSpec.
        raise ValueError("input feature map too large for resident-image tiling")
    tHo = max(feasible)
    # Keep >= 4 total grid steps when it is free (the input stays resident across
    # the row axis) so a v7x megacore gets >= 2 steps per TensorCore.
    if N * (Hout // tHo) < 4:
        smaller = [t for t in feasible if N * (Hout // t) >= 4]
        if smaller:
            tHo = max(smaller)
    nH = Hout // tHo

    vmem_limit = int(min(max(2 * step_bytes(tHo), 32 * 2**20),
                         (3 * vmem_cap) // 4))

    # TODO(synk): fold this NCHW->NHWC transpose + halo zero-pad into the kernel's
    # input DMA (or accept NHWC upstream) to avoid an XLA pre-pass over the input.
    x_nhwc = jnp.transpose(jnp.asarray(x_nchw, jnp.float32),
                           (0, 2, 3, 1)).astype(jnp.bfloat16)
    xp = jnp.pad(x_nhwc, ((0, 0), (pad_top, pad_bot), (pad_lft, pad_rgt), (0, 0)))

    w_fused = jnp.concatenate([tap_w[k] for k in taps], axis=0)      # (Ktot, Cout)
    w_fused = jnp.pad(w_fused, ((0, 0), (0, Cp - Cout))).astype(jnp.bfloat16)
    b_pad = jnp.pad(b_total, (0, Cp - Cout)).reshape(1, Cp)

    kernel = functools.partial(
        _aspp_kernel, taps=taps, tHo=tHo, Wout=Wout, Cin=Cin, Cp=Cp,
        min_sy=min_sy, pad_lft=pad_lft, row_off=row_off)

    # TODO(synk): the grid-invariant weight/bias inputs are still default
    # double-buffered; switch their BlockSpecs to pipeline_mode=pl.Buffered(1)
    # (or a one-shot DMA into scratch) when Cin grows to backbone widths.
    out_nhwc = pl.pallas_call(
        kernel,
        out_shape=jax.ShapeDtypeStruct((N, Hout, Wout, Cp), jnp.bfloat16),
        grid_spec=pltpu.PrefetchScalarGridSpec(
            num_scalar_prefetch=0,
            grid=(N, nH),
            in_specs=[
                pl.BlockSpec((None, Hp, Wp, Cin), lambda n, h: (n, 0, 0, 0)),
                pl.BlockSpec((Ktot, Cp), lambda n, h: (0, 0)),
                pl.BlockSpec((1, Cp), lambda n, h: (0, 0)),
            ],
            out_specs=pl.BlockSpec((None, tHo, Wout, Cp),
                                   lambda n, h: (n, h, 0, 0)),
            scratch_shapes=[pltpu.VMEM((tHo * Wout, Ktot), jnp.bfloat16)],
        ),
        compiler_params=pltpu.CompilerParams(
            dimension_semantics=("parallel", "parallel"),
            vmem_limit_bytes=vmem_limit),
    )(xp, w_fused, b_pad)

    out = out_nhwc[..., :Cout].astype(jnp.float32)   # drop lane pad, back to f32
    return jnp.transpose(out, (0, 3, 1, 2))          # NHWC -> NCHW


def _reference_forward(x_nchw, weights_oihw, biases, dilations, paddings):
    """Plain-JAX reference (sum of dilated convs) for correctness checking."""
    out = None
    for wi, bi, d, p in zip(weights_oihw, biases, dilations, paddings):
        y = lax.conv_general_dilated(
            x_nchw, wi, window_strides=(1, 1),
            padding=((p, p), (p, p)), rhs_dilation=(d, d),
            dimension_numbers=('NCHW', 'OIHW', 'NCHW'),
            precision=lax.Precision.HIGHEST)
        y = y + bi[None, :, None, None]
        out = y if out is None else out + y
    return out


if __name__ == "__main__":
    # Small, deterministic configuration (DeepLab-style dilation series).
    N, Cin, H, W = 2, 32, 16, 16
    num_classes = 8
    dilation_series = [6, 12, 18, 24]
    padding_series = [6, 12, 18, 24]

    key = jax.random.PRNGKey(0)
    kx, *kws = jax.random.split(key, 1 + 2 * len(dilation_series))

    x = jax.random.normal(kx, (N, Cin, H, W), dtype=jnp.float32)

    weights = []
    biases = []
    for i in range(len(dilation_series)):
        kw, kb = kws[2 * i], kws[2 * i + 1]
        # matches m.weight.data.normal_(0, 0.01)
        weights.append(0.01 * jax.random.normal(
            kw, (num_classes, Cin, 3, 3), dtype=jnp.float32))
        # deterministic stand-in for PyTorch's default uniform bias init
        bound = 1.0 / jnp.sqrt(Cin * 3 * 3)
        biases.append(jax.random.uniform(
            kb, (num_classes,), dtype=jnp.float32, minval=-bound, maxval=bound))

    out = classifier_module_forward(x, weights, biases,
                                    dilation_series, padding_series)
    out = jax.block_until_ready(out)

    # Reference on the same bf16-rounded inputs (kernel runs the MXU in bf16 and
    # now also emits bf16 outputs, hence the slightly wider tolerance).
    x_r = x.astype(jnp.bfloat16).astype(jnp.float32)
    w_r = [w.astype(jnp.bfloat16).astype(jnp.float32) for w in weights]
    ref = _reference_forward(x_r, w_r, biases, dilation_series, padding_series)
    ref = jax.block_until_ready(ref)

    assert out.shape == (N, num_classes, H, W), out.shape
    max_err = float(jnp.max(jnp.abs(out - ref)))
    assert jnp.allclose(out, ref, atol=1e-2, rtol=1e-2), max_err

    print("KERNEL_OK")
</pallas_src>

<mosaic_0001>
module attributes {stable_mosaic.version = 11 : i64} {
  func.func @_aspp_kernel(%arg0: i32, %arg1: i32, %arg2: memref<1x40x40x32xbf16, #tpu.memory_space<vmem>>, %arg3: memref<544x128xbf16, #tpu.memory_space<vmem>>, %arg4: memref<1x128xf32, #tpu.memory_space<vmem>>, %arg5: memref<1x8x16x128xbf16, #tpu.memory_space<vmem>>, %arg6: memref<128x544xbf16, #tpu.memory_space<vmem>>) attributes {dimension_semantics = [#tpu.dimension_semantics<parallel>, #tpu.dimension_semantics<parallel>], iteration_bounds = array<i64: 2, 2>, scalar_prefetch = 0 : i64, scratch_operands = 1 : i64, tpu.core_type = #tpu.core_type<tc>, window_params = [{transform_indices = @transform_0, window_bounds = array<i64: 1, 40, 40, 32>}, {pipeline_mode = #tpu.pipeline_mode<synchronous>, transform_indices = @transform_1, window_bounds = array<i64: 544, 128>}, {pipeline_mode = #tpu.pipeline_mode<synchronous>, transform_indices = @transform_2, window_bounds = array<i64: 1, 128>}, {transform_indices = @transform_3, window_bounds = array<i64: 1, 8, 16, 128>}]} {
    %c8_i32 = arith.constant 8 : i32
    %0 = arith.muli %arg1, %c8_i32 : i32
    %c0_i32 = arith.constant 0 : i32
    %1 = arith.addi %0, %c0_i32 : i32
    %c0_i32_0 = arith.constant 0 : i32
    %2 = arith.addi %1, %c0_i32_0 : i32
    %c0 = arith.constant 0 : index
    %3 = arith.index_cast %2 : i32 to index
    %c0_1 = arith.constant 0 : index
    %c0_2 = arith.constant 0 : index
    %4 = vector.load %arg2[%c0, %3, %c0_1, %c0_2] : memref<1x40x40x32xbf16, #tpu.memory_space<vmem>>, vector<1x8x16x32xbf16>
    %5 = vector.shape_cast %4 : vector<1x8x16x32xbf16> to vector<8x16x32xbf16>
    %6 = vector.shape_cast %5 : vector<8x16x32xbf16> to vector<128x32xbf16>
    %c0_3 = arith.constant 0 : index
    %c0_4 = arith.constant 0 : index
    %7 = vector.load %arg6[%c0_3, %c0_4] : memref<128x544xbf16, #tpu.memory_space<vmem>>, vector<128x32xbf16>
    tpu.vector_store %arg6[%c0_3, %c0_4], %6 {strides = array<i32>} : memref<128x544xbf16, #tpu.memory_space<vmem>>, vector<128x32xbf16>,
    %c0_i32_5 = arith.constant 0 : i32
    %8 = arith.addi %1, %c0_i32_5 : i32
    %c0_6 = arith.constant 0 : index
    %9 = arith.index_cast %8 : i32 to index
    %c12 = arith.constant 12 : index
    %c0_7 = arith.constant 0 : index
    %10 = vector.load %arg2[%c0_6, %9, %c12, %c0_7] : memref<1x40x40x32xbf16, #tpu.memory_space<vmem>>, vector<1x8x16x32xbf16>
    %11 = vector.shape_cast %10 : vector<1x8x16x32xbf16> to vector<8x16x32xbf16>
    %12 = vector.shape_cast %11 : vector<8x16x32xbf16> to vector<128x32xbf16>
    %c0_8 = arith.constant 0 : index
    %c32 = arith.constant 32 : index
    %13 = vector.load %arg6[%c0_8, %c32] : memref<128x544xbf16, #tpu.memory_space<vmem>>, vector<128x32xbf16>
    tpu.vector_store %arg6[%c0_8, %c32], %12 {strides = array<i32>} : memref<128x544xbf16, #tpu.memory_space<vmem>>, vector<128x32xbf16>,
    %c0_i32_9 = arith.constant 0 : i32
    %14 = arith.addi %1, %c0_i32_9 : i32
    %c0_10 = arith.constant 0 : index
    %15 = arith.index_cast %14 : i32 to index
    %c24 = arith.constant 24 : index
    %c0_11 = arith.constant 0 : index
    %16 = vector.load %arg2[%c0_10, %15, %c24, %c0_11] : memref<1x40x40x32xbf16, #tpu.memory_space<vmem>>, vector<1x8x16x32xbf16>
    %17 = vector.shape_cast %16 : vector<1x8x16x32xbf16> to vector<8x16x32xbf16>
    %18 = vector.shape_cast %17 : vector<8x16x32xbf16> to vector<128x32xbf16>
    %c0_12 = arith.constant 0 : index
    %c64 = arith.constant 64 : index
    %19 = vector.load %arg6[%c0_12, %c64] : memref<128x544xbf16, #tpu.memory_space<vmem>>, vector<128x32xbf16>
    tpu.vector_store %arg6[%c0_12, %c64], %18 {strides = array<i32>} : memref<128x544xbf16, #tpu.memory_space<vmem>>, vector<128x32xbf16>,
    %c6_i32 = arith.constant 6 : i32
    %20 = arith.addi %1, %c6_i32 : i32
    %c0_13 = arith.constant 0 : index
    %21 = arith.index_cast %20 : i32 to index
    %c6 = arith.constant 6 : index
    %c0_14 = arith.constant 0 : index
    %22 = vector.load %arg2[%c0_13, %21, %c6, %c0_14] : memref<1x40x40x32xbf16, #tpu.memory_space<vmem>>, vector<1x8x16x32xbf16>
    %23 = vector.shape_cast %22 : vector<1x8x16x32xbf16> to vector<8x16x32xbf16>
    %24 = vector.shape_cast %23 : vector<8x16x32xbf16> to vector<128x32xbf16>
    %c0_15 = arith.constant 0 : index
    %c96 = arith.constant 96 : index
    %25 = vector.load %arg6[%c0_15, %c96] : memref<128x544xbf16, #tpu.memory_space<vmem>>, vector<128x32xbf16>
    tpu.vector_store %arg6[%c0_15, %c96], %24 {strides = array<i32>} : memref<128x544xbf16, #tpu.memory_space<vmem>>, vector<128x32xbf16>,
    %c6_i32_16 = arith.constant 6 : i32
    %26 = arith.addi %1, %c6_i32_16 : i32
    %c0_17 = arith.constant 0 : index
    %27 = arith.index_cast %26 : i32 to index
    %c12_18 = arith.constant 12 : index
    %c0_19 = arith.constant 0 : index
    %28 = vector.load %arg2[%c0_17, %27, %c12_18, %c0_19] : memref<1x40x40x32xbf16, #tpu.memory_space<vmem>>, vector<1x8x16x32xbf16>
    %29 = vector.shape_cast %28 : vector<1x8x16x32xbf16> to vector<8x16x32xbf16>
    %30 = vector.shape_cast %29 : vector<8x16x32xbf16> to vector<128x32xbf16>
    %c0_20 = arith.constant 0 : index
    %c128 = arith.constant 128 : index
    %31 = vector.load %arg6[%c0_20, %c128] : memref<128x544xbf16, #tpu.memory_space<vmem>>, vector<128x32xbf16>
    tpu.vector_store %arg6[%c0_20, %c128], %30 {strides = array<i32>} : memref<128x544xbf16, #tpu.memory_space<vmem>>, vector<128x32xbf16>,
    %c6_i32_21 = arith.constant 6 : i32
    %32 = arith.addi %1, %c6_i32_21 : i32
    %c0_22 = arith.constant 0 : index
    %33 = arith.index_cast %32 : i32 to index
    %c18 = arith.constant 18 : index
    %c0_23 = arith.constant 0 : index
    %34 = vector.load %arg2[%c0_22, %33, %c18, %c0_23] : memref<1x40x40x32xbf16, #tpu.memory_space<vmem>>, vector<1x8x16x32xbf16>
    %35 = vector.shape_cast %34 : vector<1x8x16x32xbf16> to vector<8x16x32xbf16>
    %36 = vector.shape_cast %35 : vector<8x16x32xbf16> to vector<128x32xbf16>
    %c0_24 = arith.constant 0 : index
    %c160 = arith.constant 160 : index
    %37 = vector.load %arg6[%c0_24, %c160] : memref<128x544xbf16, #tpu.memory_space<vmem>>, vector<128x32xbf16>
    tpu.vector_store %arg6[%c0_24, %c160], %36 {strides = array<i32>} : memref<128x544xbf16, #tpu.memory_space<vmem>>, vector<128x32xbf16>,
    %c12_i32 = arith.constant 12 : i32
    %38 = arith.addi %1, %c12_i32 : i32
    %c0_25 = arith.constant 0 : index
    %39 = arith.index_cast %38 : i32 to index
    %c0_26 = arith.constant 0 : index
    %c0_27 = arith.constant 0 : index
    %40 = vector.load %arg2[%c0_25, %39, %c0_26, %c0_27] : memref<1x40x40x32xbf16, #tpu.memory_space<vmem>>, vector<1x8x16x32xbf16>
    %41 = vector.shape_cast %40 : vector<1x8x16x32xbf16> to vector<8x16x32xbf16>
    %42 = vector.shape_cast %41 : vector<8x16x32xbf16> to vector<128x32xbf16>
    %c0_28 = arith.constant 0 : index
    %c192 = arith.constant 192 : index
    %43 = vector.load %arg6[%c0_28, %c192] : memref<128x544xbf16, #tpu.memory_space<vmem>>, vector<128x32xbf16>
    tpu.vector_store %arg6[%c0_28, %c192], %42 {strides = array<i32>} : memref<128x544xbf16, #tpu.memory_space<vmem>>, vector<128x32xbf16>,
    %c12_i32_29 = arith.constant 12 : i32
    %44 = arith.addi %1, %c12_i32_29 : i32
    %c0_30 = arith.constant 0 : index
    %45 = arith.index_cast %44 : i32 to index
    %c6_31 = arith.constant 6 : index
    %c0_32 = arith.constant 0 : index
    %46 = vector.load %arg2[%c0_30, %45, %c6_31, %c0_32] : memref<1x40x40x32xbf16, #tpu.memory_space<vmem>>, vector<1x8x16x32xbf16>
    %47 = vector.shape_cast %46 : vector<1x8x16x32xbf16> to vector<8x16x32xbf16>
    %48 = vector.shape_cast %47 : vector<8x16x32xbf16> to vector<128x32xbf16>
    %c0_33 = arith.constant 0 : index
    %c224 = arith.constant 224 : index
    %49 = vector.load %arg6[%c0_33, %c224] : memref<128x544xbf16, #tpu.memory_space<vmem>>, vector<128x32xbf16>
    tpu.vector_store %arg6[%c0_33, %c224], %48 {strides = array<i32>} : memref<128x544xbf16, #tpu.memory_space<vmem>>, vector<128x32xbf16>,
    %c12_i32_34 = arith.constant 12 : i32
    %50 = arith.addi %1, %c12_i32_34 : i32
    %c0_35 = arith.constant 0 : index
    %51 = arith.index_cast %50 : i32 to index
    %c12_36 = arith.constant 12 : index
    %c0_37 = arith.constant 0 : index
    %52 = vector.load %arg2[%c0_35, %51, %c12_36, %c0_37] : memref<1x40x40x32xbf16, #tpu.memory_space<vmem>>, vector<1x8x16x32xbf16>
    %53 = vector.shape_cast %52 : vector<1x8x16x32xbf16> to vector<8x16x32xbf16>
    %54 = vector.shape_cast %53 : vector<8x16x32xbf16> to vector<128x32xbf16>
    %c0_38 = arith.constant 0 : index
    %c256 = arith.constant 256 : index
    %55 = vector.load %arg6[%c0_38, %c256] : memref<128x544xbf16, #tpu.memory_space<vmem>>, vector<128x32xbf16>
    tpu.vector_store %arg6[%c0_38, %c256], %54 {strides = array<i32>} : memref<128x544xbf16, #tpu.memory_space<vmem>>, vector<128x32xbf16>,
    %c12_i32_39 = arith.constant 12 : i32
    %56 = arith.addi %1, %c12_i32_39 : i32
    %c0_40 = arith.constant 0 : index
    %57 = arith.index_cast %56 : i32 to index
    %c18_41 = arith.constant 18 : index
    %c0_42 = arith.constant 0 : index
    %58 = vector.load %arg2[%c0_40, %57, %c18_41, %c0_42] : memref<1x40x40x32xbf16, #tpu.memory_space<vmem>>, vector<1x8x16x32xbf16>
    %59 = vector.shape_cast %58 : vector<1x8x16x32xbf16> to vector<8x16x32xbf16>
    %60 = vector.shape_cast %59 : vector<8x16x32xbf16> to vector<128x32xbf16>
    %c0_43 = arith.constant 0 : index
    %c288 = arith.constant 288 : index
    %61 = vector.load %arg6[%c0_43, %c288] : memref<128x544xbf16, #tpu.memory_space<vmem>>, vector<128x32xbf16>
    tpu.vector_store %arg6[%c0_43, %c288], %60 {strides = array<i32>} : memref<128x544xbf16, #tpu.memory_space<vmem>>, vector<128x32xbf16>,
    %c12_i32_44 = arith.constant 12 : i32
    %62 = arith.addi %1, %c12_i32_44 : i32
    %c0_45 = arith.constant 0 : index
    %63 = arith.index_cast %62 : i32 to index
    %c24_46 = arith.constant 24 : index
    %c0_47 = arith.constant 0 : index
    %64 = vector.load %arg2[%c0_45, %63, %c24_46, %c0_47] : memref<1x40x40x32xbf16, #tpu.memory_space<vmem>>, vector<1x8x16x32xbf16>
    %65 = vector.shape_cast %64 : vector<1x8x16x32xbf16> to vector<8x16x32xbf16>
    %66 = vector.shape_cast %65 : vector<8x16x32xbf16> to vector<128x32xbf16>
    %c0_48 = arith.constant 0 : index
    %c320 = arith.constant 320 : index
    %67 = vector.load %arg6[%c0_48, %c320] : memref<128x544xbf16, #tpu.memory_space<vmem>>, vector<128x32xbf16>
    tpu.vector_store %arg6[%c0_48, %c320], %66 {strides = array<i32>} : memref<128x544xbf16, #tpu.memory_space<vmem>>, vector<128x32xbf16>,
    %c18_i32 = arith.constant 18 : i32
    %68 = arith.addi %1, %c18_i32 : i32
    %c0_49 = arith.constant 0 : index
    %69 = arith.index_cast %68 : i32 to index
    %c6_50 = arith.constant 6 : index
    %c0_51 = arith.constant 0 : index
    %70 = vector.load %arg2[%c0_49, %69, %c6_50, %c0_51] : memref<1x40x40x32xbf16, #tpu.memory_space<vmem>>, vector<1x8x16x32xbf16>
    %71 = vector.shape_cast %70 : vector<1x8x16x32xbf16> to vector<8x16x32xbf16>
    %72 = vector.shape_cast %71 : vector<8x16x32xbf16> to vector<128x32xbf16>
    %c0_52 = arith.constant 0 : index
    %c352 = arith.constant 352 : index
    %73 = vector.load %arg6[%c0_52, %c352] : memref<128x544xbf16, #tpu.memory_space<vmem>>, vector<128x32xbf16>
    tpu.vector_store %arg6[%c0_52, %c352], %72 {strides = array<i32>} : memref<128x544xbf16, #tpu.memory_space<vmem>>, vector<128x32xbf16>,
    %c18_i32_53 = arith.constant 18 : i32
    %74 = arith.addi %1, %c18_i32_53 : i32
    %c0_54 = arith.constant 0 : index
    %75 = arith.index_cast %74 : i32 to index
    %c12_55 = arith.constant 12 : index
    %c0_56 = arith.constant 0 : index
    %76 = vector.load %arg2[%c0_54, %75, %c12_55, %c0_56] : memref<1x40x40x32xbf16, #tpu.memory_space<vmem>>, vector<1x8x16x32xbf16>
    %77 = vector.shape_cast %76 : vector<1x8x16x32xbf16> to vector<8x16x32xbf16>
    %78 = vector.shape_cast %77 : vector<8x16x32xbf16> to vector<128x32xbf16>
    %c0_57 = arith.constant 0 : index
    %c384 = arith.constant 384 : index
    %79 = vector.load %arg6[%c0_57, %c384] : memref<128x544xbf16, #tpu.memory_space<vmem>>, vector<128x32xbf16>
    tpu.vector_store %arg6[%c0_57, %c384], %78 {strides = array<i32>} : memref<128x544xbf16, #tpu.memory_space<vmem>>, vector<128x32xbf16>,
    %c18_i32_58 = arith.constant 18 : i32
    %80 = arith.addi %1, %c18_i32_58 : i32
    %c0_59 = arith.constant 0 : index
    %81 = arith.index_cast %80 : i32 to index
    %c18_60 = arith.constant 18 : index
    %c0_61 = arith.constant 0 : index
    %82 = vector.load %arg2[%c0_59, %81, %c18_60, %c0_61] : memref<1x40x40x32xbf16, #tpu.memory_space<vmem>>, vector<1x8x16x32xbf16>
    %83 = vector.shape_cast %82 : vector<1x8x16x32xbf16> to vector<8x16x32xbf16>
    %84 = vector.shape_cast %83 : vector<8x16x32xbf16> to vector<128x32xbf16>
    %c0_62 = arith.constant 0 : index
    %c416 = arith.constant 416 : index
    %85 = vector.load %arg6[%c0_62, %c416] : memref<128x544xbf16, #tpu.memory_space<vmem>>, vector<128x32xbf16>
    tpu.vector_store %arg6[%c0_62, %c416], %84 {strides = array<i32>} : memref<128x544xbf16, #tpu.memory_space<vmem>>, vector<128x32xbf16>,
    %c24_i32 = arith.constant 24 : i32
    %86 = arith.addi %1, %c24_i32 : i32
    %c0_63 = arith.constant 0 : index
    %87 = arith.index_cast %86 : i32 to index
    %c0_64 = arith.constant 0 : index
    %c0_65 = arith.constant 0 : index
    %88 = vector.load %arg2[%c0_63, %87, %c0_64, %c0_65] : memref<1x40x40x32xbf16, #tpu.memory_space<vmem>>, vector<1x8x16x32xbf16>
    %89 = vector.shape_cast %88 : vector<1x8x16x32xbf16> to vector<8x16x32xbf16>
    %90 = vector.shape_cast %89 : vector<8x16x32xbf16> to vector<128x32xbf16>
    %c0_66 = arith.constant 0 : index
    %c448 = arith.constant 448 : index
    %91 = vector.load %arg6[%c0_66, %c448] : memref<128x544xbf16, #tpu.memory_space<vmem>>, vector<128x32xbf16>
    tpu.vector_store %arg6[%c0_66, %c448], %90 {strides = array<i32>} : memref<128x544xbf16, #tpu.memory_space<vmem>>, vector<128x32xbf16>,
    %c24_i32_67 = arith.constant 24 : i32
    %92 = arith.addi %1, %c24_i32_67 : i32
    %c0_68 = arith.constant 0 : index
    %93 = arith.index_cast %92 : i32 to index
    %c12_69 = arith.constant 12 : index
    %c0_70 = arith.constant 0 : index
    %94 = vector.load %arg2[%c0_68, %93, %c12_69, %c0_70] : memref<1x40x40x32xbf16, #tpu.memory_space<vmem>>, vector<1x8x16x32xbf16>
    %95 = vector.shape_cast %94 : vector<1x8x16x32xbf16> to vector<8x16x32xbf16>
    %96 = vector.shape_cast %95 : vector<8x16x32xbf16> to vector<128x32xbf16>
    %c0_71 = arith.constant 0 : index
    %c480 = arith.constant 480 : index
    %97 = vector.load %arg6[%c0_71, %c480] : memref<128x544xbf16, #tpu.memory_space<vmem>>, vector<128x32xbf16>
    tpu.vector_store %arg6[%c0_71, %c480], %96 {strides = array<i32>} : memref<128x544xbf16, #tpu.memory_space<vmem>>, vector<128x32xbf16>,
    %c24_i32_72 = arith.constant 24 : i32
    %98 = arith.addi %1, %c24_i32_72 : i32
    %c0_73 = arith.constant 0 : index
    %99 = arith.index_cast %98 : i32 to index
    %c24_74 = arith.constant 24 : index
    %c0_75 = arith.constant 0 : index
    %100 = vector.load %arg2[%c0_73, %99, %c24_74, %c0_75] : memref<1x40x40x32xbf16, #tpu.memory_space<vmem>>, vector<1x8x16x32xbf16>
    %101 = vector.shape_cast %100 : vector<1x8x16x32xbf16> to vector<8x16x32xbf16>
    %102 = vector.shape_cast %101 : vector<8x16x32xbf16> to vector<128x32xbf16>
    %c0_76 = arith.constant 0 : index
    %c512 = arith.constant 512 : index
    %103 = vector.load %arg6[%c0_76, %c512] : memref<128x544xbf16, #tpu.memory_space<vmem>>, vector<128x32xbf16>
    tpu.vector_store %arg6[%c0_76, %c512], %102 {strides = array<i32>} : memref<128x544xbf16, #tpu.memory_space<vmem>>, vector<128x32xbf16>,
    %c0_77 = arith.constant 0 : index
    %c0_78 = arith.constant 0 : index
    %104 = vector.load %arg6[%c0_77, %c0_78] : memref<128x544xbf16, #tpu.memory_space<vmem>>, vector<128x544xbf16>
    %c0_79 = arith.constant 0 : index
    %c0_80 = arith.constant 0 : index
    %105 = vector.load %arg3[%c0_79, %c0_80] : memref<544x128xbf16, #tpu.memory_space<vmem>>, vector<544x128xbf16>
    %cst = arith.constant dense<0.000000e+00> : vector<128x128xf32>
    %106 = tpu.matmul %104, %105, %cst {dimension_numbers = #tpu.dot_dimension_numbers<[1], [0], [0], [1], [0, 0, 1, 1], [], []>} : vector<128x544xbf16>, vector<544x128xbf16>, vector<128x128xf32> -> vector<128x128xf32>
    %c0_81 = arith.constant 0 : index
    %c0_82 = arith.constant 0 : index
    %107 = vector.load %arg4[%c0_81, %c0_82] : memref<1x128xf32, #tpu.memory_space<vmem>>, vector<1x128xf32>
    %108 = vector.broadcast %107 : vector<1x128xf32> to vector<128x128xf32>
    %109 = arith.addf %106, %108 : vector<128x128xf32>
    %110 = vector.shape_cast %109 : vector<128x128xf32> to vector<8x16x128xf32>
    %111 = arith.truncf %110 : vector<8x16x128xf32> to vector<8x16x128xbf16>
    %c0_83 = arith.constant 0 : index
    %c0_84 = arith.constant 0 : index
    %c0_85 = arith.constant 0 : index
    %c0_86 = arith.constant 0 : index
    %112 = vector.load %arg5[%c0_83, %c0_84, %c0_85, %c0_86] : memref<1x8x16x128xbf16, #tpu.memory_space<vmem>>, vector<1x8x16x128xbf16>
    %113 = vector.shape_cast %112 : vector<1x8x16x128xbf16> to vector<8x16x128xbf16>
    %114 = vector.shape_cast %111 : vector<8x16x128xbf16> to vector<1x8x16x128xbf16>
    tpu.vector_store %arg5[%c0_83, %c0_84, %c0_85, %c0_86], %114 {strides = array<i32>} : memref<1x8x16x128xbf16, #tpu.memory_space<vmem>>, vector<1x8x16x128xbf16>,
    return
  }
  func.func @transform_0(%arg0: i32, %arg1: i32) -> (i32, i32, i32, i32) {
    %c0_i32 = arith.constant 0 : i32
    %c0_i32_0 = arith.constant 0 : i32
    %c0_i32_1 = arith.constant 0 : i32
    %c0_i32_2 = arith.constant 0 : i32
    return %arg0, %c0_i32, %c0_i32_0, %c0_i32_1 : i32, i32, i32, i32
  }
  func.func @transform_1(%arg0: i32, %arg1: i32) -> (i32, i32) {
    %c0_i32 = arith.constant 0 : i32
    %c0_i32_0 = arith.constant 0 : i32
    %c0_i32_1 = arith.constant 0 : i32
    return %c0_i32, %c0_i32_0 : i32, i32
  }
  func.func @transform_2(%arg0: i32, %arg1: i32) -> (i32, i32) {
    %c0_i32 = arith.constant 0 : i32
    %c0_i32_0 = arith.constant 0 : i32
    %c0_i32_1 = arith.constant 0 : i32
    return %c0_i32, %c0_i32_0 : i32, i32
  }
  func.func @transform_3(%arg0: i32, %arg1: i32) -> (i32, i32, i32, i32) {
    %c0_i32 = arith.constant 0 : i32
    %c0_i32_0 = arith.constant 0 : i32
    %c0_i32_1 = arith.constant 0 : i32
    return %arg0, %arg1, %c0_i32, %c0_i32_0 : i32, i32, i32, i32
  }
}

</mosaic_0001>

<bundles_post_ra>
// kernel: tpu_custom_call.1
= control target key start
LH: loop header
LB: loop body
LE: loop exit
PB: predicated region body
PF: predicated region fallthrough
CT: control target
= control target key end

     0   :  { %8 = vsyncpa [#allocation4], 0  ;;  %s6091_s0 = inlined_call_operand.vmem [shape: bf16[2,40,40,32], index: 0, kind: input, shape index: {}]   ;;  %s6092_s1 = inlined_call_operand.vmem [shape: bf16[544,128], index: 1, kind: input, shape index: {}]   ;;  %s6093_s2 = inlined_call_operand.vmem [shape: f32[1,128], index: 2, kind: input, shape index: {}]   ;;  %s6094_s3 = inlined_call_operand.hbm [shape: bf16[2,16,16,128], index: 3, kind: output, shape index: {}]  }
   0x1   :  { %10 = vsyncpa [#allocation4 + $0x1], 0  ;;  %s4467_s12 = smov 0   ;;  %s4469_s13 = smov 0  }
   0x2   :  { %s4471_s14 = smov 0   ;;  %s4473_s15 = smov 0  }
   0x3   :  { %s4475_s16 = smov 0   ;;  %s4477_s17 = smov 0  }
   0x4   :  { %s4479_s18 = smov 0   ;;  %s4481_s19 = smov 0  }
   0x5 LB: > { %s3452_s20 = sadd.s32 4294967295, %s4440_s19   ;;  %s3453_s21 = sadd.s32 4294967294, %s4440_s19   ;;  %s4440_s19 = sphi %s4481_s19, %s16_s19   ;;  %s4436_s18 = sphi %s4479_s18, %s6121_s18   ;;  %s4432_s17 = sphi %s4477_s17, %s6120_s17   ;;  %s4428_s16 = sphi %s4475_s16, %s6119_s16   ;;  %s4424_s15 = sphi %s4473_s15, %s6118_s15   ;;  %s4420_s14 = sphi %s4471_s14, %s6117_s14   ;;  %s4416_s13 = sphi %s4469_s13, %s6116_s13   ;;  %s4412_s12 = sphi %s4467_s12, %s6115_s12  }
   0x6   : > { %s25_s22 = sadd.s32 1, %s4432_s17  ;;  %s28_s23 = sadd.s32 1, %s4436_s18 }
   0x7   : > { %p26_p0 = scmp.ge.s32.totalorder %s25_s22, 2  ;;  %p115_p1 = scmp.ne.s32.totalorder %s4420_s14, %s4416_s13 }
   0x8   : > { %p116_p2 = scmp.eq.s32.totalorder %s3452_s20, 3  ;;  %p121_p5 = scmp.ne.s32.totalorder %s4416_s13, %s4412_s12 }
   0x9   : > { %s6123_s22 = smov (%p26_p0, %s25_s22), 0  ;;  %s6125_s23 = smov (!%p26_p0, %s28_s23), %s4436_s18 }
   0xa   : > { %s101_s24 = ssub.s32 %s4432_s17, %s6123_s22  ;;  %p4518_p3 = por %p116_p2, %p115_p1 }
   0xb   : > { %p30_p4 = scmp.ge.s32.totalorder %s6125_s23, 2  ;;  %p122_p6 = scmp.eq.s32.totalorder %s3453_s21, 3 }
   0xc   : > { %p3456_p7 = scmp.ge.s32.totalorder %s4440_s19, 1  ;;  %p154_p9 = scmp.lt.s32.totalorder %s4440_s19, 5 }
   0xd   : > { %s6127_s23 = smov (%p30_p4, %s6125_s23), 0  ;;  %p4527_p8 = por %p122_p6, %p121_p5 }
   0xe   : > { %s100_s27 = ssub.s32 %s4436_s18, %s6127_s23  ;;  %s105_s28 = sadd.s32 1, %s4420_s14 }
   0xf   : > { %s102_s29 = sor.u32 %s101_s24, %s100_s27  ;;  %p155_p10 = pnand %p3456_p7, %p154_p9 }
  0x10   : > { %p103_p11 = scmp.eq.s32.totalorder %s102_s29, 0 }
  0x11   : > { %158 = sbr.rel (%p155_p10) target bundleno = 773 (0x305), region = 32 }
  0x12   : > { %s4536_s30 = scalar_select %p103_p11, %s4420_s14, %s105_s28  }
  0x16   : > { %p178_p12 = scmp.lt.s32.totalorder %s4428_s16, 1  ;;  %vm270_vm0 = vcmask 1041408   ;;  %vm271_vm1 = vcmask 1045508   ;;  %s3968_s5 = smul.u32 160, %s4424_s15  ;;  %vm851_vm3 = vcmask 1042432   ;;  %vm852_vm4 = vcmask 1046532  }
  0x17   : > { %vm4541_vm2 = vmor %vm270_vm0, %vm271_vm1  ;;  %s4442_s11 = smov 32   ;;  %s4443_s20 = smov 64   ;;  %vm205_vm6 = vcmask 257024   ;;  %vm543_vm7 = vcmask 1040384   ;;  %vm544_vm8 = vcmask 1044484   ;;  %vm377_vm10 = vcmask 519424  }
  0x18   : > { %s179_s4 = scalar_select %p178_p12, %s4428_s16, 1  ;;  %vm4625_vm5 = vmor %vm851_vm3, %vm852_vm4  ;;  %vm474_vm11 = vcmask 781824   ;;  %vm650_vm12 = vcmask 1044224   ;;  %vm2945_vm13 = vcmask 261120  }
  0x19   : > { %vm4726_vm9 = vmor %vm543_vm7, %vm544_vm8  ;;  %s4444_s21 = smov 96   ;;  %s3985_s8 = sshll.u32 %s4424_s15, 4 }
  0x1a   : > { %s4195_s6 = smul.u32 800, %s179_s4 }
  0x1c   : > { %s182_s9 = scalar_lea.vmem %s6091_s0, %s4195_s6 }
  0x1d   : > { %s4548_s10 = scalar_lea.vmem %s182_s9, %s3968_s5  ;;  %s3964_s9 = sshll.u32 %s4428_s16, 5 }
  0x1e   : > { %v225_v1 = vld [vmem:[%s4548_s10 + $0x18] sm:$0xc]  ;;  %v226_v2 = vld [vmem:[%s4548_s10 + $0x1c] sm:$0xf]  ;;  %v222_v3 = vld [vmem:[%s4548_s10 + $0x4] sm:$0xc]  ;;  %s3355_s15 = sadd.s32 %s3985_s8, %s3964_s9 }
  0x1f   : > { %v3463_v4 = vrot.slane %v225_v1, 10  ;;  %v282_v5 = vrot.slane %v226_v2, 6  ;;  %v223_v6 = vld [vmem:[%s4548_s10 + $0x8] sm:$0xf]  ;;  %v3462_v7 = vrot.slane %v222_v3, 10  ;;  %s3965_s16 = sshll.u32 %s3355_s15, 6 }
  0x20   : > { %v275_v8 = vrot.slane %v223_v6, 6  ;;  %v227_v9 = vld [vmem:[%s4548_s10 + $0x20] sm:$0x3]  ;;  %v228_v10 = vld [vmem:[%s4548_s10 + $0x2c] sm:$0xc]  ;;  %s6030_s29 = scalar_lea.hbm %s6094_s3, %s3965_s16 }
  0x21   : > { %v283_v11 = vsel %vm4541_vm2, %v3463_v4, %v282_v5  ;;  %v284_v12 = vrot.slane %v282_v5, 4  ;;  %v285_v13 = vrot.slane %v227_v9, 6  ;;  %v229_v14 = vld [vmem:[%s4548_s10 + $0x30] sm:$0xf]  ;;  %v3464_v15 = vrot.slane %v228_v10, 10 }
  0x22   : > { %333 = vrot.lane.b32.xlu1 %v283_v11, %s4442_s11  ;;  %v276_v16 = vsel %vm4541_vm2, %v3462_v7, %v275_v8  ;;  %v289_v17 = vrot.slane %v229_v14, 6  ;;  %v230_v18 = vld [vmem:[%s4548_s10 + $0x34] sm:$0x3]  ;;  %v231_v19 = vld [vmem:[%s4548_s10 + $0x40] sm:$0xc]  ;;  %v277_v35 = vrot.slane %v275_v8, 4 }
  0x23   : > { %329 = vrot.lane.b32.xlu0 %v276_v16, %s4442_s11  ;;  %v286_v20 = vsel %vm4541_vm2, %v284_v12, %v285_v13  ;;  %v292_v21 = vrot.slane %v230_v18, 6  ;;  %v232_v22 = vld [vmem:[%s4548_s10 + $0x44] sm:$0xf]  ;;  %v3465_v25 = vrot.slane %v231_v19, 10  ;;  %v233_v27 = vld [vmem:[%s4548_s10 + $0x48] sm:$0x3] }
  0x24   : > { %v290_v23 = vsel %vm4541_vm2, %v3464_v15, %v289_v17  ;;  %v291_v24 = vrot.slane %v289_v17, 4  ;;  %v296_v26 = vrot.slane %v232_v22, 6  ;;  %v224_v28 = vld [vmem:[%s4548_s10 + $0xc] sm:$0x3]  ;;  %v235_v29 = vld [vmem:[%s4548_s10 + $0x58] sm:$0xf] }
  0x25   : > { %v299_v32 = vrot.slane %v233_v27, 6  ;;  %v303_v33 = vrot.slane %v235_v29, 6  ;;  %v278_v36 = vrot.slane %v224_v28, 6  ;;  %v236_v37 = vld [vmem:[%s4548_s10 + $0x5c] sm:$0x3] }
  0x26   : > { %335 = vrot.lane.b32.xlu1 %v286_v20, %s4442_s11  ;;  %v293_v30 = vsel %vm4541_vm2, %v291_v24, %v292_v21  ;;  %v298_v31 = vrot.slane %v296_v26, 4  ;;  %v297_v34 = vsel %vm4541_vm2, %v3465_v25, %v296_v26  ;;  %v238_v38 = vld [vmem:[%s4548_s10 + $0x6c] sm:$0xf]  ;;  %v234_v39 = vld [vmem:[%s4548_s10 + $0x54] sm:$0xc]  ;;  %v306_v42 = vrot.slane %v236_v37, 6 }
  0x27   : > { %337 = vrot.lane.b32.xlu0 %v290_v23, %s4442_s11  ;;  %v305_v41 = vrot.slane %v303_v33, 4  ;;  %v310_v43 = vrot.slane %v238_v38, 6  ;;  %v279_v44 = vsel %vm4541_vm2, %v277_v35, %v278_v36  ;;  %v3466_v45 = vrot.slane %v234_v39, 10  ;;  %v239_v46 = vld [vmem:[%s4548_s10 + $0x70] sm:$0x3]  ;;  %v4271_v29 = vld [vmem:[%s6092_s1 + $0x78] sm:$0xff]  }
  0x28   : > { %v300_v40 = vsel %vm4541_vm2, %v298_v31, %v299_v32  ;;  %v241_v47 = vld [vmem:[%s4548_s10 + $0x80] sm:$0xf]  ;;  %v237_v48 = vld [vmem:[%s4548_s10 + $0x68] sm:$0xc]  ;;  %v313_v51 = vrot.slane %v239_v46, 6  ;;  %4033 = vmatprep.subr.bf16.mxu0 %v4271_v29 }
  0x29   : > { %v307_v49 = vsel %vm4541_vm2, %v305_v41, %v306_v42  ;;  %v312_v50 = vrot.slane %v310_v43, 4  ;;  %v317_v52 = vrot.slane %v241_v47, 6  ;;  %v304_v53 = vsel %vm4541_vm2, %v3466_v45, %v303_v33  ;;  %v242_v55 = vld [vmem:[%s4548_s10 + $0x84] sm:$0x3]  ;;  %v244_v56 = vld [vmem:[%s4548_s10 + $0x94] sm:$0xf] }
  0x2a   : > { %339 = vrot.lane.b32.xlu1 %v293_v30, %s4442_s11  ;;  %v3467_v54 = vrot.slane %v237_v48, 10  ;;  %v240_v57 = vld [vmem:[%s4548_s10 + $0x7c] sm:$0xc]  ;;  %v320_v60 = vrot.slane %v242_v55, 6  ;;  %v324_v61 = vrot.slane %v244_v56, 6  ;;  %v4274_v41 = vld [vmem:[%s6092_s1 + $0x30] sm:$0xff]  }
  0x2b   : > { %341 = vrot.lane.b32.xlu0 %v297_v34, %s4442_s11  ;;  %v314_v58 = vsel %vm4541_vm2, %v312_v50, %v313_v51  ;;  %v319_v59 = vrot.slane %v317_v52, 4  ;;  %v3468_v63 = vrot.slane %v240_v57, 10  ;;  %v245_v1 = vld [vmem:[%s4548_s10 + $0x98] sm:$0x3]  ;;  %v243_v2 = vld [vmem:[%s4548_s10 + $0x90] sm:$0xc] }
  0x2c   : > { %v311_v62 = vsel %vm4541_vm2, %v3467_v54, %v310_v43  ;;  %v326_v4 = vrot.slane %v324_v61, 4  ;;  %v327_v5 = vrot.slane %v245_v1, 6  ;;  %v3469_v7 = vrot.slane %v243_v2, 10  ;;  %v3536_v10 = vld [vmem:[%s4548_s10 + $0x80] sm:$0xe]  ;;  %v4272_v30 = vld [vmem:[%s6092_s1 + $0x38] sm:$0xff]  }
  0x2d   : > { %v321_v3 = vsel %vm4541_vm2, %v319_v59, %v320_v60  ;;  %v318_v6 = vsel %vm4541_vm2, %v3468_v63, %v317_v52  ;;  %v3537_v11 = vld [vmem:[%s4548_s10 + $0x84] sm:$0xf]  ;;  %v395_v12 = vld [vmem:[%s4548_s10 + $0x10] sm:$0xf]  ;;  %v3560_v14 = vrot.slane %v3536_v10, 9  ;;  %4034 = vmatpush3.bf16.msra.mxu0 %v4272_v30  ;;  %v4275_v48 = vld [vmem:[%s6092_s1 + $0x68] sm:$0xff]  }
  0x2e   : > { %343 = vrot.lane.b32.xlu1 %v300_v40, %s4442_s11  ;;  %v328_v8 = vsel %vm4541_vm2, %v326_v4, %v327_v5  ;;  %v325_v9 = vsel %vm4541_vm2, %v3469_v7, %v324_v61  ;;  %v856_v15 = vrot.slane %v3537_v11, 5  ;;  %v394_v16 = vld [vmem:[%s4548_s10 + $0xc] sm:$0xf]  ;;  %v3650_v17 = vld [vmem:[%s4548_s10 + $0xf8] sm:$0xe]  ;;  %v4273_v34 = vld [vmem:[%s6092_s1 + $0x70] sm:$0xff]  }
  0x2f   : > { %331 = vrot.lane.b32.xlu0 %v279_v44, %s4442_s11  ;;  %v3651_v18 = vld [vmem:[%s4548_s10 + $0xfc] sm:$0xf]  ;;  %v3538_v19 = vld [vmem:[%s4548_s10 + $0x88] sm:$0x1]  ;;  %v396_v21 = vld [vmem:[%s4548_s10 + $0x20] sm:$0xf]  ;;  %4035 = vmatprep.subr.bf16.mxu0 %v4273_v34 }
  0x30   : > { %v857_v20 = vsel %vm4625_vm5, %v3560_v14, %v856_v15  ;;  %v3674_v22 = vrot.slane %v3650_v17, 9  ;;  %v1428_v23 = vrot.slane %v3651_v18, 5  ;;  %v858_v24 = vrot.slane %v856_v15, 4  ;;  %v3764_v26 = vld [vmem:[%s4548_s10 + $0x170] sm:$0xe]  ;;  %v4276_v52 = vld [vmem:[%s6092_s1 + $0xf8] sm:$0xff]  }
  0x31   : > { %v859_v25 = vrot.slane %v3538_v19, 5  ;;  %v3765_v27 = vld [vmem:[%s4548_s10 + $0x174] sm:$0xf]  ;;  %v3652_v28 = vld [vmem:[%s4548_s10 + $0x100] sm:$0x1]  ;;  %v3788_v32 = vrot.slane %v3764_v26, 9  ;;  %4036 = vmatpush3.bf16.msra.mxu0 %v4274_v41  ;;  %4097 = vmatprep.subr.bf16.mxu1 %v4276_v52 }
  0x32   : > { %347 = vrot.lane.b32.xlu1 %v307_v49, %s4442_s11  ;;  %v1429_v31 = vsel %vm4625_vm5, %v3674_v22, %v1428_v23  ;;  %v2000_v33 = vrot.slane %v3765_v27, 5  ;;  %v1430_v36 = vrot.slane %v1428_v23, 4  ;;  %v1431_v37 = vrot.slane %v3652_v28, 5  ;;  %v3766_v38 = vld [vmem:[%s4548_s10 + $0x178] sm:$0x1]  ;;  %4037 = vmatprep.subr.bf16.mxu0 %v4275_v48  ;;  %v4277_v56 = vld [vmem:[%s6092_s1 + $0x28] sm:$0xff]  }
  0x33   : > { %345 = vrot.lane.b32.xlu0 %v304_v53, %s4442_s11  ;;  %v860_v35 = vsel %vm4625_vm5, %v858_v24, %v859_v25  ;;  %v191_v39 = vld [vmem:[%s4548_s10 + $0x14] sm:$0xf]  ;;  %v189_v40 = vld [vmem:[%s4548_s10] sm:$0xf]  ;;  %v192_v43 = vld [vmem:[%s4548_s10 + $0x18] sm:$0xf] }
  0x34   : > { %208 = vst.msk [vmem:[#allocation2 + $0x28] sm:$0xf] %vm205_vm6, %v191_v39  ;;  %206 = vst.msk [vmem:[#allocation2] sm:$0xf] %vm205_vm6, %v189_v40  ;;  %v2001_v42 = vsel %vm4625_vm5, %v3788_v32, %v2000_v33  ;;  %v1432_v44 = vsel %vm4625_vm5, %v1430_v36, %v1431_v37  ;;  %v2002_v45 = vrot.slane %v2000_v33, 4  ;;  %v2003_v46 = vrot.slane %v3766_v38, 5 }
  0x35   : > { %209 = vst.msk [vmem:[#allocation2 + $0x3c] sm:$0xf] %vm205_vm6, %v192_v43  ;;  %v193_v47 = vld [vmem:[%s4548_s10 + $0x28] sm:$0xf]  ;;  %v194_v49 = vld [vmem:[%s4548_s10 + $0x2c] sm:$0xf]  ;;  %4038 = vmatpush3.bf16.msra.mxu0 %v4277_v56 }
  0x36   : > { %351 = vrot.lane.b32.xlu1 %v314_v58, %s4442_s11  ;;  %210 = vst.msk [vmem:[#allocation2 + $0x50] sm:$0xf] %vm205_vm6, %v193_v47  ;;  %v195_v50 = vld [vmem:[%s4548_s10 + $0x3c] sm:$0xf]  ;;  %v3570_v51 = vld [vmem:[%s4548_s10 + $0xf0] sm:$0xf]  ;;  %v2004_v53 = vsel %vm4625_vm5, %v2002_v45, %v2003_v46 }
  0x37   : > { %349 = vrot.lane.b32.xlu0 %v311_v62, %s4442_s11  ;;  %211 = vst.msk [vmem:[#allocation2 + $0x64] sm:$0xf] %vm205_vm6, %v194_v49  ;;  %212 = vst.msk [vmem:[#allocation2 + $0x78] sm:$0xf] %vm205_vm6, %v195_v50  ;;  %v196_v54 = vld [vmem:[%s4548_s10 + $0x40] sm:$0xf] }
  0x38   : > { %213 = vst.msk [vmem:[#allocation2 + $0x8c] sm:$0xf] %vm205_vm6, %v196_v54  ;;  %v190_v55 = vld [vmem:[%s4548_s10 + $0x4] sm:$0xf]  ;;  %v3682_v57 = vld [vmem:[%s4548_s10 + $0xfc] sm:$0xf] }
  0x39   : > { %207 = vst.msk [vmem:[#allocation2 + $0x14] sm:$0xf] %vm205_vm6, %v190_v55  ;;  %v3571_v58 = vld [vmem:[%s4548_s10 + $0xf4] sm:$0xf]  ;;  %v197_v60 = vld [vmem:[%s4548_s10 + $0x50] sm:$0xf] }
  0x3a   : > { %355 = vrot.lane.b32.xlu1 %v321_v3, %s4442_s11  ;;  %v198_v59 = vld [vmem:[%s4548_s10 + $0x54] sm:$0xf]  ;;  %v3472_v61 = vld [vmem:[%s4548_s10 + $0x78] sm:$0x8]  ;;  %v3473_v62 = vld [vmem:[%s4548_s10 + $0x7c] sm:$0xf] }
  0x3b   : > { %353 = vrot.lane.b32.xlu0 %v318_v6, %s4442_s11  ;;  %215 = vst.msk [vmem:[#allocation2 + $0xb4] sm:$0xf] %vm205_vm6, %v198_v59  ;;  %214 = vst.msk [vmem:[#allocation2 + $0xa0] sm:$0xf] %vm205_vm6, %v197_v60  ;;  %v4278_v63 = vld [vmem:[%s6092_s1 + $0xb8] sm:$0xff]   ;;  %v3496_v7 = vrot.slane %v3472_v61, 11 }
  0x3c   : > { %v3798_v1 = vld [vmem:[%s4548_s10 + $0x1e0] sm:$0xf]  ;;  %v200_v2 = vld [vmem:[%s4548_s10 + $0x68] sm:$0xf]  ;;  %v199_v3 = vld [vmem:[%s4548_s10 + $0x64] sm:$0xf]  ;;  %4098 = vmatpush3.bf16.msra.mxu1 %v4278_v63 }
  0x3d   : > { %v3586_v4 = vld [vmem:[%s4548_s10 + $0xf0] sm:$0x8]  ;;  %217 = vst.msk [vmem:[#allocation2 + $0xdc] sm:$0xf] %vm205_vm6, %v200_v2  ;;  %216 = vst.msk [vmem:[#allocation2 + $0xc8] sm:$0xf] %vm205_vm6, %v199_v3 }
  0x3e   : > { %359 = vrot.lane.b32.xlu1 %v328_v8, %s4442_s11  ;;  %v202_v5 = vld [vmem:[%s4548_s10 + $0x7c] sm:$0xf]  ;;  %v201_v6 = vld [vmem:[%s4548_s10 + $0x78] sm:$0xf]  ;;  %v548_v8 = vrot.slane %v3473_v62, 7  ;;  %v3610_v15 = vrot.slane %v3586_v4, 11 }
  0x3f   : > { %357 = vrot.lane.b32.xlu0 %v325_v9, %s4442_s11  ;;  %v3587_v9 = vld [vmem:[%s4548_s10 + $0xf4] sm:$0xf]  ;;  %219 = vst.msk [vmem:[#allocation2 + $0x104] sm:$0xf] %vm205_vm6, %v202_v5  ;;  %218 = vst.msk [vmem:[#allocation2 + $0xf0] sm:$0xf] %vm205_vm6, %v201_v6 }
  0x40   : > { %v204_v10 = vld [vmem:[%s4548_s10 + $0x90] sm:$0xf]  ;;  %v3683_v11 = vld [vmem:[%s4548_s10 + $0x100] sm:$0xf]  ;;  %v203_v14 = vld [vmem:[%s4548_s10 + $0x8c] sm:$0xf]  ;;  %v549_v22 = vsel %vm4726_vm9, %v3496_v7, %v548_v8 }
  0x41   : > { %221 = vst.msk [vmem:[#allocation2 + $0x12c] sm:$0xf] %vm205_vm6, %v204_v10  ;;  %v3700_v17 = vld [vmem:[%s4548_s10 + $0x168] sm:$0x8]  ;;  %220 = vst.msk [vmem:[#allocation2 + $0x118] sm:$0xf] %vm205_vm6, %v203_v14 }
  0x42   : > { %428 = vrot.lane.b32.xlu1 %v395_v12, %s4443_s20  ;;  %v1124_v18 = vrot.slane %v3587_v9, 7  ;;  %v3701_v19 = vld [vmem:[%s4548_s10 + $0x16c] sm:$0xf]  ;;  %v3799_v23 = vld [vmem:[%s4548_s10 + $0x1e4] sm:$0xf]  ;;  %v4280_v26 = vld [vmem:[%s6092_s1 + $0xf0] sm:$0xff]  }
  0x43   : > { %426 = vrot.lane.b32.xlu0 %v394_v16, %s4443_s20  ;;  %v3474_v16 = vld [vmem:[%s4548_s10 + $0x80] sm:$0x7]  ;;  %v550_v27 = vrot.slane %v548_v8, 4  ;;  %v3724_v29 = vrot.slane %v3700_v17, 11  ;;  %v1696_v32 = vrot.slane %v3701_v19, 7  ;;  %4099 = vmatprep.subr.bf16.mxu1 %v4280_v26  ;;  %v4282_v49 = vld [vmem:[%s6092_s1 + $0xb0] sm:$0xff]  }
  0x44   : > { %v3505_v24 = vld [vmem:[%s4548_s10 + $0x80] sm:$0xf]  ;;  %v551_v28 = vrot.slane %v3474_v16, 7  ;;  %v3588_v33 = vld [vmem:[%s4548_s10 + $0xf8] sm:$0x7]  ;;  %v1126_v34 = vrot.slane %v1124_v18, 4  ;;  %v1125_v36 = vsel %vm4726_vm9, %v3610_v15, %v1124_v18  ;;  %4100 = vmatpush3.bf16.msra.mxu1 %v4282_v49 }
  0x45   : > { %v717_v30 = vrot.slane %v3505_v24, 6  ;;  %v3814_v37 = vld [vmem:[%s4548_s10 + $0x1e4] sm:$0xc]  ;;  %v3619_v39 = vld [vmem:[%s4548_s10 + $0xf8] sm:$0xf]  ;;  %v1127_v46 = vrot.slane %v3588_v33, 7  ;;  %v1697_v55 = vsel %vm4726_vm9, %v3724_v29, %v1696_v32 }
  0x46   : > { %910 = vrot.lane.b32.xlu1 %v857_v20, %s4442_s11  ;;  %v3504_v20 = vld [vmem:[%s4548_s10 + $0x7c] sm:$0xc]  ;;  %v3506_v40 = vld [vmem:[%s4548_s10 + $0x84] sm:$0x3]  ;;  %v552_v45 = vsel %vm4726_vm9, %v550_v27, %v551_v28  ;;  %v3815_v47 = vld [vmem:[%s4548_s10 + $0x1e8] sm:$0xf] }
  0x47   : > { %430 = vrot.lane.b32.xlu0 %v396_v21, %s4443_s20  ;;  %v4279_v21 = vld [vmem:[%s6092_s1 + $0x60] sm:$0xff]   ;;  %v3528_v25 = vrot.slane %v3504_v20, 10  ;;  %v719_v43 = vrot.slane %v717_v30, 4  ;;  %v3702_v48 = vld [vmem:[%s4548_s10 + $0x170] sm:$0x7]  ;;  %v3838_v50 = vrot.slane %v3814_v37, 10  ;;  %v1128_v2 = vsel %vm4726_vm9, %v1126_v34, %v1127_v46 }
  0x48   : > { %4039 = vmatprep.subr.bf16.mxu0 %v4279_v21  ;;  %v3733_v54 = vld [vmem:[%s4548_s10 + $0x170] sm:$0xf]  ;;  %v2268_v60 = vrot.slane %v3815_v47, 6  ;;  %v1698_v61 = vrot.slane %v1696_v32, 4  ;;  %v1699_v62 = vrot.slane %v3702_v48, 7  ;;  %v4286_v26 = vld [vmem:[%s6092_s1 + $0xa8] sm:$0xff]  }
  0x49   : > { %v718_v38 = vsel %vm4541_vm2, %v3528_v25, %v717_v30  ;;  %v3539_v3 = vld [vmem:[%s4548_s10 + $0x94] sm:$0xe]  ;;  %v3540_v4 = vld [vmem:[%s4548_s10 + $0x98] sm:$0xf]  ;;  %v3816_v7 = vld [vmem:[%s4548_s10 + $0x1ec] sm:$0x3] }
  0x4a   : > { %1482 = vrot.lane.b32.xlu1 %v1429_v31, %s4442_s11  ;;  %v4281_v31 = vld [vmem:[%s6092_s1 + $0x20] sm:$0xff]   ;;  %787 = vst.msk [vmem:[#allocation2 + $0x4] sm:$0xf] %vm205_vm6, %v718_v38  ;;  %v3734_v6 = vld [vmem:[%s4548_s10 + $0x174] sm:$0x3]  ;;  %v2269_v15 = vsel %vm4541_vm2, %v3838_v50, %v2268_v60  ;;  %v3561_v16 = vrot.slane %v3539_v3, 9  ;;  %v1700_v20 = vsel %vm4726_vm9, %v1698_v61, %v1699_v62 }
  0x4b   : > { %912 = vrot.lane.b32.xlu0 %v860_v35, %s4442_s11  ;;  %v3618_v35 = vld [vmem:[%s4548_s10 + $0xf4] sm:$0xc]  ;;  %4040 = vmatpush3.bf16.msra.mxu0 %v4281_v31  ;;  %v1867_v10 = vrot.slane %v3734_v6, 6  ;;  %v3653_v14 = vld [vmem:[%s4548_s10 + $0x10c] sm:$0xe]  ;;  %v863_v17 = vrot.slane %v3540_v4, 5 }
  0x4c   : > { %v3642_v41 = vrot.slane %v3618_v35, 10  ;;  %v3654_v18 = vld [vmem:[%s4548_s10 + $0x110] sm:$0xf]  ;;  %v2270_v21 = vrot.slane %v2268_v60, 4  ;;  %v3675_v24 = vrot.slane %v3653_v14, 9  ;;  %v4290_v49 = vld [vmem:[%s6092_s1 + $0xa0] sm:$0xff]  }
  0x4d   : > { %v3541_v25 = vld [vmem:[%s4548_s10 + $0x9c] sm:$0x1]  ;;  %v1435_v27 = vrot.slane %v3654_v18, 5  ;;  %v865_v28 = vrot.slane %v863_v17, 4  ;;  %v3767_v29 = vld [vmem:[%s4548_s10 + $0x184] sm:$0xe]  ;;  %v864_v31 = vsel %vm4625_vm5, %v3561_v16, %v863_v17 }
  0x4e   : > { %2054 = vrot.lane.b32.xlu1 %v2001_v42, %s4442_s11  ;;  %v1292_v42 = vrot.slane %v3619_v39, 6  ;;  %v3768_v30 = vld [vmem:[%s4548_s10 + $0x188] sm:$0xf]  ;;  %v3655_v32 = vld [vmem:[%s4548_s10 + $0x114] sm:$0x1]  ;;  %v866_v34 = vrot.slane %v3541_v25, 5 }
  0x4f   : > { %1484 = vrot.lane.b32.xlu0 %v1432_v44, %s4442_s11  ;;  %v720_v44 = vrot.slane %v3506_v40, 6  ;;  %v4287_v35 = vld [vmem:[%s6092_s1 + $0x50] sm:$0xff]   ;;  %v2007_v37 = vrot.slane %v3768_v30, 5  ;;  %v1437_v38 = vrot.slane %v1435_v27, 4  ;;  %v1438_v39 = vrot.slane %v3655_v32, 5  ;;  %v4295_v62 = vld [vmem:[%s6092_s1 + $0x40] sm:$0xff]  }
  0x50   : > { %v1294_v59 = vrot.slane %v1292_v42, 4  ;;  %v1436_v40 = vsel %vm4625_vm5, %v3675_v24, %v1435_v27  ;;  %v4289_v48 = vld [vmem:[%s6092_s1 + $0x10] sm:$0xff]   ;;  %v397_v50 = vld [vmem:[%s4548_s10 + $0x24] sm:$0xf]  ;;  %v3475_v60 = vld [vmem:[%s4548_s10 + $0x8c] sm:$0x8] }
  0x51   : > { %v721_v52 = vsel %vm4541_vm2, %v719_v43, %v720_v44  ;;  %v2009_v44 = vrot.slane %v2007_v37, 4  ;;  %v1439_v46 = vsel %vm4625_vm5, %v1437_v38, %v1438_v39  ;;  %v4881_v61 = vld [vmem:[%s4548_s10 + $0x108] sm:$0xf]  ;;  %v3508_v3 = vld [vmem:[%s4548_s10 + $0x94] sm:$0xf] }
  0x52   : > { %1010 = vrot.lane.b32.xlu1 %v3570_v51, %s4443_s20  ;;  %v1293_v51 = vsel %vm4541_vm2, %v3642_v41, %v1292_v42  ;;  %788 = vst.msk [vmem:[#allocation2 + $0x18] sm:$0xf] %vm205_vm6, %v721_v52  ;;  %v867_v41 = vsel %vm4625_vm5, %v865_v28, %v866_v34  ;;  %v3769_v42 = vld [vmem:[%s4548_s10 + $0x18c] sm:$0x1]  ;;  %v3801_v14 = vld [vmem:[%s4548_s10 + $0x1f8] sm:$0xf] }
  0x53   : > { %2056 = vrot.lane.b32.xlu0 %v2004_v53, %s4442_s11  ;;  %v3732_v53 = vld [vmem:[%s4548_s10 + $0x16c] sm:$0xc]  ;;  %1362 = vst.msk [vmem:[#allocation2 + $0x8] sm:$0xf] %vm205_vm6, %v1293_v51  ;;  %v2010_v47 = vrot.slane %v3769_v42, 5  ;;  %v1131_v17 = vrot.slane %v4881_v61, 7 }
  0x54   : > { %v3756_v56 = vrot.slane %v3732_v53, 10  ;;  %v4291_v51 = vld [vmem:[%s6092_s1 + $0x48] sm:$0xff]   ;;  %v4292_v53 = vld [vmem:[%s6092_s1 + $0xd8] sm:$0xff]   ;;  %v3800_v18 = vld [vmem:[%s4548_s10 + $0x1f4] sm:$0xf] }
  0x55   : > { %v2011_v52 = vsel %vm4625_vm5, %v2009_v44, %v2010_v47  ;;  %v3591_v16 = vld [vmem:[%s4548_s10 + $0x10c] sm:$0x7]  ;;  %v3589_v24 = vld [vmem:[%s4548_s10 + $0x104] sm:$0x8]  ;;  %v3509_v27 = vld [vmem:[%s4548_s10 + $0x98] sm:$0x3] }
  0x56   : > { %1578 = vrot.lane.b32.xlu1 %v3682_v57, %s4443_s20  ;;  %v1864_v57 = vrot.slane %v3733_v54, 6  ;;  %v3573_v54 = vld [vmem:[%s4548_s10 + $0x108] sm:$0xf]  ;;  %v3622_v25 = vld [vmem:[%s4548_s10 + $0x10c] sm:$0xf]  ;;  %v1133_v30 = vrot.slane %v1131_v17, 4 }
  0x57   : > { %1012 = vrot.lane.b32.xlu0 %v3571_v58, %s4443_s20  ;;  %v3620_v58 = vld [vmem:[%s4548_s10 + $0xfc] sm:$0x3]  ;;  %v1299_v28 = vrot.slane %v3622_v25, 6  ;;  %v3705_v32 = vld [vmem:[%s4548_s10 + $0x184] sm:$0x7] }
  0x58   : > { %v1295_v63 = vrot.slane %v3620_v58, 6  ;;  %v1865_v5 = vsel %vm4541_vm2, %v3756_v56, %v1864_v57  ;;  %v1866_v9 = vrot.slane %v1864_v57, 4  ;;  %v3572_v56 = vld [vmem:[%s4548_s10 + $0x104] sm:$0xf]  ;;  %v4872_v57 = vld [vmem:[%s4548_s10 + $0x90] sm:$0xf] }
  0x59   : > { %1934 = vst.msk [vmem:[#allocation2 + $0xc] sm:$0xf] %vm205_vm6, %v1865_v5  ;;  %v4294_v58 = vld [vmem:[%s6092_s1 + $0x98] sm:$0xff]   ;;  %v724_v5 = vrot.slane %v3508_v3, 6  ;;  %v555_v6 = vrot.slane %v4872_v57, 7 }
  0x5a   : > { %2154 = vrot.lane.b32.xlu1 %v3798_v1, %s4443_s20  ;;  %v4283_v1 = vld [vmem:[%s6092_s1 + $0x58] sm:$0xff]   ;;  %v1296_v8 = vsel %vm4541_vm2, %v1294_v59, %v1295_v63  ;;  %v1868_v19 = vsel %vm4541_vm2, %v1866_v9, %v1867_v10  ;;  %v3477_v59 = vld [vmem:[%s4548_s10 + $0x94] sm:$0x7]  ;;  %v3736_v44 = vld [vmem:[%s4548_s10 + $0x184] sm:$0xf] }
  0x5b   : > { %1580 = vrot.lane.b32.xlu0 %v3683_v11, %s4443_s20  ;;  %4041 = vmatprep.subr.bf16.mxu0 %v4283_v1  ;;  %v4284_v11 = vld [vmem:[%s6092_s1 + $0xe8] sm:$0xff]   ;;  %1363 = vst.msk [vmem:[#allocation2 + $0x1c] sm:$0xf] %vm205_vm6, %v1296_v8  ;;  %1935 = vst.msk [vmem:[#allocation2 + $0x20] sm:$0xf] %vm205_vm6, %v1868_v19  ;;  %v4296_v1 = vld [vmem:[%s6092_s1 + $0xd0] sm:$0xff]  }
  0x5c   : > { %4101 = vmatprep.subr.bf16.mxu1 %v4284_v11  ;;  %v3685_v63 = vld [vmem:[%s4548_s10 + $0x114] sm:$0xf]  ;;  %v3684_v8 = vld [vmem:[%s4548_s10 + $0x110] sm:$0xf]  ;;  %v558_v9 = vrot.slane %v3477_v59, 7  ;;  %v1871_v47 = vrot.slane %v3736_v44, 6 }
  0x5d   : > { %4102 = vmatpush3.bf16.msra.mxu1 %v4286_v26  ;;  %v4298_v11 = vld [vmem:[%s6092_s1 + $0x90] sm:$0xff]   ;;  %v4911_v19 = vld [vmem:[%s4548_s10 + $0x180] sm:$0xf]  ;;  %v3703_v34 = vld [vmem:[%s4548_s10 + $0x17c] sm:$0x8] }
  0x5e   : > { %602 = vrot.lane.b32.xlu1 %v549_v22, %s4444_s21  ;;  %v2271_v22 = vrot.slane %v3816_v7, 6  ;;  %v4297_v7 = vld [vmem:[%s6092_s1] sm:$0xff]   ;;  %v1703_v39 = vrot.slane %v4911_v19, 7  ;;  %v3543_v61 = vld [vmem:[%s4548_s10 + $0xac] sm:$0xf] }
  0x5f   : > { %2156 = vrot.lane.b32.xlu0 %v3799_v23, %s4443_s20  ;;  %v4285_v23 = vld [vmem:[%s6092_s1 + $0x18] sm:$0xff]   ;;  %v3656_v19 = vld [vmem:[%s4548_s10 + $0x120] sm:$0xe]  ;;  %v3856_v0 = vld [vmem:[%s4548_s10 + $0x250] sm:$0xf] }
  0x60   : > { %4042 = vmatpush3.bf16.msra.mxu0 %v4285_v23  ;;  %v2272_v33 = vsel %vm4541_vm2, %v2270_v21, %v2271_v22  ;;  %v3621_v21 = vld [vmem:[%s4548_s10 + $0x108] sm:$0xc]  ;;  %v726_v22 = vrot.slane %v724_v5, 4  ;;  %v557_v23 = vrot.slane %v555_v6, 4  ;;  %v3625_v44 = vld [vmem:[%s4548_s10 + $0x120] sm:$0xf] }
  0x61   : > { %4043 = vmatprep.subr.bf16.mxu0 %v4287_v35  ;;  %v3643_v26 = vrot.slane %v3621_v21, 10  ;;  %v4928_v35 = vld [vmem:[%s4548_s10 + $0x1fc] sm:$0xf]  ;;  %v3585_v13 = vld [vmem:[%s4548_s10 + $0x180] sm:$0xf] }
  0x62   : > { %1178 = vrot.lane.b32.xlu1 %v1125_v36, %s4444_s21  ;;  %v3789_v36 = vrot.slane %v3767_v29, 9  ;;  %v727_v29 = vrot.slane %v3509_v27, 6  ;;  %v559_v38 = vsel %vm4726_vm9, %v557_v23, %v558_v9  ;;  %v3771_v23 = vld [vmem:[%s4548_s10 + $0x19c] sm:$0xf]  ;;  %v3772_v27 = vld [vmem:[%s4548_s10 + $0x1a0] sm:$0x1] }
  0x63   : > { %604 = vrot.lane.b32.xlu0 %v552_v45, %s4444_s21  ;;  %v4288_v45 = vld [vmem:[%s6092_s1 + $0xe0] sm:$0xff]   ;;  %v3851_v12 = vld [vmem:[%s4548_s10 + $0x218] sm:$0xf]  ;;  %2412 = vst.msk [vmem:[#allocation2 + $0xd8] sm:$0xf] %vm205_vm6, %v3856_v0 }
  0x64   : > { %v2008_v43 = vsel %vm4625_vm5, %v3789_v36, %v2007_v37  ;;  %4103 = vmatprep.subr.bf16.mxu1 %v4288_v45  ;;  %4044 = vmatpush3.bf16.msra.mxu0 %v4289_v48  ;;  %v1300_v36 = vsel %vm4541_vm2, %v3643_v26, %v1299_v28  ;;  %v728_v37 = vsel %vm4541_vm2, %v726_v22, %v727_v29  ;;  %v1301_v48 = vrot.slane %v1299_v28, 4 }
  0x65   : > { %4104 = vmatpush3.bf16.msra.mxu1 %v4290_v49  ;;  %4045 = vmatprep.subr.bf16.mxu0 %v4291_v51  ;;  %1364 = vst.msk [vmem:[#allocation2 + $0x30] sm:$0xf] %vm205_vm6, %v1300_v36  ;;  %790 = vst.msk [vmem:[#allocation2 + $0x40] sm:$0xf] %vm205_vm6, %v728_v37  ;;  %v3676_v26 = vrot.slane %v3656_v19, 9 }
  0x66   : > { %1750 = vrot.lane.b32.xlu1 %v1697_v55, %s4444_s21  ;;  %v4293_v55 = vld [vmem:[%s6092_s1 + $0x8] sm:$0xff]   ;;  %4105 = vmatprep.subr.bf16.mxu1 %v4292_v53  ;;  %v3725_v53 = vrot.slane %v3703_v34, 11  ;;  %v3510_v37 = vld [vmem:[%s4548_s10 + $0xa4] sm:$0xc]  ;;  %2407 = vst.msk [vmem:[#allocation2 + $0x74] sm:$0xf] %vm205_vm6, %v3851_v12 }
  0x67   : > { %1180 = vrot.lane.b32.xlu0 %v1128_v2, %s4444_s21  ;;  %v3507_v2 = vld [vmem:[%s4548_s10 + $0x90] sm:$0xc]  ;;  %v3479_v19 = vld [vmem:[%s4548_s10 + $0xa4] sm:$0xf] }
  0x68   : > { %4046 = vmatpush3.bf16.msra.mxu0 %v4293_v55  ;;  %v3529_v4 = vrot.slane %v3507_v2, 10  ;;  %v2275_v55 = vrot.slane %v4928_v35, 6 }
  0x69   : > { %4106 = vmatpush3.bf16.msra.mxu1 %v4294_v58  ;;  %4047 = vmatprep.subr.bf16.mxu0 %v4295_v62  ;;  %v3737_v58 = vld [vmem:[%s4548_s10 + $0x188] sm:$0x3]  ;;  %v1873_v62 = vrot.slane %v1871_v47, 4 }
  0x6a   : > { %2322 = vrot.lane.b32.xlu1 %v2269_v15, %s4444_s21  ;;  %4107 = vmatprep.subr.bf16.mxu1 %v4296_v1  ;;  %v725_v10 = vsel %vm4541_vm2, %v3529_v4, %v724_v5  ;;  %v3497_v15 = vrot.slane %v3475_v60, 11  ;;  %v3819_v60 = vld [vmem:[%s4548_s10 + $0x200] sm:$0x3]  ;;  %v3817_v1 = vld [vmem:[%s4548_s10 + $0x1f8] sm:$0xc]  ;;  %v2277_v4 = vrot.slane %v2275_v55, 4 }
  0x6b   : > { %1752 = vrot.lane.b32.xlu0 %v1700_v20, %s4444_s21  ;;  %789 = vst.msk [vmem:[#allocation2 + $0x2c] sm:$0xf] %vm205_vm6, %v725_v10  ;;  %v4302_v20 = vld [vmem:[%s6092_s1 + $0xc8] sm:$0xff]   ;;  %v2278_v5 = vrot.slane %v3819_v60, 6  ;;  %v3839_v9 = vrot.slane %v3817_v1, 10 }
  0x6c   : > { %4048 = vmatpush3.bf16.msra.mxu0 %v4297_v7  ;;  %v556_v42 = vsel %vm4726_vm9, %v3497_v15, %v555_v6  ;;  %v3544_v6 = vld [vmem:[%s4548_s10 + $0xb0] sm:$0x1]  ;;  %v870_v7 = vrot.slane %v3543_v61, 5  ;;  %v3657_v10 = vld [vmem:[%s4548_s10 + $0x124] sm:$0xf] }
  0x6d   : > { %4108 = vmatpush3.bf16.msra.mxu1 %v4298_v11  ;;  %v3542_v11 = vld [vmem:[%s4548_s10 + $0xa8] sm:$0xe]  ;;  %v2279_v15 = vsel %vm4541_vm2, %v2277_v4, %v2278_v5  ;;  %v2276_v21 = vsel %vm4541_vm2, %v3839_v9, %v2275_v55  ;;  %v3740_v60 = vld [vmem:[%s4548_s10 + $0x19c] sm:$0x3]  ;;  %v399_v9 = vld [vmem:[%s4548_s10 + $0x38] sm:$0xf] }
  0x6e   : > { %914 = vrot.lane.b32.xlu1 %v864_v31, %s4442_s11  ;;  %4109 = vmatprep.subr.bf16.mxu1 %v4302_v20  ;;  %v1134_v31 = vrot.slane %v3591_v16, 7  ;;  %v872_v16 = vrot.slane %v870_v7, 4  ;;  %v3562_v22 = vrot.slane %v3542_v11, 9  ;;  %v1881_v1 = vrot.slane %v3740_v60, 6 }
  0x6f   : > { %2324 = vrot.lane.b32.xlu0 %v2272_v33, %s4444_s21  ;;  %v4303_v33 = vld [vmem:[%s6092_s1 + $0x88] sm:$0xff]  }
  0x70   : > { %v1135_v51 = vsel %vm4726_vm9, %v1133_v30, %v1134_v31  ;;  %v2014_v30 = vrot.slane %v3771_v23, 5  ;;  %v3511_v31 = vld [vmem:[%s4548_s10 + $0xa8] sm:$0xf]  ;;  %v871_v34 = vsel %vm4625_vm5, %v3562_v22, %v870_v7  ;;  %v3686_v22 = vld [vmem:[%s4548_s10 + $0x124] sm:$0xf] }
  0x71   : > { %4110 = vmatpush3.bf16.msra.mxu1 %v4303_v33  ;;  %v731_v35 = vrot.slane %v3511_v31, 6  ;;  %v3480_v23 = vld [vmem:[%s4548_s10 + $0xa8] sm:$0x7] }
  0x72   : > { %1486 = vrot.lane.b32.xlu1 %v1436_v40, %s4442_s11  ;;  %v4304_v40 = vld [vmem:[%s6092_s1 + $0xc0] sm:$0xff]   ;;  %v565_v31 = vrot.slane %v3480_v23, 7 }
  0x73   : > { %916 = vrot.lane.b32.xlu0 %v867_v41, %s4442_s11  ;;  %v3735_v41 = vld [vmem:[%s4548_s10 + $0x180] sm:$0xc]  ;;  %4111 = vmatprep.subr.bf16.mxu1 %v4304_v40  ;;  %v3530_v40 = vrot.slane %v3510_v37, 10 }
  0x74   : > { %v3757_v45 = vrot.slane %v3735_v41, 10  ;;  %v3594_v37 = vld [vmem:[%s4548_s10 + $0x120] sm:$0x7] }
  0x76   : > { %2058 = vrot.lane.b32.xlu1 %v2008_v43, %s4442_s11  ;;  %v3611_v43 = vrot.slane %v3589_v24, 11 }
  0x77   : > { %1488 = vrot.lane.b32.xlu0 %v1439_v46, %s4442_s11  ;;  %v3623_v46 = vld [vmem:[%s4548_s10 + $0x110] sm:$0x3] }
  0x78   : > { %v1302_v49 = vrot.slane %v3623_v46, 6  ;;  %v1132_v59 = vsel %vm4726_vm9, %v3611_v43, %v1131_v17  ;;  %v3658_v17 = vld [vmem:[%s4548_s10 + $0x128] sm:$0x1]  ;;  %v733_v43 = vrot.slane %v731_v35, 4  ;;  %v2016_v46 = vrot.slane %v2014_v30, 4 }
  0x79   : > { %v1445_v25 = vrot.slane %v3658_v17, 5 }
  0x7a   : > { %432 = vrot.lane.b32.xlu1 %v397_v50, %s4443_s20  ;;  %v4305_v50 = vld [vmem:[%s6092_s1 + $0x80] sm:$0xff]   ;;  %v1303_v57 = vsel %vm4541_vm2, %v1301_v48, %v1302_v49  ;;  %v1306_v49 = vrot.slane %v3625_v44, 6  ;;  %v3708_v44 = vld [vmem:[%s4548_s10 + $0x198] sm:$0x7] }
  0x7b   : > { %2060 = vrot.lane.b32.xlu0 %v2011_v52, %s4442_s11  ;;  %v1706_v52 = vrot.slane %v3705_v32, 7  ;;  %4112 = vmatpush3.bf16.msra.mxu1 %v4305_v50  ;;  %1365 = vst.msk [vmem:[#allocation2 + $0x44] sm:$0xf] %vm205_vm6, %v1303_v57  ;;  %v3512_v32 = vld [vmem:[%s4548_s10 + $0xac] sm:$0x3] }
  0x7c   : > { %v734_v36 = vrot.slane %v3512_v32, 6  ;;  %v3626_v48 = vld [vmem:[%s4548_s10 + $0x124] sm:$0x3]  ;;  %v3624_v50 = vld [vmem:[%s4548_s10 + $0x11c] sm:$0xc]  ;;  %v1308_v57 = vrot.slane %v1306_v49, 4 }
  0x7d   : > { %v3644_v55 = vrot.slane %v3624_v50, 10  ;;  %v5088_v50 = vld [vmem:[%s4548_s10 + $0x210] sm:$0xf] }
  0x7e   : > { %1016 = vrot.lane.b32.xlu1 %v3573_v54, %s4443_s20  ;;  %v1705_v54 = vrot.slane %v1703_v39, 4 }
  0x7f   : > { %1014 = vrot.lane.b32.xlu0 %v3572_v56, %s4443_s20  ;;  %v1872_v56 = vsel %vm4541_vm2, %v3757_v45, %v1871_v47  ;;  %v732_v47 = vsel %vm4541_vm2, %v3530_v40, %v731_v35  ;;  %v3802_v35 = vld [vmem:[%s4548_s10 + $0x208] sm:$0xf] }
  0x80   : > { %1936 = vst.msk [vmem:[#allocation2 + $0x34] sm:$0xf] %vm205_vm6, %v1872_v56  ;;  %v1707_v3 = vsel %vm4726_vm9, %v1705_v54, %v1706_v52  ;;  %791 = vst.msk [vmem:[#allocation2 + $0x54] sm:$0xf] %vm205_vm6, %v732_v47  ;;  %v1309_v54 = vrot.slane %v3626_v48, 6 }
  0x82   : > { %1584 = vrot.lane.b32.xlu1 %v3685_v63, %s4443_s20  ;;  %v1874_v63 = vrot.slane %v3737_v58, 6  ;;  %v1307_v58 = vsel %vm4541_vm2, %v3644_v55, %v1306_v49  ;;  %v3706_v49 = vld [vmem:[%s4548_s10 + $0x190] sm:$0x8] }
  0x83   : > { %1582 = vrot.lane.b32.xlu0 %v3684_v8, %s4443_s20  ;;  %v1704_v8 = vsel %vm4726_vm9, %v3725_v53, %v1703_v39  ;;  %v3770_v39 = vld [vmem:[%s4548_s10 + $0x198] sm:$0xe]  ;;  %v735_v53 = vsel %vm4541_vm2, %v733_v43, %v734_v36  ;;  %1366 = vst.msk [vmem:[#allocation2 + $0x58] sm:$0xf] %vm205_vm6, %v1307_v58  ;;  %v1141_v43 = vrot.slane %v3594_v37, 7  ;;  %v3726_v60 = vrot.slane %v3706_v49, 11 }
  0x84   : > { %v1875_v2 = vsel %vm4541_vm2, %v1873_v62, %v1874_v63  ;;  %v3790_v52 = vrot.slane %v3770_v39, 9  ;;  %792 = vst.msk [vmem:[#allocation2 + $0x68] sm:$0xf] %vm205_vm6, %v735_v53  ;;  %v1310_v62 = vsel %vm4541_vm2, %v1308_v57, %v1309_v54  ;;  %v3592_v39 = vld [vmem:[%s4548_s10 + $0x118] sm:$0x8] }
  0x85   : > { %1937 = vst.msk [vmem:[#allocation2 + $0x48] sm:$0xf] %vm205_vm6, %v1875_v2  ;;  %v3738_v2 = vld [vmem:[%s4548_s10 + $0x194] sm:$0xc]  ;;  %1367 = vst.msk [vmem:[#allocation2 + $0x6c] sm:$0xf] %vm205_vm6, %v1310_v62 }
  0x86   : > { %2160 = vrot.lane.b32.xlu1 %v3801_v14, %s4443_s20  ;;  %v873_v14 = vrot.slane %v3544_v6, 5  ;;  %v2015_v4 = vsel %vm4625_vm5, %v3790_v52, %v2014_v30  ;;  %v3758_v5 = vrot.slane %v3738_v2, 10  ;;  %v3612_v48 = vrot.slane %v3592_v39, 11  ;;  %v3515_v53 = vld [vmem:[%s4548_s10 + $0xc0] sm:$0x3] }
  0x87   : > { %2158 = vrot.lane.b32.xlu0 %v3800_v18, %s4443_s20  ;;  %v1442_v18 = vrot.slane %v3657_v10, 5  ;;  %v3513_v54 = vld [vmem:[%s4548_s10 + $0xb8] sm:$0xc]  ;;  %v741_v58 = vrot.slane %v3515_v53, 6  ;;  %v2282_v62 = vrot.slane %v5088_v50, 6 }
  0x88   : > { %v874_v28 = vsel %vm4625_vm5, %v872_v16, %v873_v14  ;;  %v398_v14 = vld [vmem:[%s4548_s10 + $0x34] sm:$0xf]  ;;  %v3575_v16 = vld [vmem:[%s4548_s10 + $0x11c] sm:$0xf] }
  0x89   : > { %v1444_v29 = vrot.slane %v1442_v18, 4  ;;  %v1443_v41 = vsel %vm4625_vm5, %v3676_v26, %v1442_v18  ;;  %v3574_v18 = vld [vmem:[%s4548_s10 + $0x118] sm:$0xf]  ;;  %v3593_v26 = vld [vmem:[%s4548_s10 + $0x11c] sm:$0xf] }
  0x8a   : > { %608 = vrot.lane.b32.xlu1 %v559_v38, %s4444_s21  ;;  %v1138_v32 = vrot.slane %v3593_v26, 7  ;;  %v3660_v26 = vld [vmem:[%s4548_s10 + $0x138] sm:$0xf] }
  0x8b   : > { %606 = vrot.lane.b32.xlu0 %v556_v42, %s4444_s21  ;;  %v2017_v42 = vrot.slane %v3772_v27, 5  ;;  %v1446_v45 = vsel %vm4625_vm5, %v1444_v29, %v1445_v25  ;;  %v3803_v29 = vld [vmem:[%s4548_s10 + $0x20c] sm:$0xf]  ;;  %v1449_v39 = vrot.slane %v3660_v26, 5  ;;  %v3481_v26 = vld [vmem:[%s4548_s10 + $0xb4] sm:$0x8] }
  0x8c   : > { %v1139_v2 = vsel %vm4726_vm9, %v3612_v48, %v1138_v32  ;;  %v3659_v48 = vld [vmem:[%s4548_s10 + $0x134] sm:$0xe] }
  0x8d   : > { %v2018_v61 = vsel %vm4625_vm5, %v2016_v46, %v2017_v42  ;;  %v1140_v42 = vrot.slane %v1138_v32, 4 }
  0x8e   : > { %1184 = vrot.lane.b32.xlu1 %v1135_v51, %s4444_s21 }
  0x8f   : > { %1182 = vrot.lane.b32.xlu0 %v1132_v59, %s4444_s21  ;;  %v3739_v59 = vld [vmem:[%s4548_s10 + $0x198] sm:$0xf] }
  0x90   : > { %v1878_v63 = vrot.slane %v3739_v59, 6  ;;  %v1142_v59 = vsel %vm4726_vm9, %v1140_v42, %v1141_v43 }
  0x92   : > { %1756 = vrot.lane.b32.xlu1 %v1707_v3, %s4444_s21  ;;  %v1880_v7 = vrot.slane %v1878_v63, 4 }
  0x93   : > { %1754 = vrot.lane.b32.xlu0 %v1704_v8, %s4444_s21  ;;  %v1879_v8 = vsel %vm4541_vm2, %v3758_v5, %v1878_v63  ;;  %v3531_v63 = vrot.slane %v3513_v54, 10 }
  0x94   : > { %v334_v20 = vpop.permute.xlu1 %333  ;;  %v1882_v10 = vsel %vm4541_vm2, %v1880_v7, %v1881_v1  ;;  %1938 = vst.msk [vmem:[#allocation2 + $0x5c] sm:$0xf] %vm205_vm6, %v1879_v8 }
  0x95   : > { %380 = vst.msk [vmem:[#allocation2 + $0x28] sm:$0xf] %vm377_vm10, %v334_v20  ;;  %v330_v24 = vpop.permute.xlu0 %329 }
  0x96   : > { %378 = vst.msk [vmem:[#allocation2] sm:$0xf] %vm377_vm10, %v330_v24  ;;  %2328 = vrot.lane.b32.xlu1 %v2279_v15, %s4444_s21  ;;  %v562_v24 = vrot.slane %v3479_v19, 7 }
  0x97   : > { %2326 = vrot.lane.b32.xlu0 %v2276_v21, %s4444_s21  ;;  %1939 = vst.msk [vmem:[#allocation2 + $0x70] sm:$0xf] %vm205_vm6, %v1882_v10  ;;  %v3687_v21 = vld [vmem:[%s4548_s10 + $0x128] sm:$0xf] }
  0x98   : > { %v336_v33 = vpop.permute.xlu1 %335  ;;  %v564_v30 = vrot.slane %v562_v24, 4 }
  0x99   : > { %381 = vst.msk [vmem:[#allocation2 + $0x3c] sm:$0xf] %vm377_vm10, %v336_v33  ;;  %v338_v38 = vpop.permute.xlu0 %337  ;;  %v5070_v33 = vld [vmem:[%s4548_s10 + $0x194] sm:$0xf] }
  0x9a   : > { %382 = vst.msk [vmem:[#allocation2 + $0x50] sm:$0xf] %vm377_vm10, %v338_v38  ;;  %920 = vrot.lane.b32.xlu1 %v874_v28, %s4442_s11  ;;  %v3478_v28 = vld [vmem:[%s4548_s10 + $0xa0] sm:$0x8]  ;;  %v1710_v40 = vrot.slane %v5070_v33, 7 }
  0x9b   : > { %918 = vrot.lane.b32.xlu0 %v871_v34, %s4442_s11  ;;  %v3498_v36 = vrot.slane %v3478_v28, 11  ;;  %v3742_v28 = vld [vmem:[%s4548_s10 + $0x1ac] sm:$0xf]  ;;  %v3741_v33 = vld [vmem:[%s4548_s10 + $0x1a8] sm:$0xc] }
  0x9c   : > { %v340_v51 = vpop.permute.xlu1 %339  ;;  %v1712_v55 = vrot.slane %v1710_v40, 4  ;;  %v1885_v32 = vrot.slane %v3742_v28, 6  ;;  %v3805_v28 = vld [vmem:[%s4548_s10 + $0x220] sm:$0xf] }
  0x9d   : > { %383 = vst.msk [vmem:[#allocation2 + $0x64] sm:$0xf] %vm377_vm10, %v340_v51  ;;  %v342_v56 = vpop.permute.xlu0 %341  ;;  %v563_v47 = vsel %vm4726_vm9, %v3498_v36, %v562_v24  ;;  %v1711_v24 = vsel %vm4726_vm9, %v3726_v60, %v1710_v40  ;;  %v3759_v36 = vrot.slane %v3741_v33, 10  ;;  %v3804_v33 = vld [vmem:[%s4548_s10 + $0x21c] sm:$0xf] }
  0x9e   : > { %384 = vst.msk [vmem:[#allocation2 + $0x78] sm:$0xf] %vm377_vm10, %v342_v56  ;;  %1492 = vrot.lane.b32.xlu1 %v1446_v45, %s4442_s11  ;;  %v3514_v45 = vld [vmem:[%s4548_s10 + $0xbc] sm:$0xf]  ;;  %v1713_v56 = vrot.slane %v3708_v44, 7  ;;  %v1887_v40 = vrot.slane %v1885_v32, 4 }
  0x9f   : > { %1490 = vrot.lane.b32.xlu0 %v1443_v41, %s4442_s11  ;;  %v566_v41 = vsel %vm4726_vm9, %v564_v30, %v565_v31  ;;  %v738_v51 = vrot.slane %v3514_v45, 6  ;;  %v3743_v31 = vld [vmem:[%s4548_s10 + $0x1b0] sm:$0x3]  ;;  %v3661_v44 = vld [vmem:[%s4548_s10 + $0x13c] sm:$0x1] }
  0xa0   : > { %v344_v3 = vpop.permute.xlu1 %343  ;;  %v3774_v45 = vld [vmem:[%s4548_s10 + $0x1b0] sm:$0xf] }
  0xa1   : > { %385 = vst.msk [vmem:[#allocation2 + $0x8c] sm:$0xf] %vm377_vm10, %v344_v3  ;;  %v332_v6 = vpop.permute.xlu0 %331  ;;  %v740_v57 = vrot.slane %v738_v51, 4  ;;  %v3820_v3 = vld [vmem:[%s4548_s10 + $0x20c] sm:$0xc]  ;;  %v739_v8 = vsel %vm4541_vm2, %v3531_v63, %v738_v51  ;;  %v1451_v51 = vrot.slane %v1449_v39, 4 }
  0xa2   : > { %379 = vst.msk [vmem:[#allocation2 + $0x14] sm:$0xf] %vm377_vm10, %v332_v6  ;;  %2064 = vrot.lane.b32.xlu1 %v2018_v61, %s4442_s11  ;;  %v3822_v61 = vld [vmem:[%s4548_s10 + $0x214] sm:$0x3]  ;;  %v3840_v19 = vrot.slane %v3820_v3, 10  ;;  %v2021_v53 = vrot.slane %v3774_v45, 5 }
  0xa3   : > { %2062 = vrot.lane.b32.xlu0 %v2015_v4, %s4442_s11  ;;  %v5104_v4 = vld [vmem:[%s4548_s10 + $0xc0] sm:$0xf]  ;;  %v742_v5 = vsel %vm4541_vm2, %v740_v57, %v741_v58  ;;  %v3628_v6 = vld [vmem:[%s4548_s10 + $0x134] sm:$0xf]  ;;  %793 = vst.msk [vmem:[#allocation2 + $0x7c] sm:$0xf] %vm205_vm6, %v739_v8 }
  0xa4   : > { %v348_v11 = vpop.permute.xlu1 %347  ;;  %794 = vst.msk [vmem:[#allocation2 + $0x90] sm:$0xf] %vm205_vm6, %v742_v5  ;;  %v1313_v10 = vrot.slane %v3628_v6, 6  ;;  %v2283_v42 = vsel %vm4541_vm2, %v3840_v19, %v2282_v62  ;;  %v3775_v57 = vld [vmem:[%s4548_s10 + $0x1b4] sm:$0x1] }
  0xa5   : > { %387 = vst.msk [vmem:[#allocation2 + $0xb4] sm:$0xf] %vm377_vm10, %v348_v11  ;;  %v346_v15 = vpop.permute.xlu0 %345  ;;  %v3627_v11 = vld [vmem:[%s4548_s10 + $0x130] sm:$0xc]  ;;  %v401_v8 = vld [vmem:[%s4548_s10 + $0x4c] sm:$0xf] }
  0xa6   : > { %386 = vst.msk [vmem:[#allocation2 + $0xa0] sm:$0xf] %vm377_vm10, %v346_v15  ;;  %436 = vrot.lane.b32.xlu1 %v399_v9, %s4443_s20  ;;  %v3629_v9 = vld [vmem:[%s4548_s10 + $0x138] sm:$0x3]  ;;  %v2285_v15 = vrot.slane %v3822_v61, 6  ;;  %v2023_v61 = vrot.slane %v2021_v53, 4 }
  0xa7   : > { %434 = vrot.lane.b32.xlu0 %v398_v14, %s4443_s20  ;;  %v1714_v14 = vsel %vm4726_vm9, %v1712_v55, %v1713_v56  ;;  %v3677_v56 = vrot.slane %v3659_v48, 9  ;;  %v3689_v19 = vld [vmem:[%s4548_s10 + $0x13c] sm:$0xf]  ;;  %v3709_v48 = vld [vmem:[%s4548_s10 + $0x1a4] sm:$0x8] }
  0xa8   : > { %v352_v17 = vpop.permute.xlu1 %351 }
  0xa9   : > { %389 = vst.msk [vmem:[#allocation2 + $0xdc] sm:$0xf] %vm377_vm10, %v352_v17  ;;  %v350_v20 = vpop.permute.xlu0 %349  ;;  %v3645_v17 = vrot.slane %v3627_v11, 10 }
  0xaa   : > { %388 = vst.msk [vmem:[#allocation2 + $0xc8] sm:$0xf] %vm377_vm10, %v350_v20  ;;  %1020 = vrot.lane.b32.xlu1 %v3575_v16, %s4443_s20  ;;  %v1316_v16 = vrot.slane %v3629_v9, 6  ;;  %v3547_v20 = vld [vmem:[%s4548_s10 + $0xc4] sm:$0x1] }
  0xab   : > { %1018 = vrot.lane.b32.xlu0 %v3574_v18, %s4443_s20  ;;  %v2284_v18 = vrot.slane %v2282_v62, 4  ;;  %v2024_v62 = vrot.slane %v3775_v57, 5  ;;  %v3518_v57 = vld [vmem:[%s4548_s10 + $0xd4] sm:$0x3] }
  0xac   : > { %v356_v25 = vpop.permute.xlu1 %355 }
  0xad   : > { %391 = vst.msk [vmem:[#allocation2 + $0x104] sm:$0xf] %vm377_vm10, %v356_v25  ;;  %v354_v27 = vpop.permute.xlu0 %353  ;;  %v3545_v25 = vld [vmem:[%s4548_s10 + $0xbc] sm:$0xe]  ;;  %v2286_v37 = vsel %vm4541_vm2, %v2284_v18, %v2285_v15 }
  0xae   : > { %390 = vst.msk [vmem:[#allocation2 + $0xf0] sm:$0xf] %vm377_vm10, %v354_v27  ;;  %1588 = vrot.lane.b32.xlu1 %v3687_v21, %s4443_s20  ;;  %v877_v21 = vrot.slane %v5104_v4, 5  ;;  %v1314_v27 = vsel %vm4541_vm2, %v3645_v17, %v1313_v10  ;;  %v3563_v43 = vrot.slane %v3545_v25, 9  ;;  %v2025_v4 = vsel %vm4625_vm5, %v2023_v61, %v2024_v62  ;;  %v3482_v17 = vld [vmem:[%s4548_s10 + $0xb8] sm:$0xf] }
  0xaf   : > { %1586 = vrot.lane.b32.xlu0 %v3686_v22, %s4443_s20  ;;  %v1315_v22 = vrot.slane %v1313_v10, 4  ;;  %1368 = vst.msk [vmem:[#allocation2 + $0x80] sm:$0xf] %vm205_vm6, %v1314_v27  ;;  %v400_v10 = vld [vmem:[%s4548_s10 + $0x48] sm:$0xf]  ;;  %v748_v61 = vrot.slane %v3518_v57, 6 }
  0xb0   : > { %v360_v34 = vpop.permute.xlu1 %359  ;;  %v878_v55 = vsel %vm4625_vm5, %v3563_v43, %v877_v21  ;;  %v5221_v43 = vld [vmem:[%s4548_s10 + $0x224] sm:$0xf]  ;;  %v3516_v62 = vld [vmem:[%s4548_s10 + $0xcc] sm:$0xc] }
  0xb1   : > { %393 = vst.msk [vmem:[#allocation2 + $0x12c] sm:$0xf] %vm377_vm10, %v360_v34  ;;  %v358_v38 = vpop.permute.xlu0 %357  ;;  %v1317_v30 = vsel %vm4541_vm2, %v1315_v22, %v1316_v16  ;;  %v880_v34 = vrot.slane %v3547_v20, 5  ;;  %v3576_v16 = vld [vmem:[%s4548_s10 + $0x12c] sm:$0xf]  ;;  %v569_v20 = vrot.slane %v3482_v17, 7 }
  0xb2   : > { %392 = vst.msk [vmem:[#allocation2 + $0x118] sm:$0xf] %vm377_vm10, %v358_v38  ;;  %2164 = vrot.lane.b32.xlu1 %v3803_v29, %s4443_s20  ;;  %v879_v38 = vrot.slane %v877_v21, 4  ;;  %v3596_v21 = vld [vmem:[%s4548_s10 + $0x130] sm:$0xf] }
  0xb3   : > { %2162 = vrot.lane.b32.xlu0 %v3802_v35, %s4443_s20  ;;  %1369 = vst.msk [vmem:[#allocation2 + $0x94] sm:$0xf] %vm205_vm6, %v1317_v30  ;;  %v1888_v35 = vrot.slane %v3743_v31, 6  ;;  %v1145_v27 = vrot.slane %v3596_v21, 7  ;;  %v3597_v31 = vld [vmem:[%s4548_s10 + $0x134] sm:$0x7] }
  0xb4   : > { %v429_v46 = vpop.permute.xlu1 %428  ;;  %v881_v50 = vsel %vm4625_vm5, %v879_v38, %v880_v34  ;;  %v3499_v34 = vrot.slane %v3481_v26, 11 }
  0xb5   : > { %476 = vst.msk [vmem:[#allocation2 + $0x14] sm:$0xf] %vm474_vm11, %v429_v46  ;;  %v427_v52 = vpop.permute.xlu0 %426  ;;  %v1886_v46 = vsel %vm4541_vm2, %v3759_v36, %v1885_v32  ;;  %v1889_v49 = vsel %vm4541_vm2, %v1887_v40, %v1888_v35  ;;  %v5209_v35 = vld [vmem:[%s4548_s10 + $0x1a8] sm:$0xf]  ;;  %v1147_v38 = vrot.slane %v1145_v27, 4 }
  0xb6   : > { %475 = vst.msk [vmem:[#allocation2] sm:$0xf] %vm474_vm11, %v427_v52  ;;  %612 = vrot.lane.b32.xlu1 %v566_v41, %s4444_s21  ;;  %v1452_v52 = vrot.slane %v3661_v44, 5  ;;  %v3711_v40 = vld [vmem:[%s4548_s10 + $0x1ac] sm:$0x7] }
  0xb7   : > { %610 = vrot.lane.b32.xlu0 %v563_v47, %s4444_s21  ;;  %1940 = vst.msk [vmem:[#allocation2 + $0x84] sm:$0xf] %vm205_vm6, %v1886_v46  ;;  %1941 = vst.msk [vmem:[#allocation2 + $0x98] sm:$0xf] %vm205_vm6, %v1889_v49  ;;  %v3517_v44 = vld [vmem:[%s4548_s10 + $0xd0] sm:$0xf]  ;;  %v570_v46 = vsel %vm4726_vm9, %v3499_v34, %v569_v20 }
  0xb8   : > { %v911_v1 = vpop.permute.xlu1 %910  ;;  %v1453_v60 = vsel %vm4625_vm5, %v1451_v51, %v1452_v52  ;;  %v745_v49 = vrot.slane %v3517_v44, 6 }
  0xb9   : > { %958 = vst.msk [vmem:[#allocation2 + $0x4] sm:$0xf] %vm377_vm10, %v911_v1  ;;  %v431_v7 = vpop.permute.xlu0 %430  ;;  %v1450_v1 = vsel %vm4625_vm5, %v3677_v56, %v1449_v39  ;;  %v1148_v39 = vrot.slane %v3597_v31, 7  ;;  %v2289_v56 = vrot.slane %v5221_v43, 6 }
  0xba   : > { %477 = vst.msk [vmem:[#allocation2 + $0x28] sm:$0xf] %vm474_vm11, %v431_v7  ;;  %1188 = vrot.lane.b32.xlu1 %v1142_v59, %s4444_s21  ;;  %v3773_v59 = vld [vmem:[%s4548_s10 + $0x1ac] sm:$0xe] }
  0xbb   : > { %1186 = vrot.lane.b32.xlu0 %v1139_v2, %s4444_s21  ;;  %v3791_v2 = vrot.slane %v3773_v59, 9  ;;  %v3727_v59 = vrot.slane %v3709_v48, 11 }
  0xbc   : > { %v1483_v23 = vpop.permute.xlu1 %1482 }
  0xbd   : > { %1530 = vst.msk [vmem:[#allocation2 + $0x8] sm:$0xf] %vm377_vm10, %v1483_v23  ;;  %v913_v29 = vpop.permute.xlu0 %912  ;;  %v2022_v6 = vsel %vm4625_vm5, %v3791_v2, %v2021_v53  ;;  %v3688_v23 = vld [vmem:[%s4548_s10 + $0x138] sm:$0xf]  ;;  %v1149_v53 = vsel %vm4726_vm9, %v1147_v38, %v1148_v39  ;;  %v3823_v2 = vld [vmem:[%s4548_s10 + $0x220] sm:$0xc] }
  0xbe   : > { %959 = vst.msk [vmem:[#allocation2 + $0x18] sm:$0xf] %vm377_vm10, %v913_v29  ;;  %1760 = vrot.lane.b32.xlu1 %v1714_v14, %s4444_s21  ;;  %v3577_v14 = vld [vmem:[%s4548_s10 + $0x130] sm:$0xf]  ;;  %v571_v29 = vrot.slane %v569_v20, 4  ;;  %v3841_v17 = vrot.slane %v3823_v2, 10 }
  0xbf   : > { %1758 = vrot.lane.b32.xlu0 %v1711_v24, %s4444_s21  ;;  %v3483_v24 = vld [vmem:[%s4548_s10 + $0xbc] sm:$0x7]  ;;  %v3630_v20 = vld [vmem:[%s4548_s10 + $0x144] sm:$0xc] }
  0xc0   : > { %v2055_v41 = vpop.permute.xlu1 %2054  ;;  %v572_v30 = vrot.slane %v3483_v24, 7  ;;  %v3663_v24 = vld [vmem:[%s4548_s10 + $0x14c] sm:$0xf]  ;;  %v3646_v26 = vrot.slane %v3630_v20, 10  ;;  %v2290_v44 = vsel %vm4541_vm2, %v3841_v17, %v2289_v56 }
  0xc1   : > { %2102 = vst.msk [vmem:[#allocation2 + $0xc] sm:$0xf] %vm377_vm10, %v2055_v41  ;;  %v1485_v47 = vpop.permute.xlu0 %1484  ;;  %v1456_v38 = vrot.slane %v3663_v24, 5 }
  0xc2   : > { %1531 = vst.msk [vmem:[#allocation2 + $0x1c] sm:$0xf] %vm377_vm10, %v1485_v47  ;;  %2332 = vrot.lane.b32.xlu1 %v2286_v37, %s4444_s21  ;;  %v3595_v37 = vld [vmem:[%s4548_s10 + $0x12c] sm:$0x8]  ;;  %v573_v41 = vsel %vm4726_vm9, %v571_v29, %v572_v30 }
  0xc3   : > { %2330 = vrot.lane.b32.xlu0 %v2283_v42, %s4444_s21  ;;  %v1717_v42 = vrot.slane %v5209_v35, 7  ;;  %v3613_v47 = vrot.slane %v3595_v37, 11  ;;  %v3745_v35 = vld [vmem:[%s4548_s10 + $0x1c0] sm:$0xf] }
  0xc4   : > { %v1011_v54 = vpop.permute.xlu1 %1010  ;;  %v1892_v39 = vrot.slane %v3745_v35, 6  ;;  %v3806_v35 = vld [vmem:[%s4548_s10 + $0x230] sm:$0xf] }
  0xc5   : > { %1058 = vst.msk [vmem:[#allocation2 + $0x4] sm:$0xf] %vm474_vm11, %v1011_v54  ;;  %v2057_v58 = vpop.permute.xlu0 %2056  ;;  %v1720_v54 = vrot.slane %v3711_v40, 7 }
  0xc6   : > { %2103 = vst.msk [vmem:[#allocation2 + $0x20] sm:$0xf] %vm377_vm10, %v2057_v58  ;;  %924 = vrot.lane.b32.xlu1 %v881_v50, %s4442_s11  ;;  %v1719_v58 = vrot.slane %v1717_v42, 4 }
  0xc7   : > { %922 = vrot.lane.b32.xlu0 %v878_v55, %s4442_s11  ;;  %v3825_v55 = vld [vmem:[%s4548_s10 + $0x228] sm:$0x3] }
  0xc8   : > { %v1579_v63 = vpop.permute.xlu1 %1578 }
  0xc9   : > { %1626 = vst.msk [vmem:[#allocation2 + $0x8] sm:$0xf] %vm474_vm11, %v1579_v63  ;;  %v1013_v3 = vpop.permute.xlu0 %1012 }
  0xca   : > { %1059 = vst.msk [vmem:[#allocation2 + $0x18] sm:$0xf] %vm474_vm11, %v1013_v3  ;;  %1496 = vrot.lane.b32.xlu1 %v1453_v60, %s4442_s11  ;;  %v747_v60 = vrot.slane %v745_v49, 4  ;;  %v5241_v3 = vld [vmem:[%s4548_s10 + $0xd4] sm:$0xf] }
  0xcb   : > { %1494 = vrot.lane.b32.xlu0 %v1450_v1, %s4442_s11  ;;  %v1146_v1 = vsel %vm4726_vm9, %v3613_v47, %v1145_v27 }
  0xcc   : > { %v2155_v5 = vpop.permute.xlu1 %2154 }
  0xcd   : > { %2202 = vst.msk [vmem:[#allocation2 + $0xc] sm:$0xf] %vm474_vm11, %v2155_v5  ;;  %v1581_v7 = vpop.permute.xlu0 %1580 }
  0xce   : > { %1627 = vst.msk [vmem:[#allocation2 + $0x1c] sm:$0xf] %vm474_vm11, %v1581_v7  ;;  %2068 = vrot.lane.b32.xlu1 %v2025_v4, %s4442_s11  ;;  %v3532_v4 = vrot.slane %v3516_v62, 10  ;;  %v749_v7 = vsel %vm4541_vm2, %v747_v60, %v748_v61  ;;  %v3776_v61 = vld [vmem:[%s4548_s10 + $0x1c0] sm:$0xe] }
  0xcf   : > { %2066 = vrot.lane.b32.xlu0 %v2022_v6, %s4442_s11  ;;  %v2292_v6 = vrot.slane %v3825_v55, 6  ;;  %796 = vst.msk [vmem:[#allocation2 + $0xb8] sm:$0xf] %vm205_vm6, %v749_v7 }
  0xd0   : > { %v603_v9 = vpop.permute.xlu1 %602 }
  0xd1   : > { %651 = vst.msk [vmem:[#allocation2] sm:$0xf] %vm650_vm12, %v603_v9  ;;  %v2157_v11 = vpop.permute.xlu0 %2156  ;;  %v2291_v9 = vrot.slane %v2289_v56, 4 }
  0xd2   : > { %2203 = vst.msk [vmem:[#allocation2 + $0x20] sm:$0xf] %vm474_vm11, %v2157_v11  ;;  %440 = vrot.lane.b32.xlu1 %v401_v8, %s4443_s20  ;;  %v3631_v8 = vld [vmem:[%s4548_s10 + $0x148] sm:$0xf]  ;;  %v746_v11 = vsel %vm4541_vm2, %v3532_v4, %v745_v49  ;;  %v3792_v4 = vrot.slane %v3776_v61, 9 }
  0xd3   : > { %438 = vrot.lane.b32.xlu0 %v400_v10, %s4443_s20  ;;  %v3550_v10 = vld [vmem:[%s4548_s10 + $0xd8] sm:$0x1]  ;;  %795 = vst.msk [vmem:[#allocation2 + $0xa4] sm:$0xf] %vm205_vm6, %v746_v11  ;;  %v2293_v31 = vsel %vm4541_vm2, %v2291_v9, %v2292_v6  ;;  %v3662_v49 = vld [vmem:[%s4548_s10 + $0x148] sm:$0xe] }
  0xd4   : > { %v1179_v15 = vpop.permute.xlu1 %1178  ;;  %v887_v30 = vrot.slane %v3550_v10, 5  ;;  %v403_v10 = vld [vmem:[%s4548_s10 + $0x60] sm:$0xf] }
  0xd5   : > { %1226 = vst.msk [vmem:[#allocation2 + $0x4] sm:$0xf] %vm650_vm12, %v1179_v15  ;;  %v605_v18 = vpop.permute.xlu0 %604  ;;  %v1320_v15 = vrot.slane %v3631_v8, 6 }
  0xd6   : > { %652 = vst.msk [vmem:[#allocation2 + $0x14] sm:$0xf] %vm650_vm12, %v605_v18  ;;  %1024 = vrot.lane.b32.xlu1 %v3577_v14, %s4443_s20  ;;  %v3632_v14 = vld [vmem:[%s4548_s10 + $0x14c] sm:$0x3]  ;;  %v884_v18 = vrot.slane %v5241_v3, 5 }
  0xd7   : > { %1022 = vrot.lane.b32.xlu0 %v3576_v16, %s4443_s20  ;;  %v1721_v16 = vsel %vm4726_vm9, %v1719_v58, %v1720_v54  ;;  %v1321_v34 = vsel %vm4541_vm2, %v3646_v26, %v1320_v15  ;;  %v3678_v58 = vrot.slane %v3662_v49, 9  ;;  %v3486_v26 = vld [vmem:[%s4548_s10 + $0xd0] sm:$0x7]  ;;  %v3520_v49 = vld [vmem:[%s4548_s10 + $0xe4] sm:$0xf] }
  0xd8   : > { %v1751_v22 = vpop.permute.xlu1 %1750  ;;  %v886_v37 = vrot.slane %v884_v18, 4  ;;  %1370 = vst.msk [vmem:[#allocation2 + $0xa8] sm:$0xf] %vm205_vm6, %v1321_v34 }
  0xd9   : > { %1798 = vst.msk [vmem:[#allocation2 + $0x8] sm:$0xf] %vm650_vm12, %v1751_v22  ;;  %v1181_v25 = vpop.permute.xlu0 %1180  ;;  %v1718_v22 = vsel %vm4726_vm9, %v3727_v59, %v1717_v42  ;;  %v3778_v59 = vld [vmem:[%s4548_s10 + $0x1c8] sm:$0x1]  ;;  %v1457_v3 = vsel %vm4625_vm5, %v3678_v58, %v1456_v38  ;;  %v3519_v58 = vld [vmem:[%s4548_s10 + $0xe0] sm:$0xc] }
  0xda   : > { %1227 = vst.msk [vmem:[#allocation2 + $0x18] sm:$0xf] %vm650_vm12, %v1181_v25  ;;  %1592 = vrot.lane.b32.xlu1 %v3689_v19, %s4443_s20  ;;  %v1323_v19 = vrot.slane %v3632_v14, 6  ;;  %v1322_v25 = vrot.slane %v1320_v15, 4  ;;  %v402_v14 = vld [vmem:[%s4548_s10 + $0x5c] sm:$0xf] }
  0xdb   : > { %1590 = vrot.lane.b32.xlu0 %v3688_v23, %s4443_s20  ;;  %v3548_v23 = vld [vmem:[%s4548_s10 + $0xd0] sm:$0xe] }
  0xdc   : > { %v2323_v32 = vpop.permute.xlu1 %2322 }
  0xdd   : > { %2370 = vst.msk [vmem:[#allocation2 + $0xc] sm:$0xf] %vm650_vm12, %v2323_v32  ;;  %v1753_v36 = vpop.permute.xlu0 %1752  ;;  %v4299_v51 = vld [vmem:[#allocation2] ss:$20 sps:$4 sm:$0xff]   ;;  %v3664_v32 = vld [vmem:[%s4548_s10 + $0x150] sm:$0x1] }
  0xde   : > { %1799 = vst.msk [vmem:[#allocation2 + $0x1c] sm:$0xf] %vm650_vm12, %v1753_v36  ;;  %2168 = vrot.lane.b32.xlu1 %v3805_v28, %s4443_s20  ;;  %v3746_v36 = vld [vmem:[%s4548_s10 + $0x1c4] sm:$0x3] }
  0xdf   : > { %2166 = vrot.lane.b32.xlu0 %v3804_v33, %s4443_s20  ;;  %v1324_v33 = vsel %vm4541_vm2, %v1322_v25, %v1323_v19  ;;  %v1895_v40 = vrot.slane %v3746_v36, 6  ;;  %v3485_v19 = vld [vmem:[%s4548_s10 + $0xcc] sm:$0xf] }
  0xe0   : > { %v915_v45 = vpop.permute.xlu1 %914  ;;  %1371 = vst.msk [vmem:[#allocation2 + $0xbc] sm:$0xf] %vm205_vm6, %v1324_v33  ;;  %v3690_v25 = vld [vmem:[%s4548_s10 + $0x14c] sm:$0xf]  ;;  %v3600_v33 = vld [vmem:[%s4548_s10 + $0x148] sm:$0x7] }
  0xe1   : > { %960 = vst.msk [vmem:[#allocation2 + $0x2c] sm:$0xf] %vm377_vm10, %v915_v45  ;;  %v2325_v50 = vpop.permute.xlu0 %2324  ;;  %v4301_v52 = vld [vmem:[#allocation2 + $0x4] ss:$20 sps:$4 sm:$0xff]   ;;  %v3564_v45 = vrot.slane %v3548_v23, 9 }
  0xe2   : > { %2371 = vst.msk [vmem:[#allocation2 + $0x20] sm:$0xf] %vm650_vm12, %v2325_v50  ;;  %616 = vrot.lane.b32.xlu1 %v573_v41, %s4444_s21  ;;  %3002 = vmatprep.mubr.bf16.mxu0 %v4301_v52  ;;  %v3744_v41 = vld [vmem:[%s4548_s10 + $0x1bc] sm:$0xc]  ;;  %v1894_v50 = vrot.slane %v1892_v39, 4  ;;  %v888_v52 = vsel %vm4625_vm5, %v886_v37, %v887_v30 }
  0xe3   : > { %614 = vrot.lane.b32.xlu0 %v570_v46, %s4444_s21  ;;  %3003 = vmatmul.mubr.bf16.vlgmr.msra.gmra.mxu0 %v4299_v51  ;;  %v3777_v46 = vld [vmem:[%s4548_s10 + $0x1c4] sm:$0xf]  ;;  %v3760_v47 = vrot.slane %v3744_v41, 10  ;;  %v1459_v51 = vrot.slane %v3664_v32, 5  ;;  %v885_v57 = vsel %vm4625_vm5, %v3564_v45, %v884_v18  ;;  %v3578_v18 = vld [vmem:[%s4548_s10 + $0x140] sm:$0xf] }
  0xe4   : > { %v1487_v63 = vpop.permute.xlu1 %1486  ;;  %v2028_v54 = vrot.slane %v3777_v46, 5  ;;  %v1896_v55 = vsel %vm4541_vm2, %v1894_v50, %v1895_v40  ;;  %v3599_v23 = vld [vmem:[%s4548_s10 + $0x144] sm:$0xf]  ;;  %v3807_v30 = vld [vmem:[%s4548_s10 + $0x234] sm:$0xf]  ;;  %v579_v32 = vrot.slane %v3486_v26, 7 }
  0xe5   : > { %1532 = vst.msk [vmem:[#allocation2 + $0x30] sm:$0xf] %vm377_vm10, %v1487_v63  ;;  %v917_v5 = vpop.permute.xlu0 %916  ;;  %v4306_v28 = vld [vmem:[#allocation2 + $0x8] ss:$20 sps:$4 sm:$0xff]   ;;  %v1893_v43 = vsel %vm4541_vm2, %v3760_v47, %v1892_v39  ;;  %v1155_v46 = vrot.slane %v3600_v33, 7 }
  0xe6   : > { %961 = vst.msk [vmem:[#allocation2 + $0x40] sm:$0xf] %vm377_vm10, %v917_v5  ;;  %1192 = vrot.lane.b32.xlu1 %v1149_v53, %s4444_s21  ;;  %v1458_v53 = vrot.slane %v1456_v38, 4  ;;  %v2030_v63 = vrot.slane %v2028_v54, 4  ;;  %v2029_v8 = vsel %vm4625_vm5, %v3792_v4, %v2028_v54  ;;  %v5350_v38 = vld [vmem:[%s4548_s10 + $0x1bc] sm:$0xf] }
  0xe7   : > { %1190 = vrot.lane.b32.xlu0 %v1146_v1, %s4444_s21  ;;  %1942 = vst.msk [vmem:[#allocation2 + $0xac] sm:$0xf] %vm205_vm6, %v1893_v43  ;;  %1943 = vst.msk [vmem:[#allocation2 + $0xc0] sm:$0xf] %vm205_vm6, %v1896_v55  ;;  %v2031_v1 = vrot.slane %v3778_v59, 5  ;;  %v752_v54 = vrot.slane %v3520_v49, 6 }
  0xe8   : > { %v2059_v21 = vpop.permute.xlu1 %2058  ;;  %v1460_v62 = vsel %vm4625_vm5, %v1458_v53, %v1459_v51  ;;  %v5365_v53 = vld [vmem:[%s4548_s10 + $0x238] sm:$0xf]  ;;  %v3533_v4 = vrot.slane %v3519_v58, 10  ;;  %v3666_v33 = vld [vmem:[%s4548_s10 + $0x160] sm:$0xf] }
  0xe9   : > { %2104 = vst.msk [vmem:[#allocation2 + $0x34] sm:$0xf] %vm377_vm10, %v2059_v21  ;;  %v1489_v27 = vpop.permute.xlu0 %1488  ;;  %v4308_v29 = vld [vmem:[#allocation2 + $0xc] ss:$20 sps:$4 sm:$0xff]   ;;  %v2032_v6 = vsel %vm4625_vm5, %v2030_v63, %v2031_v1  ;;  %v3691_v21 = vld [vmem:[%s4548_s10 + $0x150] sm:$0xf] }
  0xea   : > { %1533 = vst.msk [vmem:[#allocation2 + $0x44] sm:$0xf] %vm377_vm10, %v1489_v27  ;;  %1764 = vrot.lane.b32.xlu1 %v1721_v16, %s4444_s21  ;;  %3099 = vmatprep.mubr.bf16.mxu1 %v4308_v29  ;;  %v3579_v16 = vld [vmem:[%s4548_s10 + $0x144] sm:$0xf]  ;;  %v1152_v29 = vrot.slane %v3599_v23, 7  ;;  %v754_v61 = vrot.slane %v752_v54, 4 }
  0xeb   : > { %1762 = vrot.lane.b32.xlu0 %v1718_v22, %s4444_s21  ;;  %3100 = vmatmul.mubr.bf16.vlgmr.msra.gmra.mxu1 %v4306_v28  ;;  %v576_v22 = vrot.slane %v3485_v19, 7  ;;  %v3484_v28 = vld [vmem:[%s4548_s10 + $0xc8] sm:$0x8]  ;;  %v3635_v19 = vld [vmem:[%s4548_s10 + $0x160] sm:$0x3] }
  0xec   : > { %v433_v42 = vpop.permute.xlu1 %432  ;;  %v3500_v37 = vrot.slane %v3484_v28, 11  ;;  %v1154_v45 = vrot.slane %v1152_v29, 4  ;;  %v1330_v23 = vrot.slane %v3635_v19, 6  ;;  %v3551_v28 = vld [vmem:[%s4548_s10 + $0xe4] sm:$0xe] }
  0xed   : > { %478 = vst.msk [vmem:[#allocation2 + $0x3c] sm:$0xf] %vm474_vm11, %v433_v42  ;;  %v2061_v48 = vpop.permute.xlu0 %2060  ;;  %v3598_v42 = vld [vmem:[%s4548_s10 + $0x140] sm:$0x8] }
  0xee   : > { %2105 = vst.msk [vmem:[#allocation2 + $0x48] sm:$0xf] %vm377_vm10, %v2061_v48  ;;  %2336 = vrot.lane.b32.xlu1 %v2293_v31, %s4444_s21  ;;  %v578_v31 = vrot.slane %v576_v22, 4  ;;  %v1724_v48 = vrot.slane %v5350_v38, 7  ;;  %v577_v51 = vsel %vm4726_vm9, %v3500_v37, %v576_v22  ;;  %v3614_v43 = vrot.slane %v3598_v42, 11 }
  0xef   : > { %2334 = vrot.lane.b32.xlu0 %v2290_v44, %s4444_s21  ;;  %v1156_v59 = vsel %vm4726_vm9, %v1154_v45, %v1155_v46  ;;  %v3749_v38 = vld [vmem:[%s4548_s10 + $0x1d8] sm:$0x3] }
  0xf0   : > { %v1017_v56 = vpop.permute.xlu1 %1016  ;;  %v580_v47 = vsel %vm4726_vm9, %v578_v31, %v579_v32  ;;  %v1726_v63 = vrot.slane %v1724_v48, 4 }
  0xf1   : > { %1061 = vst.msk [vmem:[#allocation2 + $0x40] sm:$0xf] %vm474_vm11, %v1017_v56  ;;  %v1015_v60 = vpop.permute.xlu0 %1014  ;;  %v3712_v56 = vld [vmem:[%s4548_s10 + $0x1b8] sm:$0x8] }
  0xf2   : > { %1060 = vst.msk [vmem:[#allocation2 + $0x2c] sm:$0xf] %vm474_vm11, %v1015_v60  ;;  %928 = vrot.lane.b32.xlu1 %v888_v52, %s4442_s11  ;;  %v3714_v52 = vld [vmem:[%s4548_s10 + $0x1c0] sm:$0x7]  ;;  %v3828_v60 = vld [vmem:[%s4548_s10 + $0x23c] sm:$0x3] }
  0xf3   : > { %926 = vrot.lane.b32.xlu0 %v885_v57, %s4442_s11  ;;  %v3521_v57 = vld [vmem:[%s4548_s10 + $0xe8] sm:$0x3]  ;;  %v1727_v1 = vrot.slane %v3714_v52, 7  ;;  %v3667_v52 = vld [vmem:[%s4548_s10 + $0x164] sm:$0x1] }
  0xf4   : > { %v1585_v2 = vpop.permute.xlu1 %1584 }
  0xf5   : > { %1629 = vst.msk [vmem:[#allocation2 + $0x44] sm:$0xf] %vm474_vm11, %v1585_v2  ;;  %v1583_v5 = vpop.permute.xlu0 %1582  ;;  %v2296_v2 = vrot.slane %v5365_v53, 6  ;;  %v3780_v53 = vld [vmem:[%s4548_s10 + $0x1d8] sm:$0xf] }
  0xf6   : > { %1628 = vst.msk [vmem:[#allocation2 + $0x30] sm:$0xf] %vm474_vm11, %v1583_v5  ;;  %1500 = vrot.lane.b32.xlu1 %v1460_v62, %s4442_s11  ;;  %v755_v62 = vrot.slane %v3521_v57, 6 }
  0xf7   : > { %1498 = vrot.lane.b32.xlu0 %v1457_v3, %s4442_s11  ;;  %v3826_v3 = vld [vmem:[%s4548_s10 + $0x234] sm:$0xc]  ;;  %v2298_v26 = vrot.slane %v2296_v2, 4 }
  0xf8   : > { %v2161_v7 = vpop.permute.xlu1 %2160  ;;  %v3842_v32 = vrot.slane %v3826_v3, 10 }
  0xf9   : > { %2205 = vst.msk [vmem:[#allocation2 + $0x48] sm:$0xf] %vm474_vm11, %v2161_v7  ;;  %v2159_v9 = vpop.permute.xlu0 %2158 }
  0xfa   : > { %2204 = vst.msk [vmem:[#allocation2 + $0x34] sm:$0xf] %vm474_vm11, %v2159_v9  ;;  %2072 = vrot.lane.b32.xlu1 %v2032_v6, %s4442_s11  ;;  %v1153_v6 = vsel %vm4726_vm9, %v3614_v43, %v1152_v29  ;;  %v5382_v9 = vld [vmem:[%s4548_s10 + $0xe8] sm:$0xf]  ;;  %v3565_v43 = vrot.slane %v3551_v28, 9 }
  0xfb   : > { %2070 = vrot.lane.b32.xlu0 %v2029_v8, %s4442_s11  ;;  %v3728_v8 = vrot.slane %v3712_v56, 11  ;;  %v3665_v56 = vld [vmem:[%s4548_s10 + $0x15c] sm:$0xe] }
  0xfc   : > { %v609_v11 = vpop.permute.xlu1 %608 }
  0xfd   : > { %654 = vst.msk [vmem:[#allocation2 + $0x3c] sm:$0xf] %vm650_vm12, %v609_v11  ;;  %v607_v15 = vpop.permute.xlu0 %606  ;;  %v3634_v11 = vld [vmem:[%s4548_s10 + $0x15c] sm:$0xf]  ;;  %v1725_v31 = vsel %vm4726_vm9, %v3728_v8, %v1724_v48  ;;  %v1463_v48 = vrot.slane %v3666_v33, 5 }
  0xfe   : > { %653 = vst.msk [vmem:[#allocation2 + $0x28] sm:$0xf] %vm650_vm12, %v607_v15  ;;  %444 = vrot.lane.b32.xlu1 %v403_v10, %s4443_s20  ;;  %v756_v10 = vsel %vm4541_vm2, %v754_v61, %v755_v62  ;;  %v1327_v22 = vrot.slane %v3634_v11, 6  ;;  %v2035_v61 = vrot.slane %v3780_v53, 5 }
  0xff   : > { %442 = vrot.lane.b32.xlu0 %v402_v14, %s4443_s20  ;;  %798 = vst.msk [vmem:[#allocation2 + $0xe0] sm:$0xf] %vm205_vm6, %v756_v10 }
 0x100   : > { %v1185_v17 = vpop.permute.xlu1 %1184 }
 0x101   : > { %1229 = vst.msk [vmem:[#allocation2 + $0x40] sm:$0xf] %vm650_vm12, %v1185_v17  ;;  %v1183_v20 = vpop.permute.xlu0 %1182  ;;  %v2299_v17 = vrot.slane %v3828_v60, 6  ;;  %v1466_v60 = vrot.slane %v3667_v52, 5 }
 0x102   : > { %1228 = vst.msk [vmem:[#allocation2 + $0x2c] sm:$0xf] %vm650_vm12, %v1183_v20  ;;  %1028 = vrot.lane.b32.xlu1 %v3579_v16, %s4443_s20 }
 0x103   : > { %1026 = vrot.lane.b32.xlu0 %v3578_v18, %s4443_s20  ;;  %v753_v18 = vsel %vm4541_vm2, %v3533_v4, %v752_v54  ;;  %v2300_v46 = vsel %vm4541_vm2, %v2298_v26, %v2299_v17  ;;  %v3779_v4 = vld [vmem:[%s4548_s10 + $0x1d4] sm:$0xe] }
 0x104   : > { %v1757_v24 = vpop.permute.xlu1 %1756  ;;  %797 = vst.msk [vmem:[#allocation2 + $0xcc] sm:$0xf] %vm205_vm6, %v753_v18  ;;  %v3793_v10 = vrot.slane %v3779_v4, 9  ;;  %v405_v18 = vld [vmem:[%s4548_s10 + $0x74] sm:$0xf] }
 0x105   : > { %1801 = vst.msk [vmem:[#allocation2 + $0x44] sm:$0xf] %vm650_vm12, %v1757_v24  ;;  %v1755_v27 = vpop.permute.xlu0 %1754  ;;  %v3633_v24 = vld [vmem:[%s4548_s10 + $0x158] sm:$0xc] }
 0x106   : > { %1800 = vst.msk [vmem:[#allocation2 + $0x30] sm:$0xf] %vm650_vm12, %v1755_v27  ;;  %1596 = vrot.lane.b32.xlu1 %v3691_v21, %s4443_s20  ;;  %v3553_v21 = vld [vmem:[%s4548_s10 + $0xec] sm:$0x1]  ;;  %v891_v27 = vrot.slane %v5382_v9, 5  ;;  %v3647_v29 = vrot.slane %v3633_v24, 10 }
 0x107   : > { %1594 = vrot.lane.b32.xlu0 %v3690_v25, %s4443_s20  ;;  %v1728_v25 = vsel %vm4726_vm9, %v1726_v63, %v1727_v1  ;;  %v3679_v1 = vrot.slane %v3665_v56, 9  ;;  %v3580_v24 = vld [vmem:[%s4548_s10 + $0x154] sm:$0xf] }
 0x108   : > { %v2329_v34 = vpop.permute.xlu1 %2328  ;;  %v2427_v36 = vld [vmem:[#allocation2 + $0x3c] sm:$0xff]  ;;  %v1328_v37 = vsel %vm4541_vm2, %v3647_v29, %v1327_v22  ;;  %v892_v63 = vsel %vm4625_vm5, %v3565_v43, %v891_v27 }
 0x109   : > { %2373 = vst.msk [vmem:[#allocation2 + $0x48] sm:$0xf] %vm650_vm12, %v2329_v34  ;;  %v2327_v39 = vpop.permute.xlu0 %2326  ;;  %v2424_v40 = vld [vmem:[#allocation2 + $0x28] sm:$0xff]  ;;  %v1329_v34 = vrot.slane %v1327_v22, 4  ;;  %v1464_v9 = vsel %vm4625_vm5, %v3679_v1, %v1463_v48  ;;  %v3581_v22 = vld [vmem:[%s4548_s10 + $0x158] sm:$0xf] }
 0x10a   : > { %v4309_v41 = vld [vmem:[#allocation2 + $0x2c] ss:$20 sps:$4 sm:$0xff]   ;;  %2372 = vst.msk [vmem:[#allocation2 + $0x34] sm:$0xf] %vm650_vm12, %v2327_v39  ;;  %2172 = vrot.lane.b32.xlu1 %v3807_v30, %s4443_s20  ;;  %v3868_v44 = vcombine.low %v2424_v40, %v2427_v36  ;;  %v3747_v40 = vld [vmem:[%s4548_s10 + $0x1d0] sm:$0xc] }
 0x10b   : > { %2170 = vrot.lane.b32.xlu0 %v3806_v35, %s4443_s20  ;;  %3010 = vmatprep.mubr.bf16.mxu0 %v4309_v41  ;;  %v3748_v35 = vld [vmem:[%s4548_s10 + $0x1d4] sm:$0xf]  ;;  %v894_v41 = vrot.slane %v3553_v21, 5  ;;  %v1331_v42 = vsel %vm4541_vm2, %v1329_v34, %v1330_v23  ;;  %1372 = vst.msk [vmem:[#allocation2 + $0xd0] sm:$0xf] %vm205_vm6, %v1328_v37  ;;  %v3761_v45 = vrot.slane %v3747_v40, 10 }
 0x10c   : > { %v921_v50 = vpop.permute.xlu1 %920  ;;  %3011 = vmatmul.mubr.bf16.gmra.mxu0 %v3868_v44  ;;  %v1899_v39 = vrot.slane %v3748_v35, 6  ;;  %v1902_v44 = vrot.slane %v3749_v38, 6  ;;  %1373 = vst.msk [vmem:[#allocation2 + $0xe4] sm:$0xf] %vm205_vm6, %v1331_v42  ;;  %v3487_v34 = vld [vmem:[%s4548_s10 + $0xdc] sm:$0x8] }
 0x10d   : > { %963 = vst.msk [vmem:[#allocation2 + $0x68] sm:$0xf] %vm377_vm10, %v921_v50  ;;  %v919_v55 = vpop.permute.xlu0 %918  ;;  %v3809_v35 = vld [vmem:[%s4548_s10 + $0x248] sm:$0xf]  ;;  %v3524_v1 = vld [vmem:[%s4548_s10 + $0xfc] sm:$0x3] }
 0x10e   : > { %962 = vst.msk [vmem:[#allocation2 + $0x54] sm:$0xf] %vm377_vm10, %v919_v55  ;;  %620 = vrot.lane.b32.xlu1 %v580_v47, %s4444_s21  ;;  %v893_v47 = vrot.slane %v891_v27, 4  ;;  %v1901_v49 = vrot.slane %v1899_v39, 4  ;;  %v1900_v54 = vsel %vm4541_vm2, %v3761_v45, %v1899_v39  ;;  %v3693_v27 = vld [vmem:[%s4548_s10 + $0x164] sm:$0xf] }
 0x10f   : > { %618 = vrot.lane.b32.xlu0 %v577_v51, %s4444_s21  ;;  %v2297_v51 = vsel %vm4541_vm2, %v3842_v32, %v2296_v2  ;;  %1944 = vst.msk [vmem:[#allocation2 + $0xd4] sm:$0xf] %vm205_vm6, %v1900_v54  ;;  %v3781_v2 = vld [vmem:[%s4548_s10 + $0x1dc] sm:$0x1]  ;;  %v3602_v32 = vld [vmem:[%s4548_s10 + $0x158] sm:$0xf] }
 0x110   : > { %v1493_v5 = vpop.permute.xlu1 %1492  ;;  %v2428_v7 = vld [vmem:[#allocation2 + $0x44] sm:$0xff]  ;;  %v1903_v57 = vsel %vm4541_vm2, %v1901_v49, %v1902_v44  ;;  %v895_v58 = vsel %vm4625_vm5, %v893_v47, %v894_v41  ;;  %v1159_v38 = vrot.slane %v3602_v32, 7  ;;  %v5485_v39 = vld [vmem:[%s4548_s10 + $0x1d0] sm:$0xf]  ;;  %v3501_v44 = vrot.slane %v3487_v34, 11 }
 0x111   : > { %1535 = vst.msk [vmem:[#allocation2 + $0x6c] sm:$0xf] %vm377_vm10, %v1493_v5  ;;  %v1491_v14 = vpop.permute.xlu0 %1490  ;;  %v2425_v15 = vld [vmem:[#allocation2 + $0x30] sm:$0xff]  ;;  %v3808_v41 = vld [vmem:[%s4548_s10 + $0x244] sm:$0xf]  ;;  %v1731_v43 = vrot.slane %v5485_v39, 7 }
 0x112   : > { %v4311_v16 = vld [vmem:[#allocation2 + $0x34] ss:$20 sps:$4 sm:$0xff]   ;;  %1534 = vst.msk [vmem:[#allocation2 + $0x58] sm:$0xf] %vm377_vm10, %v1491_v14  ;;  %1196 = vrot.lane.b32.xlu1 %v1156_v59, %s4444_s21  ;;  %v3870_v20 = vcombine.low %v2425_v15, %v2428_v7  ;;  %v1465_v59 = vrot.slane %v1463_v48, 4  ;;  %v2038_v7 = vrot.slane %v3781_v2, 5 }
 0x113   : > { %1194 = vrot.lane.b32.xlu0 %v1153_v6, %s4444_s21  ;;  %3107 = vmatprep.mubr.bf16.mxu1 %v4311_v16  ;;  %1945 = vst.msk [vmem:[#allocation2 + $0xe8] sm:$0xf] %vm205_vm6, %v1903_v57  ;;  %v2037_v6 = vrot.slane %v2035_v61, 4  ;;  %v2036_v16 = vsel %vm4625_vm5, %v3793_v10, %v2035_v61  ;;  %v3603_v45 = vld [vmem:[%s4548_s10 + $0x15c] sm:$0x7]  ;;  %v1161_v53 = vrot.slane %v1159_v38, 4 }
 0x114   : > { %v2065_v30 = vpop.permute.xlu1 %2064  ;;  %3108 = vmatmul.mubr.bf16.gmra.mxu1 %v3870_v20  ;;  %v1467_v5 = vsel %vm4625_vm5, %v1465_v59, %v1466_v60  ;;  %v404_v20 = vld [vmem:[%s4548_s10 + $0x70] sm:$0xf]  ;;  %v3601_v49 = vld [vmem:[%s4548_s10 + $0x154] sm:$0x8]  ;;  %v1162_v54 = vrot.slane %v3603_v45, 7 }
 0x115   : > { %2107 = vst.msk [vmem:[#allocation2 + $0x70] sm:$0xf] %vm377_vm10, %v2065_v30  ;;  %v2063_v36 = vpop.permute.xlu0 %2062  ;;  %v2039_v14 = vsel %vm4625_vm5, %v2037_v6, %v2038_v7  ;;  %v3692_v30 = vld [vmem:[%s4548_s10 + $0x160] sm:$0xf]  ;;  %v3715_v59 = vld [vmem:[%s4548_s10 + $0x1cc] sm:$0x8] }
 0x116   : > { %2106 = vst.msk [vmem:[#allocation2 + $0x5c] sm:$0xf] %vm377_vm10, %v2063_v36  ;;  %1768 = vrot.lane.b32.xlu1 %v1728_v25, %s4444_s21  ;;  %v3488_v25 = vld [vmem:[%s4548_s10 + $0xe0] sm:$0xf]  ;;  %v5503_v60 = vld [vmem:[%s4548_s10 + $0x24c] sm:$0xf]  ;;  %v1163_v7 = vsel %vm4726_vm9, %v1161_v53, %v1162_v54 }
 0x117   : > { %1766 = vrot.lane.b32.xlu0 %v1725_v31, %s4444_s21  ;;  %v583_v28 = vrot.slane %v3488_v25, 7  ;;  %v3489_v31 = vld [vmem:[%s4548_s10 + $0xe4] sm:$0x7]  ;;  %v3522_v2 = vld [vmem:[%s4548_s10 + $0xf4] sm:$0xc]  ;;  %v2303_v10 = vrot.slane %v5503_v60, 6 }
 0x118   : > { %v437_v50 = vpop.permute.xlu1 %436  ;;  %v586_v37 = vrot.slane %v3489_v31, 7  ;;  %v3534_v6 = vrot.slane %v3522_v2, 10  ;;  %v3638_v25 = vld [vmem:[%s4548_s10 + $0x174] sm:$0x3]  ;;  %v3752_v39 = vld [vmem:[%s4548_s10 + $0x1ec] sm:$0x3] }
 0x119   : > { %480 = vst.msk [vmem:[#allocation2 + $0x64] sm:$0xf] %vm474_vm11, %v437_v50  ;;  %v435_v55 = vpop.permute.xlu0 %434  ;;  %v585_v36 = vrot.slane %v583_v28, 4  ;;  %v584_v57 = vsel %vm4726_vm9, %v3501_v44, %v583_v28  ;;  %v2305_v31 = vrot.slane %v2303_v10, 4 }
 0x11a   : > { %479 = vst.msk [vmem:[#allocation2 + $0x50] sm:$0xf] %vm474_vm11, %v435_v55  ;;  %2340 = vrot.lane.b32.xlu1 %v2300_v46, %s4444_s21  ;;  %v3523_v55 = vld [vmem:[%s4548_s10 + $0xf8] sm:$0xf] }
 0x11b   : > { %2338 = vrot.lane.b32.xlu0 %v2297_v51, %s4444_s21  ;;  %v3717_v51 = vld [vmem:[%s4548_s10 + $0x1d4] sm:$0x7]  ;;  %v587_v52 = vsel %vm4726_vm9, %v585_v36, %v586_v37  ;;  %v759_v61 = vrot.slane %v3523_v55, 6 }
 0x11c   : > { %v1021_v62 = vpop.permute.xlu1 %1020 }
 0x11d   : > { %1063 = vst.msk [vmem:[#allocation2 + $0x68] sm:$0xf] %vm474_vm11, %v1021_v62  ;;  %v1019_v3 = vpop.permute.xlu0 %1018  ;;  %v761_v4 = vrot.slane %v759_v61, 4 }
 0x11e   : > { %1062 = vst.msk [vmem:[#allocation2 + $0x54] sm:$0xf] %vm474_vm11, %v1019_v3  ;;  %932 = vrot.lane.b32.xlu1 %v895_v58, %s4442_s11  ;;  %v3615_v58 = vrot.slane %v3601_v49, 11  ;;  %v1733_v3 = vrot.slane %v1731_v43, 4 }
 0x11f   : > { %930 = vrot.lane.b32.xlu0 %v892_v63, %s4442_s11  ;;  %v1734_v63 = vrot.slane %v3717_v51, 7 }
 0x120   : > { %v1589_v8 = vpop.permute.xlu1 %1588 }
 0x121   : > { %1631 = vst.msk [vmem:[#allocation2 + $0x6c] sm:$0xf] %vm474_vm11, %v1589_v8  ;;  %v1587_v11 = vpop.permute.xlu0 %1586  ;;  %v3729_v8 = vrot.slane %v3715_v59, 11  ;;  %v3783_v59 = vld [vmem:[%s4548_s10 + $0x1ec] sm:$0xf] }
 0x122   : > { %1630 = vst.msk [vmem:[#allocation2 + $0x58] sm:$0xf] %vm474_vm11, %v1587_v11  ;;  %1504 = vrot.lane.b32.xlu1 %v1467_v5, %s4442_s11  ;;  %v762_v5 = vrot.slane %v3524_v1, 6  ;;  %v3637_v11 = vld [vmem:[%s4548_s10 + $0x170] sm:$0xf] }
 0x123   : > { %1502 = vrot.lane.b32.xlu0 %v1464_v9, %s4442_s11  ;;  %v3831_v9 = vld [vmem:[%s4548_s10 + $0x250] sm:$0x3]  ;;  %v1732_v37 = vsel %vm4726_vm9, %v3729_v8, %v1731_v43 }
 0x124   : > { %v2165_v15 = vpop.permute.xlu1 %2164  ;;  %v2306_v32 = vrot.slane %v3831_v9, 6  ;;  %v3784_v8 = vld [vmem:[%s4548_s10 + $0x1f0] sm:$0x1] }
 0x125   : > { %2207 = vst.msk [vmem:[#allocation2 + $0x70] sm:$0xf] %vm474_vm11, %v2165_v15  ;;  %v2163_v17 = vpop.permute.xlu0 %2162  ;;  %v1160_v15 = vsel %vm4726_vm9, %v3615_v58, %v1159_v38  ;;  %v3670_v58 = vld [vmem:[%s4548_s10 + $0x178] sm:$0x1] }
 0x126   : > { %2206 = vst.msk [vmem:[#allocation2 + $0x5c] sm:$0xf] %vm474_vm11, %v2163_v17  ;;  %2076 = vrot.lane.b32.xlu1 %v2039_v14, %s4442_s11  ;;  %v3829_v17 = vld [vmem:[%s4548_s10 + $0x248] sm:$0xc]  ;;  %v2307_v43 = vsel %vm4541_vm2, %v2305_v31, %v2306_v32  ;;  %v3491_v31 = vld [vmem:[%s4548_s10 + $0xf4] sm:$0xf] }
 0x127   : > { %2074 = vrot.lane.b32.xlu0 %v2036_v16, %s4442_s11  ;;  %v3843_v38 = vrot.slane %v3829_v17, 10 }
 0x128   : > { %v613_v19 = vpop.permute.xlu1 %612 }
 0x129   : > { %656 = vst.msk [vmem:[#allocation2 + $0x64] sm:$0xf] %vm650_vm12, %v613_v19  ;;  %v611_v21 = vpop.permute.xlu0 %610  ;;  %v763_v19 = vsel %vm4541_vm2, %v761_v4, %v762_v5  ;;  %v2042_v4 = vrot.slane %v3783_v59, 5 }
 0x12a   : > { %655 = vst.msk [vmem:[#allocation2 + $0x50] sm:$0xf] %vm650_vm12, %v611_v21  ;;  %448 = vrot.lane.b32.xlu1 %v405_v18, %s4443_s20  ;;  %v5522_v18 = vld [vmem:[%s4548_s10 + $0xfc] sm:$0xf]  ;;  %v1334_v21 = vrot.slane %v3637_v11, 6 }
 0x12b   : > { %446 = vrot.lane.b32.xlu0 %v404_v20, %s4443_s20  ;;  %v760_v20 = vsel %vm4541_vm2, %v3534_v6, %v759_v61  ;;  %800 = vst.msk [vmem:[#allocation2 + $0x108] sm:$0xf] %vm205_vm6, %v763_v19 }
 0x12c   : > { %v1189_v23 = vpop.permute.xlu1 %1188  ;;  %799 = vst.msk [vmem:[#allocation2 + $0xf4] sm:$0xf] %vm205_vm6, %v760_v20  ;;  %v1336_v28 = vrot.slane %v1334_v21, 4 }
 0x12d   : > { %1231 = vst.msk [vmem:[#allocation2 + $0x68] sm:$0xf] %vm650_vm12, %v1189_v23  ;;  %v1187_v26 = vpop.permute.xlu0 %1186 }
 0x12e   : > { %1230 = vst.msk [vmem:[#allocation2 + $0x54] sm:$0xf] %vm650_vm12, %v1187_v26  ;;  %1032 = vrot.lane.b32.xlu1 %v3581_v22, %s4443_s20 }
 0x12f   : > { %1030 = vrot.lane.b32.xlu0 %v3580_v24, %s4443_s20 }
 0x130   : > { %v1761_v29 = vpop.permute.xlu1 %1760 }
 0x131   : > { %1803 = vst.msk [vmem:[#allocation2 + $0x6c] sm:$0xf] %vm650_vm12, %v1761_v29  ;;  %v1759_v33 = vpop.permute.xlu0 %1758  ;;  %v1337_v29 = vrot.slane %v3638_v25, 6 }
 0x132   : > { %1802 = vst.msk [vmem:[#allocation2 + $0x58] sm:$0xf] %vm650_vm12, %v1759_v33  ;;  %1600 = vrot.lane.b32.xlu1 %v3693_v27, %s4443_s20  ;;  %v1735_v27 = vsel %vm4726_vm9, %v1733_v3, %v1734_v63  ;;  %v898_v33 = vrot.slane %v5522_v18, 5  ;;  %v3668_v63 = vld [vmem:[%s4548_s10 + $0x170] sm:$0xe]  ;;  %v1473_v3 = vrot.slane %v3670_v58, 5 }
 0x133   : > { %1598 = vrot.lane.b32.xlu0 %v3692_v30, %s4443_s20  ;;  %v3636_v30 = vld [vmem:[%s4548_s10 + $0x16c] sm:$0xc] }
 0x134   : > { %v2333_v40 = vpop.permute.xlu1 %2332  ;;  %v2433_v42 = vld [vmem:[#allocation2 + $0x64] sm:$0xff]  ;;  %v3648_v34 = vrot.slane %v3636_v30, 10 }
 0x135   : > { %2375 = vst.msk [vmem:[#allocation2 + $0x70] sm:$0xf] %vm650_vm12, %v2333_v40  ;;  %v2331_v46 = vpop.permute.xlu0 %2330  ;;  %v2430_v47 = vld [vmem:[#allocation2 + $0x50] sm:$0xff]  ;;  %v3556_v40 = vld [vmem:[%s4548_s10 + $0x100] sm:$0x1]  ;;  %v4329_v58 = vld [vmem:[%s6092_s1 + $0x108] sm:$0xff]  }
 0x136   : > { %v4313_v48 = vld [vmem:[#allocation2 + $0x54] ss:$20 sps:$4 sm:$0xff]   ;;  %2374 = vst.msk [vmem:[#allocation2 + $0x5c] sm:$0xf] %vm650_vm12, %v2331_v46  ;;  %2176 = vrot.lane.b32.xlu1 %v3809_v35, %s4443_s20  ;;  %v3873_v50 = vcombine.low %v2430_v47, %v2433_v42  ;;  %v1338_v42 = vsel %vm4541_vm2, %v1336_v28, %v1337_v29  ;;  %v3554_v46 = vld [vmem:[%s4548_s10 + $0xf8] sm:$0xe]  ;;  %v1335_v47 = vsel %vm4541_vm2, %v3648_v34, %v1334_v21 }
 0x137   : > { %2174 = vrot.lane.b32.xlu0 %v3808_v41, %s4443_s20  ;;  %3018 = vmatprep.mubr.bf16.mxu0 %v4313_v48  ;;  %v3751_v35 = vld [vmem:[%s4548_s10 + $0x1e8] sm:$0xf]  ;;  %v3669_v41 = vld [vmem:[%s4548_s10 + $0x174] sm:$0xf]  ;;  %1375 = vst.msk [vmem:[#allocation2 + $0x10c] sm:$0xf] %vm205_vm6, %v1338_v42 }
 0x138   : > { %v925_v56 = vpop.permute.xlu1 %924  ;;  %3019 = vmatmul.mubr.bf16.gmra.mxu0 %v3873_v50  ;;  %v1906_v44 = vrot.slane %v3751_v35, 6  ;;  %v3750_v48 = vld [vmem:[%s4548_s10 + $0x1e4] sm:$0xc]  ;;  %1374 = vst.msk [vmem:[#allocation2 + $0xf8] sm:$0xf] %vm205_vm6, %v1335_v47  ;;  %v1909_v50 = vrot.slane %v3752_v39, 6  ;;  %4171 = vmatprep.subr.bf16.mxu0 %v4329_v58 }
 0x139   : > { %965 = vst.msk [vmem:[#allocation2 + $0x90] sm:$0xf] %vm377_vm10, %v925_v56  ;;  %v923_v62 = vpop.permute.xlu0 %922  ;;  %v3762_v51 = vrot.slane %v3750_v48, 10  ;;  %v901_v53 = vrot.slane %v3556_v40, 5  ;;  %v1470_v54 = vrot.slane %v3669_v41, 5  ;;  %v2304_v56 = vsel %vm4541_vm2, %v3843_v38, %v2303_v10  ;;  %4191 = vmatprep.subr.bf16.mxu1 %v4329_v58  ;;  %4172 = vmatpush3.bf16.msra.mxu0 %v4329_v58 }
 0x13a   : > { %964 = vst.msk [vmem:[#allocation2 + $0x7c] sm:$0xf] %vm377_vm10, %v923_v62  ;;  %624 = vrot.lane.b32.xlu1 %v587_v52, %s4444_s21  ;;  %v1908_v49 = vrot.slane %v1906_v44, 4  ;;  %v900_v52 = vrot.slane %v898_v33, 4  ;;  %v3782_v10 = vld [vmem:[%s4548_s10 + $0x1e8] sm:$0xe]  ;;  %4193 = vmatpush3.bf16.msra.mxu1 %v4329_v58 }
 0x13b   : > { %622 = vrot.lane.b32.xlu0 %v584_v57, %s4444_s21  ;;  %v3566_v57 = vrot.slane %v3554_v46, 9  ;;  %v1907_v61 = vsel %vm4541_vm2, %v3762_v51, %v1906_v44  ;;  %v1472_v2 = vrot.slane %v1470_v54, 4  ;;  %v3794_v18 = vrot.slane %v3782_v10, 9  ;;  %v3583_v28 = vld [vmem:[%s4548_s10 + $0x16c] sm:$0xf] }
 0x13c   : > { %v1497_v14 = vpop.permute.xlu1 %1496  ;;  %v2434_v16 = vld [vmem:[#allocation2 + $0x6c] sm:$0xff]  ;;  %v1910_v60 = vsel %vm4541_vm2, %v1908_v49, %v1909_v50  ;;  %1946 = vst.msk [vmem:[#allocation2 + $0xfc] sm:$0xf] %vm205_vm6, %v1907_v61  ;;  %v902_v1 = vsel %vm4625_vm5, %v900_v52, %v901_v53  ;;  %v3582_v30 = vld [vmem:[%s4548_s10 + $0x168] sm:$0xf]  ;;  %v590_v34 = vrot.slane %v3491_v31, 7 }
 0x13d   : > { %1537 = vst.msk [vmem:[#allocation2 + $0x94] sm:$0xf] %vm377_vm10, %v1497_v14  ;;  %v1495_v22 = vpop.permute.xlu0 %1494  ;;  %v2431_v23 = vld [vmem:[#allocation2 + $0x58] sm:$0xff]  ;;  %v899_v6 = vsel %vm4625_vm5, %v3566_v57, %v898_v33  ;;  %v1474_v11 = vsel %vm4625_vm5, %v1472_v2, %v1473_v3  ;;  %v2044_v14 = vrot.slane %v2042_v4, 4  ;;  %v5619_v38 = vld [vmem:[%s4548_s10 + $0x16c] sm:$0xf] }
 0x13e   : > { %v4315_v24 = vld [vmem:[#allocation2 + $0x5c] ss:$20 sps:$4 sm:$0xff]   ;;  %1536 = vst.msk [vmem:[#allocation2 + $0x80] sm:$0xf] %vm377_vm10, %v1495_v22  ;;  %1200 = vrot.lane.b32.xlu1 %v1163_v7, %s4444_s21  ;;  %v3875_v26 = vcombine.low %v2431_v23, %v2434_v16  ;;  %v3680_v7 = vrot.slane %v3668_v63, 9  ;;  %v2043_v22 = vsel %vm4625_vm5, %v3794_v18, %v2042_v4  ;;  %v592_v44 = vrot.slane %v590_v34, 4 }
 0x13f   : > { %1198 = vrot.lane.b32.xlu0 %v1160_v15, %s4444_s21  ;;  %3115 = vmatprep.mubr.bf16.mxu1 %v4315_v24  ;;  %1947 = vst.msk [vmem:[#allocation2 + $0x110] sm:$0xf] %vm205_vm6, %v1910_v60  ;;  %v2045_v15 = vrot.slane %v3784_v8, 5  ;;  %v407_v24 = vld [vmem:[%s4548_s10 + $0x88] sm:$0xf]  ;;  %v1166_v47 = vrot.slane %v5619_v38, 7 }
 0x140   : > { %v2069_v36 = vpop.permute.xlu1 %2068  ;;  %3116 = vmatmul.mubr.bf16.gmra.mxu1 %v3875_v26  ;;  %v1471_v17 = vsel %vm4625_vm5, %v3680_v7, %v1470_v54  ;;  %v406_v26 = vld [vmem:[%s4548_s10 + $0x84] sm:$0xf]  ;;  %v3695_v33 = vld [vmem:[%s4548_s10 + $0x178] sm:$0xf]  ;;  %v3490_v41 = vld [vmem:[%s4548_s10 + $0xf0] sm:$0x8] }
 0x141   : > { %2109 = vst.msk [vmem:[#allocation2 + $0x98] sm:$0xf] %vm377_vm10, %v2069_v36  ;;  %v2067_v45 = vpop.permute.xlu0 %2066  ;;  %v2046_v20 = vsel %vm4625_vm5, %v2044_v14, %v2045_v15  ;;  %v3694_v36 = vld [vmem:[%s4548_s10 + $0x174] sm:$0xf]  ;;  %v3811_v42 = vld [vmem:[%s4548_s10 + $0x25c] sm:$0xf] }
 0x142   : > { %2108 = vst.msk [vmem:[#allocation2 + $0x84] sm:$0xf] %vm377_vm10, %v2067_v45  ;;  %1772 = vrot.lane.b32.xlu1 %v1735_v27, %s4444_s21  ;;  %v3606_v46 = vld [vmem:[%s4548_s10 + $0x170] sm:$0x7]  ;;  %v3810_v48 = vld [vmem:[%s4548_s10 + $0x258] sm:$0xf] }
 0x143   : > { %1770 = vrot.lane.b32.xlu0 %v1732_v37, %s4444_s21  ;;  %v3492_v37 = vld [vmem:[%s4548_s10 + $0xf8] sm:$0x7]  ;;  %v3502_v50 = vrot.slane %v3490_v41, 11  ;;  %v5631_v51 = vld [vmem:[%s4548_s10 + $0x1e4] sm:$0xf]  ;;  %v1168_v60 = vrot.slane %v1166_v47, 4 }
 0x144   : > { %v441_v55 = vpop.permute.xlu1 %440  ;;  %v593_v45 = vrot.slane %v3492_v37, 7  ;;  %v3604_v54 = vld [vmem:[%s4548_s10 + $0x168] sm:$0x8]  ;;  %v3720_v57 = vld [vmem:[%s4548_s10 + $0x1e8] sm:$0x7]  ;;  %v1738_v61 = vrot.slane %v5631_v51, 7 }
 0x145   : > { %482 = vst.msk [vmem:[#allocation2 + $0x8c] sm:$0xf] %vm474_vm11, %v441_v55  ;;  %v439_v62 = vpop.permute.xlu0 %438  ;;  %v3526_v63 = vld [vmem:[%s4548_s10 + $0x10c] sm:$0xf]  ;;  %v591_v2 = vsel %vm4726_vm9, %v3502_v50, %v590_v34  ;;  %v3616_v3 = vrot.slane %v3604_v54, 11  ;;  %v1741_v7 = vrot.slane %v3720_v57, 7 }
 0x146   : > { %481 = vst.msk [vmem:[#allocation2 + $0x78] sm:$0xf] %vm474_vm11, %v439_v62  ;;  %2344 = vrot.lane.b32.xlu1 %v2307_v43, %s4444_s21  ;;  %v594_v59 = vsel %vm4726_vm9, %v592_v44, %v593_v45  ;;  %v3718_v62 = vld [vmem:[%s4548_s10 + $0x1e0] sm:$0x8]  ;;  %v3527_v8 = vld [vmem:[%s4548_s10 + $0x110] sm:$0x3] }
 0x147   : > { %2342 = vrot.lane.b32.xlu0 %v2304_v56, %s4444_s21  ;;  %v1169_v56 = vrot.slane %v3606_v46, 7  ;;  %v5650_v4 = vld [vmem:[%s4548_s10 + $0x260] sm:$0xf]  ;;  %v3730_v10 = vrot.slane %v3718_v62, 11  ;;  %v769_v14 = vrot.slane %v3527_v8, 6 }
 0x148   : > { %v1025_v5 = vpop.permute.xlu1 %1024  ;;  %v3834_v18 = vld [vmem:[%s4548_s10 + $0x264] sm:$0x3]  ;;  %v3639_v37 = vld [vmem:[%s4548_s10 + $0x180] sm:$0xc]  ;;  %v3754_v44 = vld [vmem:[%s4548_s10 + $0x1fc] sm:$0xf] }
 0x149   : > { %1065 = vst.msk [vmem:[#allocation2 + $0x90] sm:$0xf] %vm474_vm11, %v1025_v5  ;;  %v1023_v9 = vpop.permute.xlu0 %1022  ;;  %v766_v5 = vrot.slane %v3526_v63, 6  ;;  %v2313_v34 = vrot.slane %v3834_v18, 6  ;;  %v1739_v46 = vsel %vm4726_vm9, %v3730_v10, %v1738_v61  ;;  %v1913_v50 = vrot.slane %v3754_v44, 6 }
 0x14a   : > { %1064 = vst.msk [vmem:[#allocation2 + $0x7c] sm:$0xf] %vm474_vm11, %v1023_v9  ;;  %936 = vrot.lane.b32.xlu1 %v902_v1, %s4442_s11  ;;  %v3525_v9 = vld [vmem:[%s4548_s10 + $0x108] sm:$0xc]  ;;  %v3753_v54 = vld [vmem:[%s4548_s10 + $0x1f8] sm:$0xc] }
 0x14b   : > { %934 = vrot.lane.b32.xlu0 %v899_v6, %s4442_s11  ;;  %v3535_v15 = vrot.slane %v3525_v9, 10  ;;  %v3763_v57 = vrot.slane %v3753_v54, 10 }
 0x14c   : > { %v1593_v16 = vpop.permute.xlu1 %1592 }
 0x14d   : > { %1633 = vst.msk [vmem:[#allocation2 + $0x94] sm:$0xf] %vm474_vm11, %v1593_v16  ;;  %v1591_v19 = vpop.permute.xlu0 %1590  ;;  %v1170_v16 = vsel %vm4726_vm9, %v1168_v60, %v1169_v56 }
 0x14e   : > { %1632 = vst.msk [vmem:[#allocation2 + $0x80] sm:$0xf] %vm474_vm11, %v1591_v19  ;;  %1508 = vrot.lane.b32.xlu1 %v1474_v11, %s4442_s11  ;;  %v768_v11 = vrot.slane %v766_v5, 4  ;;  %v2310_v19 = vrot.slane %v5650_v4, 6 }
 0x14f   : > { %1506 = vrot.lane.b32.xlu0 %v1471_v17, %s4442_s11  ;;  %v1740_v17 = vrot.slane %v1738_v61, 4 }
 0x150   : > { %v2169_v21 = vpop.permute.xlu1 %2168 }
 0x151   : > { %2209 = vst.msk [vmem:[#allocation2 + $0x98] sm:$0xf] %vm474_vm11, %v2169_v21  ;;  %v2167_v23 = vpop.permute.xlu0 %2166  ;;  %v1742_v38 = vsel %vm4726_vm9, %v1740_v17, %v1741_v7  ;;  %v3671_v7 = vld [vmem:[%s4548_s10 + $0x184] sm:$0xe]  ;;  %v3787_v17 = vld [vmem:[%s4548_s10 + $0x204] sm:$0x1] }
 0x152   : > { %2208 = vst.msk [vmem:[#allocation2 + $0x84] sm:$0xf] %vm474_vm11, %v2167_v23  ;;  %2080 = vrot.lane.b32.xlu1 %v2046_v20, %s4442_s11  ;;  %v3640_v20 = vld [vmem:[%s4548_s10 + $0x184] sm:$0xf] }
 0x153   : > { %2078 = vrot.lane.b32.xlu0 %v2043_v22, %s4442_s11  ;;  %v1167_v22 = vsel %vm4726_vm9, %v3616_v3, %v1166_v47  ;;  %v3786_v3 = vld [vmem:[%s4548_s10 + $0x200] sm:$0xf] }
 0x154   : > { %v617_v25 = vpop.permute.xlu1 %616 }
 0x155   : > { %658 = vst.msk [vmem:[#allocation2 + $0x8c] sm:$0xf] %vm650_vm12, %v617_v25  ;;  %v615_v27 = vpop.permute.xlu0 %614  ;;  %v5667_v25 = vld [vmem:[%s4548_s10 + $0x110] sm:$0xf] }
 0x156   : > { %657 = vst.msk [vmem:[#allocation2 + $0x78] sm:$0xf] %vm650_vm12, %v615_v27  ;;  %452 = vrot.lane.b32.xlu1 %v407_v24, %s4443_s20  ;;  %v3832_v24 = vld [vmem:[%s4548_s10 + $0x25c] sm:$0xc]  ;;  %v767_v27 = vsel %vm4541_vm2, %v3535_v15, %v766_v5  ;;  %v905_v41 = vrot.slane %v5667_v25, 5  ;;  %v1914_v5 = vsel %vm4541_vm2, %v3763_v57, %v1913_v50 }
 0x157   : > { %450 = vrot.lane.b32.xlu0 %v406_v26, %s4443_s20  ;;  %v770_v26 = vsel %vm4541_vm2, %v768_v11, %v769_v14  ;;  %801 = vst.msk [vmem:[#allocation2 + $0x11c] sm:$0xf] %vm205_vm6, %v767_v27  ;;  %v3844_v47 = vrot.slane %v3832_v24, 10  ;;  %1948 = vst.msk [vmem:[#allocation2 + $0x124] sm:$0xf] %vm205_vm6, %v1914_v5  ;;  %v2049_v11 = vrot.slane %v3786_v3, 5 }
 0x158   : > { %v1193_v29 = vpop.permute.xlu1 %1192  ;;  %802 = vst.msk [vmem:[#allocation2 + $0x130] sm:$0xf] %vm205_vm6, %v770_v26  ;;  %v3722_v57 = vld [vmem:[%s4548_s10 + $0x1f8] sm:$0xf] }
 0x159   : > { %1233 = vst.msk [vmem:[#allocation2 + $0x90] sm:$0xf] %vm650_vm12, %v1193_v29  ;;  %v1191_v32 = vpop.permute.xlu0 %1190  ;;  %v2311_v63 = vsel %vm4541_vm2, %v3844_v47, %v2310_v19  ;;  %v3608_v47 = vld [vmem:[%s4548_s10 + $0x180] sm:$0xf]  ;;  %v1745_v3 = vrot.slane %v3722_v57, 7 }
 0x15a   : > { %1232 = vst.msk [vmem:[#allocation2 + $0x7c] sm:$0xf] %vm650_vm12, %v1191_v32  ;;  %1036 = vrot.lane.b32.xlu1 %v3583_v28, %s4443_s20  ;;  %v1341_v28 = vrot.slane %v3640_v20, 6  ;;  %v3641_v32 = vld [vmem:[%s4548_s10 + $0x188] sm:$0x3] }
 0x15b   : > { %1034 = vrot.lane.b32.xlu0 %v3582_v30, %s4443_s20 }
 0x15c   : > { %v1765_v35 = vpop.permute.xlu1 %1764 }
 0x15d   : > { %1805 = vst.msk [vmem:[#allocation2 + $0x94] sm:$0xf] %vm650_vm12, %v1765_v35  ;;  %v1763_v40 = vpop.permute.xlu0 %1762  ;;  %v1343_v35 = vrot.slane %v1341_v28, 4 }
 0x15e   : > { %1804 = vst.msk [vmem:[#allocation2 + $0x80] sm:$0xf] %vm650_vm12, %v1763_v40  ;;  %1604 = vrot.lane.b32.xlu1 %v3695_v33, %s4443_s20  ;;  %v2312_v40 = vrot.slane %v2310_v19, 4  ;;  %v3785_v19 = vld [vmem:[%s4548_s10 + $0x1fc] sm:$0xe] }
 0x15f   : > { %1602 = vrot.lane.b32.xlu0 %v3694_v36, %s4443_s20  ;;  %v1344_v36 = vrot.slane %v3641_v32, 6  ;;  %v3795_v25 = vrot.slane %v3785_v19, 9 }
 0x160   : > { %v2337_v39 = vpop.permute.xlu1 %2336  ;;  %v2439_v49 = vld [vmem:[#allocation2 + $0x8c] sm:$0xff]  ;;  %v2314_v58 = vsel %vm4541_vm2, %v2312_v40, %v2313_v34 }
 0x161   : > { %2377 = vst.msk [vmem:[#allocation2 + $0x98] sm:$0xf] %vm650_vm12, %v2337_v39  ;;  %v2335_v43 = vpop.permute.xlu0 %2334  ;;  %v2436_v52 = vld [vmem:[#allocation2 + $0x78] sm:$0xff]  ;;  %v3559_v39 = vld [vmem:[%s4548_s10 + $0x114] sm:$0x1] }
 0x162   : > { %v4317_v53 = vld [vmem:[#allocation2 + $0x7c] ss:$20 sps:$4 sm:$0xff]   ;;  %2376 = vst.msk [vmem:[#allocation2 + $0x84] sm:$0xf] %vm650_vm12, %v2335_v43  ;;  %2180 = vrot.lane.b32.xlu1 %v3811_v42, %s4443_s20  ;;  %v3878_v55 = vcombine.low %v2436_v52, %v2439_v49  ;;  %v3649_v42 = vrot.slane %v3639_v37, 10  ;;  %v1345_v49 = vsel %vm4541_vm2, %v1343_v35, %v1344_v36  ;;  %v908_v60 = vrot.slane %v3559_v39, 5 }
 0x163   : > { %2178 = vrot.lane.b32.xlu0 %v3810_v48, %s4443_s20  ;;  %3026 = vmatprep.mubr.bf16.mxu0 %v4317_v53  ;;  %v3672_v48 = vld [vmem:[%s4548_s10 + $0x188] sm:$0xf]  ;;  %v3557_v43 = vld [vmem:[%s4548_s10 + $0x10c] sm:$0xe]  ;;  %1377 = vst.msk [vmem:[#allocation2 + $0x134] sm:$0xf] %vm205_vm6, %v1345_v49 }
 0x164   : > { %v929_v1 = vpop.permute.xlu1 %928  ;;  %3027 = vmatmul.mubr.bf16.gmra.mxu0 %v3878_v55  ;;  %v1342_v52 = vsel %vm4541_vm2, %v3649_v42, %v1341_v28  ;;  %v3755_v53 = vld [vmem:[%s4548_s10 + $0x200] sm:$0x3]  ;;  %v1915_v55 = vrot.slane %v1913_v50, 4  ;;  %v1477_v61 = vrot.slane %v3672_v48, 5  ;;  %v3584_v37 = vld [vmem:[%s4548_s10 + $0x17c] sm:$0xf] }
 0x165   : > { %967 = vst.msk [vmem:[#allocation2 + $0xb8] sm:$0xf] %vm377_vm10, %v929_v1  ;;  %v927_v6 = vpop.permute.xlu0 %926  ;;  %v1916_v56 = vrot.slane %v3755_v53, 6  ;;  %v3567_v1 = vrot.slane %v3557_v43, 9  ;;  %v4334_v35 = vld [vmem:[%s6092_s1 + $0x100] sm:$0xff]  }
 0x166   : > { %966 = vst.msk [vmem:[#allocation2 + $0xa4] sm:$0xf] %vm377_vm10, %v927_v6  ;;  %628 = vrot.lane.b32.xlu1 %v594_v59, %s4444_s21  ;;  %v907_v59 = vrot.slane %v905_v41, 4  ;;  %v1479_v9 = vrot.slane %v1477_v61, 4  ;;  %4173 = vmatprep.subr.bf16.mxu0 %v4334_v35  ;;  %v3493_v48 = vld [vmem:[%s4548_s10 + $0x104] sm:$0x8] }
 0x167   : > { %626 = vrot.lane.b32.xlu0 %v591_v2, %s4444_s21  ;;  %1376 = vst.msk [vmem:[#allocation2 + $0x120] sm:$0xf] %vm205_vm6, %v1342_v52  ;;  %v3673_v2 = vld [vmem:[%s4548_s10 + $0x18c] sm:$0x1]  ;;  %v1917_v4 = vsel %vm4541_vm2, %v1915_v55, %v1916_v56  ;;  %v906_v15 = vsel %vm4625_vm5, %v3567_v1, %v905_v41  ;;  %4192 = vmatprep.subr.bf16.mxu1 %v4334_v35  ;;  %v3813_v49 = vld [vmem:[%s4548_s10 + $0x270] sm:$0xf] }
 0x168   : > { %v1501_v21 = vpop.permute.xlu1 %1500  ;;  %v2440_v23 = vld [vmem:[#allocation2 + $0x94] sm:$0xff]  ;;  %1949 = vst.msk [vmem:[#allocation2 + $0x138] sm:$0xf] %vm205_vm6, %v1917_v4  ;;  %v909_v8 = vsel %vm4625_vm5, %v907_v59, %v908_v60  ;;  %v1480_v10 = vrot.slane %v3673_v2, 5  ;;  %4194 = vmatpush3.bf16.msra.mxu1 %v4334_v35  ;;  %v3697_v41 = vld [vmem:[%s4548_s10 + $0x18c] sm:$0xf]  ;;  %4174 = vmatpush3.bf16.msra.mxu0 %v4334_v35 }
 0x169   : > { %1539 = vst.msk [vmem:[#allocation2 + $0xbc] sm:$0xf] %vm377_vm10, %v1501_v21  ;;  %v1499_v29 = vpop.permute.xlu0 %1498  ;;  %v2437_v30 = vld [vmem:[#allocation2 + $0x80] sm:$0xff]  ;;  %v2051_v21 = vrot.slane %v2049_v11, 4  ;;  %v3812_v50 = vld [vmem:[%s4548_s10 + $0x26c] sm:$0xf] }
 0x16a   : > { %v4319_v31 = vld [vmem:[#allocation2 + $0x84] ss:$20 sps:$4 sm:$0xff]   ;;  %1538 = vst.msk [vmem:[#allocation2 + $0xa8] sm:$0xf] %vm377_vm10, %v1499_v29  ;;  %1204 = vrot.lane.b32.xlu1 %v1170_v16, %s4444_s21  ;;  %v3880_v33 = vcombine.low %v2437_v30, %v2440_v23  ;;  %v3681_v16 = vrot.slane %v3671_v7, 9  ;;  %v1481_v20 = vsel %vm4625_vm5, %v1479_v9, %v1480_v10  ;;  %v2050_v29 = vsel %vm4625_vm5, %v3795_v25, %v2049_v11 }
 0x16b   : > { %1202 = vrot.lane.b32.xlu0 %v1167_v22, %s4444_s21  ;;  %3123 = vmatprep.mubr.bf16.mxu1 %v4319_v31  ;;  %v2052_v22 = vrot.slane %v3787_v17, 5  ;;  %v409_v31 = vld [vmem:[%s4548_s10 + $0x9c] sm:$0xf]  ;;  %v1173_v52 = vrot.slane %v3608_v47, 7  ;;  %v3503_v55 = vrot.slane %v3493_v48, 11 }
 0x16c   : > { %v2073_v45 = vpop.permute.xlu1 %2072  ;;  %3124 = vmatmul.mubr.bf16.gmra.mxu1 %v3880_v33  ;;  %v1478_v24 = vsel %vm4625_vm5, %v3681_v16, %v1477_v61  ;;  %v408_v33 = vld [vmem:[%s4548_s10 + $0x98] sm:$0xf]  ;;  %v3609_v56 = vld [vmem:[%s4548_s10 + $0x184] sm:$0x7]  ;;  %v3607_v61 = vld [vmem:[%s4548_s10 + $0x17c] sm:$0x8] }
 0x16d   : > { %2111 = vst.msk [vmem:[#allocation2 + $0xc0] sm:$0xf] %vm377_vm10, %v2073_v45  ;;  %v2071_v51 = vpop.permute.xlu0 %2070  ;;  %v2053_v27 = vsel %vm4625_vm5, %v2051_v21, %v2052_v22  ;;  %v3696_v45 = vld [vmem:[%s4548_s10 + $0x188] sm:$0xf]  ;;  %v1175_v1 = vrot.slane %v1173_v52, 4  ;;  %v1176_v2 = vrot.slane %v3609_v56, 7 }
 0x16e   : > { %2110 = vst.msk [vmem:[#allocation2 + $0xac] sm:$0xf] %vm377_vm10, %v2071_v51  ;;  %1776 = vrot.lane.b32.xlu1 %v1742_v38, %s4444_s21  ;;  %v3494_v38 = vld [vmem:[%s4548_s10 + $0x108] sm:$0xf]  ;;  %v3723_v7 = vld [vmem:[%s4548_s10 + $0x1fc] sm:$0x7] }
 0x16f   : > { %1774 = vrot.lane.b32.xlu0 %v1739_v46, %s4444_s21  ;;  %v597_v42 = vrot.slane %v3494_v38, 7  ;;  %v3495_v46 = vld [vmem:[%s4548_s10 + $0x10c] sm:$0x7]  ;;  %v3721_v10 = vld [vmem:[%s4548_s10 + $0x1f4] sm:$0x8]  ;;  %v1177_v17 = vsel %vm4726_vm9, %v1175_v1, %v1176_v2  ;;  %v1748_v19 = vrot.slane %v3723_v7, 7 }
 0x170   : > { %v445_v62 = vpop.permute.xlu1 %444  ;;  %v600_v43 = vrot.slane %v3495_v46, 7  ;;  %v3846_v11 = vld [vmem:[%s4548_s10 + $0x1ec] sm:$0xf]  ;;  %v3849_v16 = vld [vmem:[%s4548_s10 + $0x204] sm:$0xf] }
 0x171   : > { %484 = vst.msk [vmem:[#allocation2 + $0xb4] sm:$0xf] %vm474_vm11, %v445_v62  ;;  %v443_v6 = vpop.permute.xlu0 %442  ;;  %v599_v51 = vrot.slane %v597_v42, 4  ;;  %v598_v5 = vsel %vm4726_vm9, %v3503_v55, %v597_v42  ;;  %v3837_v25 = vld [vmem:[%s4548_s10 + $0x278] sm:$0x3] }
 0x172   : > { %483 = vst.msk [vmem:[#allocation2 + $0xa0] sm:$0xf] %vm474_vm11, %v443_v6  ;;  %2348 = vrot.lane.b32.xlu1 %v2314_v58, %s4444_s21  ;;  %v3617_v6 = vrot.slane %v3607_v61, 11  ;;  %v3850_v38 = vld [vmem:[%s4548_s10 + $0x214] sm:$0xf] }
 0x173   : > { %2346 = vrot.lane.b32.xlu0 %v2311_v63, %s4444_s21  ;;  %v601_v63 = vsel %vm4726_vm9, %v599_v51, %v600_v43  ;;  %2402 = vst.msk [vmem:[#allocation2 + $0x10] sm:$0xf] %vm205_vm6, %v3846_v11  ;;  %2405 = vst.msk [vmem:[#allocation2 + $0x4c] sm:$0xf] %vm205_vm6, %v3849_v16  ;;  %v3854_v42 = vld [vmem:[%s4548_s10 + $0x23c] sm:$0xf] }
 0x174   : > { %v1029_v14 = vpop.permute.xlu1 %1028  ;;  %v1174_v22 = vsel %vm4726_vm9, %v3617_v6, %v1173_v52  ;;  %2406 = vst.msk [vmem:[#allocation2 + $0x60] sm:$0xf] %vm205_vm6, %v3850_v38  ;;  %2410 = vst.msk [vmem:[#allocation2 + $0xb0] sm:$0xf] %vm205_vm6, %v3854_v42  ;;  %v3853_v47 = vld [vmem:[%s4548_s10 + $0x22c] sm:$0xf] }
 0x175   : > { %1067 = vst.msk [vmem:[#allocation2 + $0xb8] sm:$0xf] %vm474_vm11, %v1029_v14  ;;  %v1027_v18 = vpop.permute.xlu0 %1026  ;;  %v3847_v14 = vld [vmem:[%s4548_s10 + $0x1f0] sm:$0xf]  ;;  %v3859_v51 = vld [vmem:[%s4548_s10 + $0x268] sm:$0xf] }
 0x176   : > { %1066 = vst.msk [vmem:[#allocation2 + $0xa4] sm:$0xf] %vm474_vm11, %v1027_v18  ;;  %940 = vrot.lane.b32.xlu1 %v909_v8, %s4442_s11  ;;  %v3836_v8 = vld [vmem:[%s4548_s10 + $0x274] sm:$0xf]  ;;  %v1747_v18 = vrot.slane %v1745_v3, 4 }
 0x177   : > { %938 = vrot.lane.b32.xlu0 %v906_v15, %s4442_s11  ;;  %2403 = vst.msk [vmem:[#allocation2 + $0x24] sm:$0xf] %vm205_vm6, %v3847_v14  ;;  %v3848_v15 = vld [vmem:[%s4548_s10 + $0x200] sm:$0xf]  ;;  %2409 = vst.msk [vmem:[#allocation2 + $0x9c] sm:$0xf] %vm205_vm6, %v3853_v47 }
 0x178   : > { %v1597_v23 = vpop.permute.xlu1 %1596  ;;  %2404 = vst.msk [vmem:[#allocation2 + $0x38] sm:$0xf] %vm205_vm6, %v3848_v15  ;;  %2415 = vst.msk [vmem:[#allocation2 + $0x114] sm:$0xf] %vm205_vm6, %v3859_v51  ;;  %v3860_v43 = vld [vmem:[%s4548_s10 + $0x278] sm:$0xf] }
 0x179   : > { %1635 = vst.msk [vmem:[#allocation2 + $0xbc] sm:$0xf] %vm474_vm11, %v1597_v23  ;;  %v1595_v26 = vpop.permute.xlu0 %1594  ;;  %v3861_v52 = vld [vmem:[%s4548_s10 + $0x27c] sm:$0xf] }
 0x17a   : > { %1634 = vst.msk [vmem:[#allocation2 + $0xa8] sm:$0xf] %vm474_vm11, %v1595_v26  ;;  %1512 = vrot.lane.b32.xlu1 %v1481_v20, %s4442_s11  ;;  %v2317_v20 = vrot.slane %v3836_v8, 6 }
 0x17b   : > { %1510 = vrot.lane.b32.xlu0 %v1478_v24, %s4442_s11  ;;  %v3731_v24 = vrot.slane %v3721_v10, 11  ;;  %2416 = vst.msk [vmem:[#allocation2 + $0x128] sm:$0xf] %vm205_vm6, %v3860_v43  ;;  %2417 = vst.msk [vmem:[#allocation2 + $0x13c] sm:$0xf] %vm205_vm6, %v3861_v52 }
 0x17c   : > { %v2173_v28 = vpop.permute.xlu1 %2172 }
 0x17d   : > { %2211 = vst.msk [vmem:[#allocation2 + $0xc0] sm:$0xf] %vm474_vm11, %v2173_v28  ;;  %v2171_v30 = vpop.permute.xlu0 %2170 }
 0x17e   : > { %2210 = vst.msk [vmem:[#allocation2 + $0xac] sm:$0xf] %vm474_vm11, %v2171_v30  ;;  %2084 = vrot.lane.b32.xlu1 %v2053_v27, %s4442_s11 }
 0x17f   : > { %2082 = vrot.lane.b32.xlu0 %v2050_v29, %s4442_s11  ;;  %v3835_v29 = vld [vmem:[%s4548_s10 + $0x270] sm:$0xc] }
 0x180   : > { %v621_v32 = vpop.permute.xlu1 %620  ;;  %v3845_v35 = vrot.slane %v3835_v29, 10 }
 0x181   : > { %660 = vst.msk [vmem:[#allocation2 + $0xb4] sm:$0xf] %vm650_vm12, %v621_v32  ;;  %v619_v34 = vpop.permute.xlu0 %618  ;;  %v2319_v32 = vrot.slane %v2317_v20, 4 }
 0x182   : > { %659 = vst.msk [vmem:[#allocation2 + $0xa0] sm:$0xf] %vm650_vm12, %v619_v34  ;;  %456 = vrot.lane.b32.xlu1 %v409_v31, %s4443_s20  ;;  %v1749_v31 = vsel %vm4726_vm9, %v1747_v18, %v1748_v19 }
 0x183   : > { %454 = vrot.lane.b32.xlu0 %v408_v33, %s4443_s20  ;;  %v2320_v33 = vrot.slane %v3837_v25, 6 }
 0x184   : > { %v1197_v36 = vpop.permute.xlu1 %1196 }
 0x185   : > { %1235 = vst.msk [vmem:[#allocation2 + $0xb8] sm:$0xf] %vm650_vm12, %v1197_v36  ;;  %v1195_v40 = vpop.permute.xlu0 %1194 }
 0x186   : > { %1234 = vst.msk [vmem:[#allocation2 + $0xa4] sm:$0xf] %vm650_vm12, %v1195_v40  ;;  %1040 = vrot.lane.b32.xlu1 %v3585_v13, %s4443_s20  ;;  %v1746_v13 = vsel %vm4726_vm9, %v3731_v24, %v1745_v3 }
 0x187   : > { %1038 = vrot.lane.b32.xlu0 %v3584_v37, %s4443_s20  ;;  %v2321_v37 = vsel %vm4541_vm2, %v2319_v32, %v2320_v33 }
 0x188   : > { %v1769_v44 = vpop.permute.xlu1 %1768 }
 0x189   : > { %1807 = vst.msk [vmem:[#allocation2 + $0xbc] sm:$0xf] %vm650_vm12, %v1769_v44  ;;  %v1767_v39 = vpop.permute.xlu0 %1766  ;;  %v3855_v44 = vld [vmem:[%s4548_s10 + $0x240] sm:$0xf] }
 0x18a   : > { %1806 = vst.msk [vmem:[#allocation2 + $0xa8] sm:$0xf] %vm650_vm12, %v1767_v39  ;;  %1608 = vrot.lane.b32.xlu1 %v3697_v41, %s4443_s20  ;;  %v2318_v41 = vsel %vm4541_vm2, %v3845_v35, %v2317_v20  ;;  %v3857_v39 = vld [vmem:[%s4548_s10 + $0x254] sm:$0xf] }
 0x18b   : > { %1606 = vrot.lane.b32.xlu0 %v3696_v45, %s4443_s20  ;;  %v3852_v45 = vld [vmem:[%s4548_s10 + $0x228] sm:$0xf]  ;;  %2411 = vst.msk [vmem:[#allocation2 + $0xc4] sm:$0xf] %vm205_vm6, %v3855_v44  ;;  %2413 = vst.msk [vmem:[#allocation2 + $0xec] sm:$0xf] %vm205_vm6, %v3857_v39 }
 0x18c   : > { %v2341_v53 = vpop.permute.xlu1 %2340  ;;  %v2445_v54 = vld [vmem:[#allocation2 + $0xb4] sm:$0xff]  ;;  %2408 = vst.msk [vmem:[#allocation2 + $0x88] sm:$0xf] %vm205_vm6, %v3852_v45 }
 0x18d   : > { %2379 = vst.msk [vmem:[#allocation2 + $0xc0] sm:$0xf] %vm650_vm12, %v2341_v53  ;;  %v2339_v58 = vpop.permute.xlu0 %2338  ;;  %v2442_v59 = vld [vmem:[#allocation2 + $0xa0] sm:$0xff] }
 0x18e   : > { %v4321_v60 = vld [vmem:[#allocation2 + $0xa4] ss:$20 sps:$4 sm:$0xff]   ;;  %2378 = vst.msk [vmem:[#allocation2 + $0xac] sm:$0xf] %vm650_vm12, %v2339_v58  ;;  %2184 = vrot.lane.b32.xlu1 %v3813_v49, %s4443_s20  ;;  %v3883_v62 = vcombine.low %v2442_v59, %v2445_v54 }
 0x18f   : > { %2182 = vrot.lane.b32.xlu0 %v3812_v50, %s4443_s20  ;;  %3034 = vmatprep.mubr.bf16.mxu0 %v4321_v60  ;;  %v3858_v50 = vld [vmem:[%s4548_s10 + $0x264] sm:$0xf]  ;;  %s4445_s10 = smov [#allocation3]  }
 0x190   : > { %v933_v4 = vpop.permute.xlu1 %932  ;;  %3035 = vmatmul.mubr.bf16.gmra.mxu0 %v3883_v62  ;;  %2414 = vst.msk [vmem:[#allocation2 + $0x100] sm:$0xf] %vm205_vm6, %v3858_v50  ;;  %s4352_s11 = sshll.u32 %s4445_s10, 4  ;;  %s4353_s11 = int_to_ptr.vmem [resolvable:$false] %s4352_s11 }
 0x191   : > { %969 = vst.msk [vmem:[#allocation2 + $0xe0] sm:$0xf] %vm377_vm10, %v933_v4  ;;  %v931_v9 = vpop.permute.xlu0 %930 }
 0x192   : > { %968 = vst.msk [vmem:[#allocation2 + $0xcc] sm:$0xf] %vm377_vm10, %v931_v9  ;;  %632 = vrot.lane.b32.xlu1 %v601_v63, %s4444_s21 }
 0x193   : > { %630 = vrot.lane.b32.xlu0 %v598_v5, %s4444_s21 }
 0x194   : > { %v1505_v21 = vpop.permute.xlu1 %1504  ;;  %v2446_v23 = vld [vmem:[#allocation2 + $0xbc] sm:$0xff] }
 0x195   : > { %1541 = vst.msk [vmem:[#allocation2 + $0xe4] sm:$0xf] %vm377_vm10, %v1505_v21  ;;  %v1503_v26 = vpop.permute.xlu0 %1502  ;;  %v2443_v27 = vld [vmem:[#allocation2 + $0xa8] sm:$0xff] }
 0x196   : > { %v4323_v28 = vld [vmem:[#allocation2 + $0xac] ss:$20 sps:$4 sm:$0xff]   ;;  %1540 = vst.msk [vmem:[#allocation2 + $0xd0] sm:$0xf] %vm377_vm10, %v1503_v26  ;;  %1208 = vrot.lane.b32.xlu1 %v1177_v17, %s4444_s21  ;;  %v3885_v30 = vcombine.low %v2443_v27, %v2446_v23 }
 0x197   : > { %1206 = vrot.lane.b32.xlu0 %v1174_v22, %s4444_s21  ;;  %3131 = vmatprep.mubr.bf16.mxu1 %v4323_v28 }
 0x198   : > { %v2077_v34 = vpop.permute.xlu1 %2076  ;;  %3132 = vmatmul.mubr.bf16.gmra.mxu1 %v3885_v30 }
 0x199   : > { %2113 = vst.msk [vmem:[#allocation2 + $0xe8] sm:$0xf] %vm377_vm10, %v2077_v34  ;;  %v2075_v36 = vpop.permute.xlu0 %2074 }
 0x19a   : > { %2112 = vst.msk [vmem:[#allocation2 + $0xd4] sm:$0xf] %vm377_vm10, %v2075_v36  ;;  %1780 = vrot.lane.b32.xlu1 %v1749_v31, %s4444_s21 }
 0x19b   : > { %1778 = vrot.lane.b32.xlu0 %v1746_v13, %s4444_s21 }
 0x19c   : > { %v449_v40 = vpop.permute.xlu1 %448 }
 0x19d   : > { %486 = vst.msk [vmem:[#allocation2 + $0xdc] sm:$0xf] %vm474_vm11, %v449_v40  ;;  %v447_v46 = vpop.permute.xlu0 %446 }
 0x19e   : > { %485 = vst.msk [vmem:[#allocation2 + $0xc8] sm:$0xf] %vm474_vm11, %v447_v46  ;;  %2352 = vrot.lane.b32.xlu1 %v2321_v37, %s4444_s21 }
 0x19f   : > { %2350 = vrot.lane.b32.xlu0 %v2318_v41, %s4444_s21  ;;  %s175_s21 = sand.u32 1, %s4416_s13  }
 0x1a0   : > { %v1033_v48 = vpop.permute.xlu1 %1032  ;;  %s3457_s6 = sshll.u32 %s175_s21, 6  ;;  %s6038_s4 = scalar_lea.sflag [#allocation4], %s175_s21 }
 0x1a1   : > { %1069 = vst.msk [vmem:[#allocation2 + $0xe0] sm:$0xf] %vm474_vm11, %v1033_v48  ;;  %v1031_v49 = vpop.permute.xlu0 %1030  ;;  %s5999_s7 = scalar_lea.vmem [#allocation3], %s3457_s6  ;;  %s4354_s6 = scalar_lea.vmem %s4353_s11, 2048 }
 0x1a2   : > { %1068 = vst.msk [vmem:[#allocation2 + $0xcc] sm:$0xf] %vm474_vm11, %v1031_v49  ;;  %s3358_s24 = sshll.u32 %s5999_s7, 4  ;;  %s6033_s24 = int_to_ptr.vmem [resolvable:$true] %s3358_s24 }
 0x1a3   : > { %s4348_s5 = scalar_lea.vmem %s6033_s24, 1024  ;;  %p4355_p2 = scmp.lt.s32.totalorder %s6033_s24, %s4353_s11 }
 0x1a4   : > { %v1601_v53 = vpop.permute.xlu1 %1600  ;;  %p4349_p13 = scmp.ne.s32.totalorder %s6033_s24, %s4348_s5  ;;  %p4356_p4 = scmp.lt.s32.totalorder %s4354_s6, %s4348_s5 }
 0x1a5   : > { %1637 = vst.msk [vmem:[#allocation2 + $0xe4] sm:$0xf] %vm474_vm11, %v1601_v53  ;;  %v1599_v54 = vpop.permute.xlu0 %1598 }
 0x1a6   : > { %1636 = vst.msk [vmem:[#allocation2 + $0xd0] sm:$0xf] %vm474_vm11, %v1599_v54  ;;  %p4350_p0 = pnand %p4349_p13, %p4518_p3  ;;  %p4357_p5 = por %p4356_p4, %p4355_p2 }
 0x1a8   : > { %v2177_v55 = vpop.permute.xlu1 %2176  ;;  %p4351_p1 = pneg %p4350_p0 }
 0x1a9   : > { %2213 = vst.msk [vmem:[#allocation2 + $0xe8] sm:$0xf] %vm474_vm11, %v2177_v55  ;;  %v2175_v56 = vpop.permute.xlu0 %2174 }
 0x1aa   : > { %2212 = vst.msk [vmem:[#allocation2 + $0xd4] sm:$0xf] %vm474_vm11, %v2175_v56  ;;  %p4358_p6 = pnand %p4357_p5, %p4351_p1 }
 0x1ac   : > { %v625_v57 = vpop.permute.xlu1 %624 }
 0x1ad   : > { %662 = vst.msk [vmem:[#allocation2 + $0xdc] sm:$0xf] %vm650_vm12, %v625_v57  ;;  %v623_v58 = vpop.permute.xlu0 %622 }
 0x1ae   : > { %661 = vst.msk [vmem:[#allocation2 + $0xc8] sm:$0xf] %vm650_vm12, %v623_v58 }
 0x1b0   : > { %v1201_v59 = vpop.permute.xlu1 %1200 }
 0x1b1   : > { %1237 = vst.msk [vmem:[#allocation2 + $0xe0] sm:$0xf] %vm650_vm12, %v1201_v59  ;;  %v1199_v60 = vpop.permute.xlu0 %1198 }
 0x1b2   : > { %1236 = vst.msk [vmem:[#allocation2 + $0xcc] sm:$0xf] %vm650_vm12, %v1199_v60  ;;  %v4340_v60 = vld [vmem:[#allocation2 + $0x10] ss:$20 sps:$4 sm:$0xff]  }
 0x1b4   : > { %v1773_v61 = vpop.permute.xlu1 %1772 }
 0x1b5   : > { %1809 = vst.msk [vmem:[#allocation2 + $0xe4] sm:$0xf] %vm650_vm12, %v1773_v61  ;;  %v1771_v62 = vpop.permute.xlu0 %1770 }
 0x1b6   : > { %1808 = vst.msk [vmem:[#allocation2 + $0xd0] sm:$0xf] %vm650_vm12, %v1771_v62 }
 0x1b8   : > { %v2345_v63 = vpop.permute.xlu1 %2344  ;;  %v2451_v1 = vld [vmem:[#allocation2 + $0xdc] sm:$0xff] }
 0x1b9   : > { %2381 = vst.msk [vmem:[#allocation2 + $0xe8] sm:$0xf] %vm650_vm12, %v2345_v63  ;;  %v2343_v2 = vpop.permute.xlu0 %2342  ;;  %v2448_v3 = vld [vmem:[#allocation2 + $0xc8] sm:$0xff] }
 0x1ba   : > { %v4325_v4 = vld [vmem:[#allocation2 + $0xcc] ss:$20 sps:$4 sm:$0xff]   ;;  %2380 = vst.msk [vmem:[#allocation2 + $0xd4] sm:$0xf] %vm650_vm12, %v2343_v2  ;;  %v3888_v5 = vcombine.low %v2448_v3, %v2451_v1 }
 0x1bb   : > { %3042 = vmatprep.mubr.bf16.mxu0 %v4325_v4  ;;  %v4341_v2 = vld [vmem:[#allocation2 + $0x38] ss:$20 sps:$4 sm:$0xff]   ;;  %v4342_v3 = vld [vmem:[#allocation2 + $0x60] ss:$20 sps:$4 sm:$0xff]  }
 0x1bc   : > { %v937_v6 = vpop.permute.xlu1 %936  ;;  %3043 = vmatmul.mubr.bf16.gmra.mxu0 %v3888_v5 }
 0x1bd   : > { %971 = vst.msk [vmem:[#allocation2 + $0x108] sm:$0xf] %vm377_vm10, %v937_v6  ;;  %v935_v7 = vpop.permute.xlu0 %934  ;;  %v4343_v6 = vld [vmem:[#allocation2 + $0xb0] ss:$20 sps:$4 sm:$0xff]  }
 0x1be   : > { %970 = vst.msk [vmem:[#allocation2 + $0xf4] sm:$0xf] %vm377_vm10, %v935_v7 }
 0x1c0   : > { %v1509_v8 = vpop.permute.xlu1 %1508  ;;  %v2452_v9 = vld [vmem:[#allocation2 + $0xe4] sm:$0xff] }
 0x1c1   : > { %1543 = vst.msk [vmem:[#allocation2 + $0x10c] sm:$0xf] %vm377_vm10, %v1509_v8  ;;  %v1507_v10 = vpop.permute.xlu0 %1506  ;;  %v2449_v11 = vld [vmem:[#allocation2 + $0xd0] sm:$0xff]  ;;  %v4344_v8 = vld [vmem:[#allocation2 + $0x88] ss:$20 sps:$4 sm:$0xff]  }
 0x1c2   : > { %v4327_v14 = vld [vmem:[#allocation2 + $0xd4] ss:$20 sps:$4 sm:$0xff]   ;;  %1542 = vst.msk [vmem:[#allocation2 + $0xf8] sm:$0xf] %vm377_vm10, %v1507_v10  ;;  %v3890_v15 = vcombine.low %v2449_v11, %v2452_v9  ;;  %v4345_v9 = vld [vmem:[#allocation2 + $0xd8] ss:$20 sps:$4 sm:$0xff]  }
 0x1c3   : > { %3139 = vmatprep.mubr.bf16.mxu1 %v4327_v14  ;;  %v4346_v10 = vld [vmem:[#allocation2 + $0x100] ss:$20 sps:$4 sm:$0xff]   ;;  %v4347_v11 = vld [vmem:[#allocation2 + $0x128] ss:$20 sps:$4 sm:$0xff]   ;;  %v4049_v14 = vpop.f32.mrf.mxu0 }
 0x1c4   : > { %v2081_v16 = vpop.permute.xlu1 %2080  ;;  %3140 = vmatmul.mubr.bf16.gmra.mxu1 %v3890_v15 }
 0x1c5   : > { %2115 = vst.msk [vmem:[#allocation2 + $0x110] sm:$0xf] %vm377_vm10, %v2081_v16  ;;  %v2079_v17 = vpop.permute.xlu0 %2078  ;;  %v4050_v15 = vpop.f32.mrf.mxu0 }
 0x1c6   : > { %2114 = vst.msk [vmem:[#allocation2 + $0xfc] sm:$0xf] %vm377_vm10, %v2079_v17  ;;  %v4113_v17 = vpop.f32.mrf.mxu1 }
 0x1c7   : > { %v4052_v16 = vpop.f32.mrf.mxu0 }
 0x1c8   : > { %v453_v18 = vpop.permute.xlu1 %452 }
 0x1c9   : > { %488 = vst.msk [vmem:[#allocation2 + $0x104] sm:$0xf] %vm474_vm11, %v453_v18  ;;  %v451_v19 = vpop.permute.xlu0 %450  ;;  %v4053_v18 = vpop.f32.mrf.mxu0 }
 0x1ca   : > { %487 = vst.msk [vmem:[#allocation2 + $0xf0] sm:$0xf] %vm474_vm11, %v451_v19  ;;  %v4114_v19 = vpop.f32.mrf.mxu1 }
 0x1cc   : > { %v1037_v20 = vpop.permute.xlu1 %1036 }
 0x1cd   : > { %1071 = vst.msk [vmem:[#allocation2 + $0x108] sm:$0xf] %vm474_vm11, %v1037_v20  ;;  %v1035_v21 = vpop.permute.xlu0 %1034  ;;  %v4055_v20 = vpop.f32.mrf.mxu0 }
 0x1ce   : > { %1070 = vst.msk [vmem:[#allocation2 + $0xf4] sm:$0xf] %vm474_vm11, %v1035_v21  ;;  %v4116_v21 = vpop.f32.mrf.mxu1 }
 0x1d0   : > { %v1605_v22 = vpop.permute.xlu1 %1604 }
 0x1d1   : > { %1639 = vst.msk [vmem:[#allocation2 + $0x10c] sm:$0xf] %vm474_vm11, %v1605_v22  ;;  %v1603_v23 = vpop.permute.xlu0 %1602  ;;  %v4056_v22 = vpop.f32.mrf.mxu0 }
 0x1d2   : > { %1638 = vst.msk [vmem:[#allocation2 + $0xf8] sm:$0xf] %vm474_vm11, %v1603_v23  ;;  %v4117_v23 = vpop.f32.mrf.mxu1 }
 0x1d4   : > { %v2181_v24 = vpop.permute.xlu1 %2180 }
 0x1d5   : > { %2215 = vst.msk [vmem:[#allocation2 + $0x110] sm:$0xf] %vm474_vm11, %v2181_v24  ;;  %v2179_v25 = vpop.permute.xlu0 %2178  ;;  %v4058_v24 = vpop.f32.mrf.mxu0 }
 0x1d6   : > { %2214 = vst.msk [vmem:[#allocation2 + $0xfc] sm:$0xf] %vm474_vm11, %v2179_v25  ;;  %v4119_v25 = vpop.f32.mrf.mxu1 }
 0x1d8   : > { %v629_v26 = vpop.permute.xlu1 %628 }
 0x1d9   : > { %664 = vst.msk [vmem:[#allocation2 + $0x104] sm:$0xf] %vm650_vm12, %v629_v26  ;;  %v627_v27 = vpop.permute.xlu0 %626  ;;  %v4059_v26 = vpop.f32.mrf.mxu0 }
 0x1da   : > { %663 = vst.msk [vmem:[#allocation2 + $0xf0] sm:$0xf] %vm650_vm12, %v627_v27  ;;  %v4120_v27 = vpop.f32.mrf.mxu1 }
 0x1dc   : > { %v1205_v28 = vpop.permute.xlu1 %1204 }
 0x1dd   : > { %1239 = vst.msk [vmem:[#allocation2 + $0x108] sm:$0xf] %vm650_vm12, %v1205_v28  ;;  %v1203_v29 = vpop.permute.xlu0 %1202 }
 0x1de   : > { %1238 = vst.msk [vmem:[#allocation2 + $0xf4] sm:$0xf] %vm650_vm12, %v1203_v29  ;;  %v4122_v29 = vpop.f32.mrf.mxu1 }
 0x1e0   : > { %v1777_v30 = vpop.permute.xlu1 %1776 }
 0x1e1   : > { %1811 = vst.msk [vmem:[#allocation2 + $0x10c] sm:$0xf] %vm650_vm12, %v1777_v30  ;;  %v1775_v31 = vpop.permute.xlu0 %1774 }
 0x1e2   : > { %1810 = vst.msk [vmem:[#allocation2 + $0xf8] sm:$0xf] %vm650_vm12, %v1775_v31  ;;  %v4123_v31 = vpop.f32.mrf.mxu1 }
 0x1e4   : > { %v2349_v32 = vpop.permute.xlu1 %2348  ;;  %v2457_v33 = vld [vmem:[#allocation2 + $0x104] sm:$0xff] }
 0x1e5   : > { %2383 = vst.msk [vmem:[#allocation2 + $0x110] sm:$0xf] %vm650_vm12, %v2349_v32  ;;  %v2347_v34 = vpop.permute.xlu0 %2346  ;;  %v2454_v13 = vld [vmem:[#allocation2 + $0xf0] sm:$0xff] }
 0x1e6   : > { %v4330_v35 = vld [vmem:[#allocation2 + $0xf4] ss:$20 sps:$4 sm:$0xff]   ;;  %2382 = vst.msk [vmem:[#allocation2 + $0xfc] sm:$0xf] %vm650_vm12, %v2347_v34  ;;  %v3893_v36 = vcombine.low %v2454_v13, %v2457_v33 }
 0x1e7   : > { %3050 = vmatprep.mubr.bf16.mxu0 %v4330_v35 }
 0x1e8   : > { %v941_v37 = vpop.permute.xlu1 %940  ;;  %3051 = vmatmul.mubr.bf16.gmra.mxu0 %v3893_v36 }
 0x1e9   : > { %973 = vst.msk [vmem:[#allocation2 + $0x130] sm:$0xf] %vm377_vm10, %v941_v37  ;;  %v939_v38 = vpop.permute.xlu0 %938 }
 0x1ea   : > { %972 = vst.msk [vmem:[#allocation2 + $0x11c] sm:$0xf] %vm377_vm10, %v939_v38 }
 0x1ec   : > { %v1513_v12 = vpop.permute.xlu1 %1512  ;;  %v2458_v40 = vld [vmem:[#allocation2 + $0x10c] sm:$0xff] }
 0x1ed   : > { %1545 = vst.msk [vmem:[#allocation2 + $0x134] sm:$0xf] %vm377_vm10, %v1513_v12  ;;  %v1511_v41 = vpop.permute.xlu0 %1510  ;;  %v2455_v42 = vld [vmem:[#allocation2 + $0xf8] sm:$0xff] }
 0x1ee   : > { %v4332_v44 = vld [vmem:[#allocation2 + $0xfc] ss:$20 sps:$4 sm:$0xff]   ;;  %1544 = vst.msk [vmem:[#allocation2 + $0x120] sm:$0xf] %vm377_vm10, %v1511_v41  ;;  %v3895_v45 = vcombine.low %v2455_v42, %v2458_v40 }
 0x1ef   : > { %3147 = vmatprep.mubr.bf16.mxu1 %v4332_v44 }
 0x1f0   : > { %v2085_v46 = vpop.permute.xlu1 %2084  ;;  %3148 = vmatmul.mubr.bf16.gmra.mxu1 %v3895_v45 }
 0x1f1   : > { %2117 = vst.msk [vmem:[#allocation2 + $0x138] sm:$0xf] %vm377_vm10, %v2085_v46  ;;  %v2083_v47 = vpop.permute.xlu0 %2082 }
 0x1f2   : > { %2116 = vst.msk [vmem:[#allocation2 + $0x124] sm:$0xf] %vm377_vm10, %v2083_v47 }
 0x1f4   : > { %v457_v0 = vpop.permute.xlu1 %456 }
 0x1f5   : > { %490 = vst.msk [vmem:[#allocation2 + $0x12c] sm:$0xf] %vm474_vm11, %v457_v0  ;;  %v455_v39 = vpop.permute.xlu0 %454 }
 0x1f6   : > { %489 = vst.msk [vmem:[#allocation2 + $0x118] sm:$0xf] %vm474_vm11, %v455_v39 }
 0x1f8   : > { %v1041_v48 = vpop.permute.xlu1 %1040  ;;  %v4061_v28 = vpop.f32.mrf.mxu0 }
 0x1f9   : > { %1073 = vst.msk [vmem:[#allocation2 + $0x130] sm:$0xf] %vm474_vm11, %v1041_v48  ;;  %v1039_v49 = vpop.permute.xlu0 %1038 }
 0x1fa   : > { %1072 = vst.msk [vmem:[#allocation2 + $0x11c] sm:$0xf] %vm474_vm11, %v1039_v49  ;;  %v4062_v30 = vpop.f32.mrf.mxu0 }
 0x1fc   : > { %v1609_v50 = vpop.permute.xlu1 %1608  ;;  %v5914_v32 = vpop.f32.mrf.mxu0 }
 0x1fd   : > { %1641 = vst.msk [vmem:[#allocation2 + $0x134] sm:$0xf] %vm474_vm11, %v1609_v50  ;;  %v1607_v51 = vpop.permute.xlu0 %1606 }
 0x1fe   : > { %1640 = vst.msk [vmem:[#allocation2 + $0x120] sm:$0xf] %vm474_vm11, %v1607_v51  ;;  %v5918_v34 = vpop.f32.mrf.mxu0 }
 0x200   : > { %v2185_v43 = vpop.permute.xlu1 %2184  ;;  %v5916_v33 = vpop.f32.mrf.mxu1 }
 0x201   : > { %2217 = vst.msk [vmem:[#allocation2 + $0x138] sm:$0xf] %vm474_vm11, %v2185_v43  ;;  %v2183_v52 = vpop.permute.xlu0 %2182 }
 0x202   : > { %2216 = vst.msk [vmem:[#allocation2 + $0x124] sm:$0xf] %vm474_vm11, %v2183_v52  ;;  %v5920_v13 = vpop.f32.mrf.mxu1 }
 0x204   : > { %v633_v53 = vpop.permute.xlu1 %632  ;;  %v5924_v36 = vpop.f32.mrf.mxu1 }
 0x205   : > { %666 = vst.msk [vmem:[#allocation2 + $0x12c] sm:$0xf] %vm650_vm12, %v633_v53  ;;  %v631_v54 = vpop.permute.xlu0 %630 }
 0x206   : > { %665 = vst.msk [vmem:[#allocation2 + $0x118] sm:$0xf] %vm650_vm12, %v631_v54  ;;  %v4129_v38 = vpop.f32.mrf.mxu1 }
 0x208   : > { %v1209_v55 = vpop.permute.xlu1 %1208 }
 0x209   : > { %1241 = vst.msk [vmem:[#allocation2 + $0x130] sm:$0xf] %vm650_vm12, %v1209_v55  ;;  %v1207_v56 = vpop.permute.xlu0 %1206 }
 0x20a   : > { %1240 = vst.msk [vmem:[#allocation2 + $0x11c] sm:$0xf] %vm650_vm12, %v1207_v56 }
 0x20c   : > { %v1781_v57 = vpop.permute.xlu1 %1780 }
 0x20d   : > { %1813 = vst.msk [vmem:[#allocation2 + $0x134] sm:$0xf] %vm650_vm12, %v1781_v57  ;;  %v1779_v58 = vpop.permute.xlu0 %1778  ;;  %v4337_v63 = vld [vmem:[#allocation2 + $0x118] ss:$20 sps:$4 sm:$0xff]  }
 0x20e   : > { %1812 = vst.msk [vmem:[#allocation2 + $0x120] sm:$0xf] %vm650_vm12, %v1779_v58 }
 0x210   : > { %v2353_v59 = vpop.permute.xlu1 %2352 }
 0x211   : > { %2385 = vst.msk [vmem:[#allocation2 + $0x138] sm:$0xf] %vm650_vm12, %v2353_v59  ;;  %v2351_v61 = vpop.permute.xlu0 %2350  ;;  %v4335_v62 = vld [vmem:[#allocation2 + $0x11c] ss:$20 sps:$4 sm:$0xff]  }
 0x212   : > { %2384 = vst.msk [vmem:[#allocation2 + $0x124] sm:$0xf] %vm650_vm12, %v2351_v61  ;;  %3058 = vmatprep.mubr.bf16.mxu0 %v4335_v62 }
 0x213   : > { %3059 = vmatmul.mubr.bf16.gmra.mxu0 %v4337_v63 }
 0x214   : > { %4175 = vmatprep.mubr.msk.bf16.mxu0 %vm2945_vm13, %v4340_v60 }
 0x218   : > { %v2464_v1 = vld [vmem:[#allocation2 + $0x134] sm:$0xff] }
 0x219   : > { %v2461_v4 = vld [vmem:[#allocation2 + $0x120] sm:$0xff] }
 0x21a   : > { %v4338_v5 = vld [vmem:[#allocation2 + $0x124] ss:$20 sps:$4 sm:$0xff]   ;;  %v3900_v7 = vcombine.low %v2461_v4, %v2464_v1 }
 0x21b   : > { %3155 = vmatprep.mubr.bf16.mxu1 %v4338_v5  ;;  %4176 = vmatmul.mubr.msk.bf16.vlgmr.msra.gmra.mxu0 %vm2945_vm13, %v4341_v2  ;;  %v4051_v5 = vadd.f32 %v4050_v15, %v4049_v14 }
 0x21c   : > { %3156 = vmatmul.mubr.bf16.gmra.mxu1 %v3900_v7  ;;  %4179 = vmatprep.mubr.msk.bf16.mxu0 %vm2945_vm13, %v4342_v3  ;;  %v4054_v7 = vadd.f32 %v4053_v18, %v4052_v16 }
 0x21d   : > { %4183 = vmatprep.mubr.msk.bf16.mxu1 %vm2945_vm13, %v4343_v6  ;;  %v5961_v6 = vld [vmem:[%s6093_s2] ss:$0 sm:$0xff] }
 0x21e   : > { %v3005_v14 = vadd.f32 %v4051_v5, %v5961_v6  ;;  %v3008_v15 = vadd.f32 %v4054_v7, %v5961_v6 }
 0x223   : > { %4180 = vmatmul.mubr.msk.bf16.gmra.mxu0 %vm2945_vm13, %v4344_v8  ;;  %v4057_v8 = vadd.f32 %v4056_v22, %v4055_v20 }
 0x224   : > { %4184 = vmatmul.mubr.msk.bf16.vlgmr.msra.gmra.mxu1 %vm2945_vm13, %v4345_v9  ;;  %v5922_v35 = vpop.f32.mrf.mxu0  ;;  %v4060_v9 = vadd.f32 %v4059_v26, %v4058_v24 }
 0x225   : > { %4187 = vmatprep.mubr.msk.bf16.mxu1 %vm2945_vm13, %v4346_v10  ;;  %v3013_v16 = vadd.f32 %v4057_v8, %v5961_v6 }
 0x226   : > { %v5926_v37 = vpop.f32.mrf.mxu0  ;;  %v3016_v18 = vadd.f32 %v4060_v9, %v5961_v6 }
 0x228   : > { %v5928_v12 = vpop.f32.mrf.mxu0 }
 0x22a   : > { %v4071_v41 = vpop.f32.mrf.mxu0 }
 0x22c   : > { %4188 = vmatmul.mubr.msk.bf16.gmra.mxu1 %vm2945_vm13, %v4347_v11  ;;  %v5930_v40 = vpop.f32.mrf.mxu1  ;;  %v4115_v11 = vadd.f32 %v4114_v19, %v4113_v17 }
 0x22e   : > { %v4132_v42 = vpop.f32.mrf.mxu1  ;;  %v3102_v19 = vadd.f32 %v4115_v11, %v3005_v14 }
 0x230   : > { %v5932_v45 = vpop.f32.mrf.mxu1 }
 0x232   : > { %v5934_v47 = vpop.f32.mrf.mxu1 }
 0x250   : > { %v4073_v44 = vpop.f32.mrf.mxu0 }
 0x252   : > { %v4074_v46 = vpop.f32.mrf.mxu0 }
 0x254   : > { %v4076_v0 = vpop.f32.mrf.mxu0 }
 0x256   : > { %v4077_v48 = vpop.f32.mrf.mxu0 }
 0x258   : > { %v5936_v39 = vpop.f32.mrf.mxu1 }
 0x25a   : > { %v5938_v49 = vpop.f32.mrf.mxu1 }
 0x25c   : > { %v4140_v51 = vpop.f32.mrf.mxu1 }
 0x25e   : > { %v4141_v52 = vpop.f32.mrf.mxu1 }
 0x27c   : > { %v4079_v50 = vpop.f32.mrf.mxu0 }
 0x27e   : > { %v4080_v43 = vpop.f32.mrf.mxu0 }
 0x27f   : > { %v4081_v7 = vadd.f32 %v4080_v43, %v4079_v50 }
 0x280   : > { %v4082_v53 = vpop.f32.mrf.mxu0 }
 0x282   : > { %v4083_v55 = vpop.f32.mrf.mxu0 }
 0x284   : > { %v4143_v54 = vpop.f32.mrf.mxu1 }
 0x286   : > { %v4144_v56 = vpop.f32.mrf.mxu1 }
 0x288   : > { %v4146_v58 = vpop.f32.mrf.mxu1 }
 0x28a   : > { %v4147_v60 = vpop.f32.mrf.mxu1 }
 0x2a8   : > { %v5940_v57 = vpop.f32.mrf.mxu0 }
 0x2aa   : > { %v5942_v59 = vpop.f32.mrf.mxu0 }
 0x2ab   : > { %v4087_v14 = vadd.f32 %v5942_v59, %v5940_v57 }
 0x2ac   : > { %v5944_v61 = vpop.f32.mrf.mxu0 }
 0x2ae   : > { %v5948_v63 = vpop.f32.mrf.mxu0 }
 0x2af   : > { %6104 = vst [vmem:[#allocation7_spill] sm:$0xff] %v5948_v63  ;;  %v4063_v63 = vadd.f32 %v4062_v30, %v4061_v28  ;;  %v4127_v28 = vadd.f32 %v5920_v13, %v5916_v33  ;;  %v4069_v30 = vadd.f32 %v5926_v37, %v5922_v35  ;;  %v4136_v33 = vadd.f32 %v5934_v47, %v5932_v45 }
 0x2b0   : > { %v5946_v62 = vpop.f32.mrf.mxu1  ;;  %v4139_v13 = vadd.f32 %v5938_v49, %v5936_v39  ;;  %v4142_v35 = vadd.f32 %v4141_v52, %v4140_v51  ;;  %v3045_v49 = vadd.f32 %v4081_v7, %v5961_v6 }
 0x2b1   : > { %6103 = vst [vmem:[#allocation6_spill] sm:$0xff] %v5946_v62  ;;  %v4121_v62 = vadd.f32 %v4120_v27, %v4119_v25  ;;  %v4066_v27 = vadd.f32 %v5918_v34, %v5914_v32  ;;  %v4084_v32 = vadd.f32 %v4083_v55, %v4082_v53 }
 0x2b2   : > { %v5950_v1 = vpop.f32.mrf.mxu1 }
 0x2b3   : > { %6105 = vst [vmem:[#allocation8_spill] sm:$0xff] %v5950_v1  ;;  %v4118_v1 = vadd.f32 %v4117_v23, %v4116_v21  ;;  %v3021_v21 = vadd.f32 %v4063_v63, %v5961_v6  ;;  %v3110_v22 = vadd.f32 %v4121_v62, %v3013_v16  ;;  %v4133_v62 = vadd.f32 %v4132_v42, %v5930_v40 }
 0x2b4   : > { %v5954_v3 = vpop.f32.mrf.mxu1  ;;  %v4075_v63 = vadd.f32 %v4074_v46, %v4073_v44  ;;  %v3024_v44 = vadd.f32 %v4066_v27, %v5961_v6  ;;  %v3029_v46 = vadd.f32 %v4069_v30, %v5961_v6  ;;  %v3048_v50 = vadd.f32 %v4084_v32, %v5961_v6 }
 0x2b5   : > { %6107 = vst [vmem:[#allocation10_spill] sm:$0xff] %v5954_v3  ;;  %v3105_v26 = vadd.f32 %v4118_v1, %v3008_v15  ;;  %v3118_v52 = vadd.f32 %v4127_v28, %v3021_v21 }
 0x2b6   : > { %v5965_v3 = vpop.f32.mrf.mxu1  ;;  %v3126_v43 = vadd.f32 %v4133_v62, %v3029_v46  ;;  %v6109_v15 = vld [vmem:[#allocation7_spill] sm:$0xff] }
 0x2b7   : > { %v4090_v16 = vadd.f32 %v6109_v15, %v5944_v61 }
 0x2bc   : > { %v6114_v32 = vld [vmem:[#allocation10_spill] sm:$0xff] }
 0x2d3   : > { %v5952_v2 = vpop.f32.mrf.mxu0 }
 0x2d4   : > { %6106 = vst [vmem:[#allocation9_spill] sm:$0xff] %v5952_v2  ;;  %v4124_v2 = vadd.f32 %v4123_v31, %v4122_v29  ;;  %v4130_v29 = vadd.f32 %v4129_v38, %v5924_v36  ;;  %v4072_v31 = vadd.f32 %v4071_v41, %v5928_v12  ;;  %v4145_v36 = vadd.f32 %v4144_v56, %v4143_v54 }
 0x2d5   : > { %v5956_v4 = vpop.f32.mrf.mxu0  ;;  %v4148_v12 = vadd.f32 %v4147_v60, %v4146_v58 }
 0x2d6   : > { %6108 = vst [vmem:[#allocation11_spill] sm:$0xff] %v5956_v4  ;;  %v3113_v25 = vadd.f32 %v4124_v2, %v3016_v18  ;;  %v4078_v2 = vadd.f32 %v4077_v48, %v4076_v0  ;;  %v3032_v0 = vadd.f32 %v4072_v31, %v5961_v6  ;;  %v3037_v48 = vadd.f32 %v4075_v63, %v5961_v6 }
 0x2d7   : > { %v5963_v10 = vpop.f32.mrf.mxu0  ;;  %v3121_v56 = vadd.f32 %v4130_v29, %v3024_v44  ;;  %v3142_v58 = vadd.f32 %v4145_v36, %v3045_v49  ;;  %v3145_v9 = vadd.f32 %v4148_v12, %v3048_v50  ;;  %v3056_v36 = vadd.f32 %v4090_v16, %v5961_v6 }
 0x2d8   : > { %v3040_v39 = vadd.f32 %v4078_v2, %v5961_v6  ;;  %v3129_v55 = vadd.f32 %v4136_v33, %v3032_v0  ;;  %v3134_v60 = vadd.f32 %v4139_v13, %v3037_v48  ;;  %v6112_v2 = vld [vmem:[#allocation6_spill] sm:$0xff] }
 0x2d9   : > { %v5967_v4 = vpop.f32.mrf.mxu0 }
 0x2da   : > { %v3137_v11 = vadd.f32 %v4142_v35, %v3040_v39  ;;  %v4096_v21 = vadd.f32 %v5967_v4, %v5963_v10  ;;  %v3053_v35 = vadd.f32 %v4087_v14, %v5961_v6 }
 0x2db   : > { %v4177_v17 = vpop.f32.mrf.mxu0  ;;  %v6110_v18 = vld [vmem:[#allocation9_spill] sm:$0xff] }
 0x2dc   : > { %v5973_v20 = vpop.f32.mrf.mxu1  ;;  %v3207_v34 = vadd.f32 %v4177_v17, %v3110_v22 }
 0x2dd   : > { %v3198_v24 = vpop.f32.mrf.mxu0  ;;  %v6111_v17 = vld [vmem:[#allocation11_spill] sm:$0xff] }
 0x2de   : > { %v4156_v23 = vpop.f32.mrf.mxu1  ;;  %v3199_v40 = vadd.f32 %v3198_v24, %v3102_v19  ;;  %v4093_v19 = vadd.f32 %v6111_v17, %v6110_v18 }
 0x2df   : > { %v4178_v5 = vpop.f32.mrf.mxu0  ;;  %v4157_v29 = vadd.f32 %v4156_v23, %v5973_v20  ;;  %v4154_v20 = vadd.f32 %v5965_v3, %v6114_v32 }
 0x2e0   : > { %v4158_v1 = vpop.f32.mrf.mxu1  ;;  %v3210_v8 = vadd.f32 %v4178_v5, %v3113_v25  ;;  %v6113_v5 = vld [vmem:[#allocation8_spill] sm:$0xff] }
 0x2e1   : > { %v3201_v38 = vpop.f32.mrf.mxu0  ;;  %v4151_v7 = vadd.f32 %v6113_v5, %v6112_v2 }
 0x2e2   : > { %v4159_v37 = vpop.f32.mrf.mxu1  ;;  %v3994_v41 = vpack.c.bf16 %v3210_v8, %v3207_v34  ;;  %v3202_v42 = vadd.f32 %v3201_v38, %v3105_v26  ;;  %v3064_v34 = vadd.f32 %v4096_v21, %v5961_v6 }
 0x2e3   : > { %v4181_v45 = vpop.f32.mrf.mxu0  ;;  %v4160_v57 = vadd.f32 %v4159_v37, %v4158_v1  ;;  %v3061_v1 = vadd.f32 %v4093_v19, %v5961_v6 }
 0x2e4   : > { %v4185_v47 = vpop.f32.mrf.mxu1  ;;  %4026 = vst [vmem:[%s5999_s7 + $0x8] sm:$0xff] %v3994_v41   ;;  %v3989_v51 = vpack.c.bf16 %v3202_v42, %v3199_v40  ;;  %v3223_v25 = vadd.f32 %v4181_v45, %v3126_v43  ;;  %v3150_v40 = vadd.f32 %v4151_v7, %v3053_v35  ;;  %v3153_v42 = vadd.f32 %v4154_v20, %v3056_v36 }
 0x2e5   : > { %v3214_v53 = vpop.f32.mrf.mxu0  ;;  %v3239_v26 = vadd.f32 %v4185_v47, %v3142_v58  ;;  %v3158_v3 = vadd.f32 %v4157_v29, %v3061_v1  ;;  %v3161_v37 = vadd.f32 %v4160_v57, %v3064_v34 }
 0x2e6   : > { %v3230_v54 = vpop.f32.mrf.mxu1  ;;  %3990 = vst [vmem:[%s5999_s7] sm:$0xff] %v3989_v51   ;;  %v3215_v59 = vadd.f32 %v3214_v53, %v3118_v52 }
 0x2e7   : > { %v4182_v22 = vpop.f32.mrf.mxu0  ;;  %v3231_v61 = vadd.f32 %v3230_v54, %v3134_v60 }
 0x2e8   : > { %v4186_v24 = vpop.f32.mrf.mxu1  ;;  %v3226_v27 = vadd.f32 %v4182_v22, %v3129_v55 }
 0x2e9   : > { %v3242_v28 = vadd.f32 %v4186_v24, %v3145_v9  ;;  %v3217_v30 = vpop.f32.mrf.mxu0 }
 0x2ea   : > { %v3233_v31 = vpop.f32.mrf.mxu1  ;;  %v4004_v62 = vpack.c.bf16 %v3226_v27, %v3223_v25  ;;  %v3218_v4 = vadd.f32 %v3217_v30, %v3121_v56 }
 0x2eb   : > { %v4014_v63 = vpack.c.bf16 %v3242_v28, %v3239_v26  ;;  %v3234_v10 = vadd.f32 %v3233_v31, %v3137_v11 }
 0x2ec   : > { %v4189_v23 = vpop.f32.mrf.mxu1  ;;  %4028 = vst [vmem:[%s5999_s7 + $0x18] sm:$0xff] %v4004_v62   ;;  %v3999_v8 = vpack.c.bf16 %v3218_v4, %v3215_v59 }
 0x2ed   : > { %4030 = vst [vmem:[%s5999_s7 + $0x28] sm:$0xff] %v4014_v63   ;;  %v4009_v33 = vpack.c.bf16 %v3234_v10, %v3231_v61  ;;  %v3255_v12 = vadd.f32 %v4189_v23, %v3158_v3 }
 0x2ee   : > { %v3246_v13 = vpop.f32.mrf.mxu1  ;;  %4027 = vst [vmem:[%s5999_s7 + $0x10] sm:$0xff] %v3999_v8  }
 0x2ef   : > { %4029 = vst [vmem:[%s5999_s7 + $0x20] sm:$0xff] %v4009_v33   ;;  %v3247_v46 = vadd.f32 %v3246_v13, %v3150_v40 }
 0x2f0   : > { %v4190_v38 = vpop.f32.mrf.mxu1 }
 0x2f1   : > { %v3258_v41 = vadd.f32 %v4190_v38, %v3161_v37 }
 0x2f2   : > { %v3249_v44 = vpop.f32.mrf.mxu1 }
 0x2f3   : > { %v4024_v0 = vpack.c.bf16 %v3258_v41, %v3255_v12  ;;  %v3250_v48 = vadd.f32 %v3249_v44, %v3153_v42 }
 0x2f5   : > { %4032 = vst [vmem:[%s5999_s7 + $0x38] sm:$0xff] %v4024_v0   ;;  %v4019_v6 = vpack.c.bf16 %v3250_v48, %v3247_v46 }
 0x2f7   : > { %4031 = vst [vmem:[%s5999_s7 + $0x30] sm:$0xff] %v4019_v6  }
 0x2f8   : > { %4361 = shalt.err (!%p4358_p6)
}
 0x2f9   : > { %s4362_s21 = scalar_lea.hbm %s6030_s29, 1024  ;;  %s4366_s9 = scalar_lea.hbm %s6094_s3, 4096 }
 0x2fa   : > { %p4363_p7 = scmp.ne.s32.totalorder %s6030_s29, %s4362_s21  ;;  %p4367_p11 = scmp.lt.s32.totalorder %s6030_s29, %s6094_s3 }
 0x2fb   : > { %p4368_p12 = scmp.lt.s32.totalorder %s4366_s9, %s4362_s21 }
 0x2fc   : > { %p4364_p9 = pnand %p4363_p7, %p4518_p3 }
 0x2fd   : > { %p4369_p13 = por %p4368_p12, %p4367_p11 }
 0x2fe   : > { %p4365_p10 = pneg %p4364_p9 }
 0x300   : > { %p4370_p0 = pnand %p4369_p13, %p4365_p10 }
 0x302   : > { %4373 = shalt.err (!%p4370_p0)
}
 0x303   : > { %s4446_s27 = smov 4  }
 0x304   : > { %4196 = dma.vmem_to_hbm [thread:$0]  (%p4518_p3), %s6033_s24, 1024, %s6030_s29, %s6038_s4, %s4443_s20, %s4443_s20, %s4446_s27  }
 0x305 PF: > { %p4202_p1 = scmp.ge.s32.totalorder %s4440_s19, 2  ;;  %s3373_s28 = sand.u32 1, %s4412_s12  }
 0x306   : > { %s3374_s5 = scalar_lea.sflag [#allocation4], %s3373_s28 }
 0x307   : > { %p4199_p2 = pnand %p4202_p1, %p4527_p8 }
 0x309   : > { %p4200_p4 = pneg %p4199_p2 }
 0x30b   : > { %4407 = dma.done.wait (%p4200_p4), %s3374_s5, 1024  }
 0x30c   : > { %4409 = vsyncadd (%p4200_p4), %s3374_s5, 4294966272  ;;  %s16_s19 = sadd.s32 1, %s4440_s19   ;;  %s6115_s12 = smov %s4416_s13 }
 0x30d   : > { %p13_p5 = scmp.ge.s32.totalorder %s16_s19, 6   ;;  %s6116_s13 = smov %s4420_s14 }
 0x30e   : > { %s6117_s14 = smov %s4536_s30  ;;  %s6118_s15 = smov %s4432_s17 }
 0x30f   : > { %s6119_s16 = smov %s4436_s18  ;;  %s6120_s17 = smov %s6123_s22 }
 0x310   : > { %s6121_s18 = smov %s6127_s23  ;;  %15 = sbr.rel (!%p13_p5) target bundleno = 5 (0x5), region = 72 }
 0x315   :  { %3379 = vsyncpa [#allocation4], 1 }
 0x316   :  { %3381 = vsyncpa [#allocation4 + $0x1], 1 }

</bundles_post_ra>
